<compile_context>
chip_gen: v6e
topology: v6e:2x2x1
jax: 0.10.0
libtpu: 0.0.40
codegen_flags: <defaults>
</compile_context>

<pallas_src>
import numpy as np
import jax
import jax.numpy as jnp
from jax.experimental import pallas as pl
from jax.experimental.pallas import tpu as pltpu

NUM_HEADS = 4
LEAKY_SLOPE = 0.2
NEG_INF = -1e30
OUT_LANES = 128     # lane-dense width of the final output stores
ROW_PAD = 8         # pad each node type's node count to a multiple of 8 sublanes


# ----------------------------------------------------------------------------
# Host-side layout helpers
# ----------------------------------------------------------------------------
def _stack_layout(ntypes, n_nodes):
    npad = {nt: int(np.ceil(n_nodes[nt] / ROW_PAD) * ROW_PAD) for nt in ntypes}
    row_off, off = {}, 0
    for nt in ntypes:
        row_off[nt] = off
        off += npad[nt]
    return npad, row_off, off


def _pack_layer(head_params, fin, dout, cetypes, ntypes, num_heads, z_scale):
    """One block-diagonal packed (W, b) for the whole layer.

    Column layout (global), per node type block:
      [ H*D cols per edge with src==nt ]  z_src, heads stacked along lanes
      [ H   cols per edge with src==nt ]  att_src  (a_src folded:  W @ a)
      [ H   cols per edge with dst==nt ]  att_dst  (a_dst folded:  W @ a)
    Rows are block-diagonal over node-type feature blocks, so cross-type
    "junk" entries of the stacked activations never leak into real outputs.
    `z_scale` (1/H for the final 'avg' layer) is applied to the z columns only.
    """
    f_off, F_total = {}, 0
    for nt in ntypes:
        f_off[nt] = F_total
        F_total += fin[nt]

    seg, C_total = {}, 0
    for nt in ntypes:
        local = C_total
        for (s, e, d) in cetypes:
            if s == nt:
                seg[(e, 'src_z')] = local
                local += num_heads * dout[d]
        for (s, e, d) in cetypes:
            if s == nt:
                seg[(e, 'src_a')] = local
                local += num_heads
        for (s, e, d) in cetypes:
            if d == nt:
                seg[(e, 'dst_a')] = local
                local += num_heads
        C_total = local

    W = np.zeros((F_total, C_total), np.float32)
    b = np.zeros((1, C_total), np.float32)
    for nt in ntypes:
        fo, fn = f_off[nt], fin[nt]
        for (s, e, d) in cetypes:
            if s == nt:
                D = dout[d]
                zo, ao = seg[(e, 'src_z')], seg[(e, 'src_a')]
                for h in range(num_heads):
                    p = head_params[h][e]
                    W[fo:fo + fn, zo + h * D: zo + (h + 1) * D] = \
                        np.asarray(p['W_src']) * z_scale
                    b[0, zo + h * D: zo + (h + 1) * D] = \
                        np.asarray(p['b_src'])[0] * z_scale
                    W[fo:fo + fn, ao + h: ao + h + 1] = \
                        np.asarray(p['W_src'] @ p['a_src'])
                    b[0, ao + h] = float(np.asarray(p['b_src'] @ p['a_src'])[0, 0])
            if d == nt:
                co = seg[(e, 'dst_a')]
                for h in range(num_heads):
                    p = head_params[h][e]
                    W[fo:fo + fn, co + h: co + h + 1] = \
                        np.asarray(p['W_dst'] @ p['a_dst'])
                    b[0, co + h] = float(np.asarray(p['b_dst'] @ p['a_dst'])[0, 0])

    return (jnp.asarray(W, jnp.bfloat16), jnp.asarray(b, jnp.float32),
            seg, f_off, F_total, C_total)


def _build_masks(adjs, cetypes, n_nodes, row_off, n_stack, num_heads):
    """Additive softmax masks in the stacked node space, tiled per head:
    masks[e][d, h*N + s] = 0 for real edge s->d, else -1e30 (includes padding
    rows/cols and cross-node-type positions)."""
    masks = {}
    for (s, e, d) in cetypes:
        base = np.full((n_stack, n_stack), NEG_INF, np.float32)
        a = np.asarray(adjs[e], np.float32)
        blk = np.where(a > 0.0, 0.0, NEG_INF).astype(np.float32)
        base[row_off[d]:row_off[d] + n_nodes[d],
             row_off[s]:row_off[s] + n_nodes[s]] = blk
        masks[e] = jnp.asarray(np.tile(base, (1, num_heads)))
    return masks


def _stack_features(feat_dict, fin, f_off, f_total, n_nodes, row_off, n_stack):
    x = jnp.zeros((n_stack, f_total), jnp.float32)
    for nt in feat_dict:
        x = x.at[row_off[nt]:row_off[nt] + n_nodes[nt],
                 f_off[nt]:f_off[nt] + fin[nt]].set(
            feat_dict[nt].astype(jnp.float32))
    return x


# ----------------------------------------------------------------------------
# Fully fused forward pass: one pallas_call for all 4 layers.
# ----------------------------------------------------------------------------
def build_fused_forward(params, in_dim, hid_dim, out_dim, cetypes, ntypes,
                        n_nodes, adjs, num_heads=NUM_HEADS):
    npad, row_off, n_stack = _stack_layout(ntypes, n_nodes)
    hid_in = {k: hid_dim[k] * num_heads for k in hid_dim}
    layer_dims = [(in_dim, hid_dim), (hid_in, hid_dim),
                  (hid_in, hid_dim), (hid_in, out_dim)]
    merges = ('cat', 'cat', 'cat', 'avg')
    num_layers = len(layer_dims)
    n_edges = len(cetypes)
    H = num_heads
    HN = H * n_stack

    packed, metas = [], []
    for li, (fin, dout) in enumerate(layer_dims):
        z_scale = (1.0 / H) if merges[li] == 'avg' else 1.0
        W, b, seg, f_off, Ft, Ct = _pack_layer(
            params[f'layer{li + 1}'], fin, dout, cetypes, ntypes, H, z_scale)
        packed += [W, b]
        metas.append(dict(seg=seg, dout=dout, merge=merges[li],
                          f_off=f_off, F=Ft, C=Ct))

    masks = _build_masks(adjs, cetypes, n_nodes, row_off, n_stack, H)

    # Host-side constants (hoisted: no in-kernel iota / select / broadcast).
    e_exp = jnp.asarray(np.kron(np.eye(H, dtype=np.float32),
                                np.ones((1, n_stack), np.float32)))   # [H, H*N]
    tid = jnp.asarray(np.tile(np.eye(n_stack, dtype=np.float32), (1, H)))  # [N, H*N]
    ones_nn = jnp.ones((n_stack, n_stack), jnp.float32)
    s_sum = jnp.asarray(np.kron(np.eye(H, dtype=np.float32),
                                np.ones((n_stack, 1), np.float32)))   # [H*N, H]
    bm_ds = sorted({metas[li]['dout'][d]
                    for li in range(num_layers)
                    if metas[li]['merge'] == 'cat'
                    for (_, _, d) in cetypes})
    bms = [jnp.asarray(np.kron(np.eye(H, dtype=np.float32),
                               np.ones((n_stack, D), np.float32)))    # [H*N, H*D]
           for D in bm_ds]
    bm_idx = {D: i for i, D in enumerate(bm_ds)}

    def kernel(*refs):
        i = 0
        x_ref = refs[i]; i += 1
        mask_refs = {}
        for (_, e, _) in cetypes:
            mask_refs[e] = refs[i]; i += 1
        eexp = refs[i][...]; i += 1
        tid_c = refs[i][...]; i += 1
        ones_c = refs[i][...]; i += 1
        ssum_c = refs[i][...]; i += 1
        bm_cs = []
        for _ in bm_ds:
            bm_cs.append(refs[i][...]); i += 1
        wb = refs[i:i + 2 * num_layers]; i += 2 * num_layers
        out_refs = refs[i:]

        x = x_ref[...]                               # stacked node features
        for li, meta in enumerate(metas):
            seg, dout, merge = meta['seg'], meta['dout'], meta['merge']
            w_ref, b_ref = wb[2 * li], wb[2 * li + 1]

            # One fused transform per layer: all node types / heads / edge-type
            # roles / folded attention vectors. bf16 operands, f32 accumulation.
            z = jnp.dot(x.astype(jnp.bfloat16), w_ref[...],
                        preferred_element_type=jnp.float32) + b_ref[...]

            agg = {nt: None for nt in ntypes}
            for (s_nt, e, d_nt) in cetypes:
                D = dout[d_nt]
                HD = H * D
                zo = seg[(e, 'src_z')]
                so = seg[(e, 'src_a')]
                do = seg[(e, 'dst_a')]
                zs = z[:, zo:zo + HD]                # [N, H*D]
                att_s = z[:, so:so + H]              # [N, H]
                att_d = z[:, do:do + H]              # [N, H]

                # Logits for ALL heads in one [N, H*N] tile (heads along
                # lanes):  l[d, h*N+s] = att_d[d, h] + att_s[s, h].
                # Built with constant-operand MXU expansions (no transposes,
                # no in-kernel iotas).
                ad_exp = jnp.dot(att_d, eexp, preferred_element_type=jnp.float32)
                q = jnp.dot(att_s, eexp, preferred_element_type=jnp.float32) * tid_c
                as_exp = jnp.dot(ones_c, q, preferred_element_type=jnp.float32)
                lg = ad_exp + as_exp
                lg = jnp.where(lg >= 0.0, lg, LEAKY_SLOPE * lg) + mask_refs[e][...]

                # ONE softmax chain per edge type (heads batched).  The
                # per-row max over all heads is a valid per-segment shift.
                mx = jnp.max(lg, axis=-1, keepdims=True)
                p = jnp.exp(lg - mx)
                denom = jnp.dot(p, ssum_c, preferred_element_type=jnp.float32)
                inv = pl.reciprocal(denom, approx=True)            # [N, H]
                alpha = p * jnp.dot(inv, eexp, preferred_element_type=jnp.float32)

                # ONE aggregation matmul per edge type.
                if merge == 'cat':
                    # Block-diagonal zs: head h's message lands directly in
                    # lanes h*D:(h+1)*D of the packed ('cat') layout.
                    rhs = jnp.concatenate([zs] * H, axis=0) * bm_cs[bm_idx[D]]
                else:
                    # 'avg': every head accumulates into the same D lanes
                    # (1/H already folded into the packed layer-4 z weights).
                    rhs = jnp.concatenate(
                        [zs[:, h * D:(h + 1) * D] for h in range(H)], axis=0)
                msg = jnp.dot(alpha.astype(jnp.bfloat16),
                              rhs.astype(jnp.bfloat16),
                              preferred_element_type=jnp.float32)
                agg[d_nt] = msg if agg[d_nt] is None else agg[d_nt] + msg

            if merge == 'cat':
                blocks = []
                for nt in ntypes:
                    a = agg[nt]
                    if a is None:
                        a = jnp.zeros((n_stack, H * dout[nt]), jnp.float32)
                    blocks.append(jnp.maximum(a, 0.0))
                x = jnp.concatenate(blocks, axis=1)
            else:
                for oi, nt in enumerate(ntypes):
                    D = dout[nt]
                    a = agg[nt]
                    if a is None:
                        a = jnp.zeros((n_stack, D), jnp.float32)
                    full = jnp.concatenate(
                        [a, jnp.zeros((n_stack, OUT_LANES - D), jnp.float32)],
                        axis=1)
                    out_refs[oi][...] = full[row_off[nt]:row_off[nt] + npad[nt], :]

    const_args = ([masks[e] for (_, e, _) in cetypes]
                  + [e_exp, tid, ones_nn, s_sum] + bms + packed)

    # Advisory cost estimate for the XLA scheduler.
    flops, transcend = 0, 0
    for meta in metas:
        flops += 2 * n_stack * meta['F'] * meta['C']
        for (_, _, d) in cetypes:
            D = meta['dout'][d]
            cols = H * D if meta['merge'] == 'cat' else D
            flops += 2 * n_stack * H * HN * 3     # attention expansions
            flops += 2 * n_stack * HN * H         # segmented denominator
            flops += 2 * n_stack * HN * cols      # aggregation
            transcend += n_stack * HN             # exp
    bytes_acc = n_stack * metas[0]['F'] * 4
    for a in const_args:
        bytes_acc += int(np.prod(a.shape)) * a.dtype.itemsize
    for nt in ntypes:
        bytes_acc += npad[nt] * OUT_LANES * 4

    vmem = pl.BlockSpec(memory_space=pltpu.MemorySpace.VMEM)
    num_inputs = 1 + n_edges + 4 + len(bm_ds) + 2 * num_layers
    fused = pl.pallas_call(
        kernel,
        out_shape=tuple(jax.ShapeDtypeStruct((npad[nt], OUT_LANES), jnp.float32)
                        for nt in ntypes),
        in_specs=[vmem] * num_inputs,
        out_specs=tuple([vmem] * len(ntypes)),
        compiler_params=pltpu.CompilerParams(vmem_limit_bytes=32 * 1024 * 1024),
        cost_estimate=pl.CostEstimate(flops=int(flops),
                                      transcendentals=int(transcend),
                                      bytes_accessed=int(bytes_acc)),
    )

    f_off0, F0 = metas[0]['f_off'], metas[0]['F']
    fin0 = layer_dims[0][0]

    def forward(feat_dict):
        x1 = _stack_features(feat_dict, fin0, f_off0, F0, n_nodes, row_off,
                             n_stack)
        outs = fused(x1, *const_args)
        return {nt: outs[oi][:n_nodes[nt], :out_dim[nt]]
                for oi, nt in enumerate(ntypes)}

    return forward


# ----------------------------------------------------------------------------
# Pure-JAX f32 reference (same reconstruction), used for validation only.
# ----------------------------------------------------------------------------
def _ref_gat_head(h_src, h_dst, p, adj):
    z_src = h_src @ p['W_src'] + p['b_src']
    z_dst = h_dst @ p['W_dst'] + p['b_dst']
    att_s = z_src @ p['a_src']
    att_d = z_dst @ p['a_dst']
    logits = att_d + att_s.T
    logits = jnp.where(logits >= 0.0, logits, LEAKY_SLOPE * logits)
    logits = jnp.where(adj > 0.0, logits, NEG_INF)
    m = jnp.max(logits, axis=-1, keepdims=True)
    pexp = jnp.exp(logits - m)
    alpha = pexp / jnp.sum(pexp, axis=-1, keepdims=True)
    return alpha @ z_src


def _ref_layer(feat, head_params_list, adjs, cetypes, merge, num_heads):
    use_relu = merge == 'cat'
    per_head = []
    for hh in range(num_heads):
        agg = {nt: None for nt in feat}
        for (s, e, d) in cetypes:
            msg = _ref_gat_head(feat[s], feat[d], head_params_list[hh][e], adjs[e])
            agg[d] = msg if agg[d] is None else agg[d] + msg
        if use_relu:
            agg = {nt: jnp.maximum(v, 0.0) for nt, v in agg.items()}
        per_head.append(agg)
    if merge == 'cat':
        return {nt: jnp.concatenate([per_head[hh][nt] for hh in range(num_heads)],
                                    axis=1) for nt in feat}
    return {nt: jnp.mean(jnp.stack([per_head[hh][nt] for hh in range(num_heads)]),
                         axis=0) for nt in feat}


def _ref_forward(params, feat, adjs, cetypes, num_heads):
    h = feat
    for li, merge in enumerate(('cat', 'cat', 'cat', 'avg')):
        h = _ref_layer(h, params[f'layer{li + 1}'], adjs, cetypes, merge, num_heads)
    return h


# ----------------------------------------------------------------------------
# Deterministic parameter initialization.
# ----------------------------------------------------------------------------
def _init_linear(key, d_in, d_out):
    k1, k2 = jax.random.split(key)
    scale = 1.0 / np.sqrt(d_in)
    w = jax.random.uniform(k1, (d_in, d_out), jnp.float32, -scale, scale)
    b = jax.random.uniform(k2, (1, d_out), jnp.float32, -scale, scale)
    return w, b


def init_head_params(key, in_dim, out_dim, cetypes):
    params = {}
    for i, (srctype, etype, dsttype) in enumerate(cetypes):
        k = jax.random.fold_in(key, i)
        ks, kd, ka1, ka2 = jax.random.split(k, 4)
        d_out = out_dim[dsttype]
        w_src, b_src = _init_linear(ks, in_dim[srctype], d_out)
        w_dst, b_dst = _init_linear(kd, in_dim[dsttype], d_out)
        a_src = jax.random.normal(ka1, (d_out, 1), jnp.float32) * 0.1
        a_dst = jax.random.normal(ka2, (d_out, 1), jnp.float32) * 0.1
        params[etype] = dict(W_src=w_src, b_src=b_src, W_dst=w_dst, b_dst=b_dst,
                             a_src=a_src, a_dst=a_dst)
    return params


def init_schedule_net(key, in_dim, hid_dim, out_dim, cetypes, num_heads=4):
    hid_dim_input = {k: hid_dim[k] * num_heads for k in hid_dim}
    layer_dims = [
        (in_dim, hid_dim),         # layer1
        (hid_dim_input, hid_dim),  # layer2
        (hid_dim_input, hid_dim),  # layer3
        (hid_dim_input, out_dim),  # layer4 (merge='avg')
    ]
    params = {}
    for li, (din, dout) in enumerate(layer_dims):
        lkey = jax.random.fold_in(key, 100 + li)
        heads = [init_head_params(jax.random.fold_in(lkey, h), din, dout, cetypes)
                 for h in range(num_heads)]
        params[f'layer{li + 1}'] = heads
    return params


# ----------------------------------------------------------------------------
# Main: small synthetic heterograph.
# ----------------------------------------------------------------------------
if __name__ == "__main__":
    key = jax.random.PRNGKey(0)

    n_task, n_robot = 8, 4
    ntypes = ('task', 'robot')
    n_nodes = {'task': n_task, 'robot': n_robot}
    in_dim = {'task': 6, 'robot': 5}
    hid_dim = {'task': 8, 'robot': 8}
    out_dim = {'task': 8, 'robot': 4}
    num_heads = 4

    cetypes = [
        ('task', 'tt', 'task'),
        ('task', 'tr', 'robot'),
        ('robot', 'rt', 'task'),
        ('robot', 'rr', 'robot'),
    ]

    # Dense adjacency [N_dst, N_src]; every dst row has >= 1 incoming edge.
    adj_tt = np.eye(n_task, dtype=np.float32)
    for i in range(n_task):
        adj_tt[i, (i + 1) % n_task] = 1.0          # ring + self-loops
    adjs = {
        'tt': jnp.asarray(adj_tt),
        'tr': jnp.ones((n_robot, n_task), jnp.float32),
        'rt': jnp.ones((n_task, n_robot), jnp.float32),
        'rr': jnp.ones((n_robot, n_robot), jnp.float32),
    }

    kf1, kf2, kp = jax.random.split(key, 3)
    feat_dict = {
        'task': jax.random.normal(kf1, (n_task, in_dim['task']), jnp.float32),
        'robot': jax.random.normal(kf2, (n_robot, in_dim['robot']), jnp.float32),
    }

    params = init_schedule_net(kp, in_dim, hid_dim, out_dim, cetypes, num_heads)

    forward = build_fused_forward(params, in_dim, hid_dim, out_dim, cetypes,
                                  ntypes, n_nodes, adjs, num_heads)
    out = forward(feat_dict)
    out = jax.tree_util.tree_map(jax.block_until_ready, out)

    assert out['task'].shape == (n_task, out_dim['task'])
    assert out['robot'].shape == (n_robot, out_dim['robot'])
    assert all(bool(jnp.all(jnp.isfinite(v))) for v in out.values())

    # Validate against the pure-JAX f32 reference.  Tolerance covers the bf16
    # MXU operands (f32 accumulation) and the approx EUP reciprocal.
    ref = _ref_forward(params, feat_dict, adjs, cetypes, num_heads)
    for nt in ntypes:
        np.testing.assert_allclose(np.asarray(out[nt]), np.asarray(ref[nt]),
                                   rtol=1e-1, atol=5e-2)

    print("KERNEL_OK")
</pallas_src>

<mosaic_0001>
module attributes {stable_mosaic.version = 11 : i64} {
  func.func @kernel(%arg0: memref<16x11xf32, #tpu.memory_space<vmem>>, %arg1: memref<16x64xf32, #tpu.memory_space<vmem>>, %arg2: memref<16x64xf32, #tpu.memory_space<vmem>>, %arg3: memref<16x64xf32, #tpu.memory_space<vmem>>, %arg4: memref<16x64xf32, #tpu.memory_space<vmem>>, %arg5: memref<4x64xf32, #tpu.memory_space<vmem>>, %arg6: memref<16x64xf32, #tpu.memory_space<vmem>>, %arg7: memref<16x16xf32, #tpu.memory_space<vmem>>, %arg8: memref<64x4xf32, #tpu.memory_space<vmem>>, %arg9: memref<64x32xf32, #tpu.memory_space<vmem>>, %arg10: memref<11x160xbf16, #tpu.memory_space<vmem>>, %arg11: memref<1x160xf32, #tpu.memory_space<vmem>>, %arg12: memref<64x160xbf16, #tpu.memory_space<vmem>>, %arg13: memref<1x160xf32, #tpu.memory_space<vmem>>, %arg14: memref<64x160xbf16, #tpu.memory_space<vmem>>, %arg15: memref<1x160xf32, #tpu.memory_space<vmem>>, %arg16: memref<64x128xbf16, #tpu.memory_space<vmem>>, %arg17: memref<1x128xf32, #tpu.memory_space<vmem>>, %arg18: memref<8x128xf32, #tpu.memory_space<vmem>>, %arg19: memref<8x128xf32, #tpu.memory_space<vmem>>) attributes {dimension_semantics = [], scalar_prefetch = 0 : i64, scratch_operands = 0 : i64, tpu.core_type = #tpu.core_type<tc>} {
    %c0 = arith.constant 0 : index
    %c0_0 = arith.constant 0 : index
    %0 = vector.load %arg5[%c0, %c0_0] : memref<4x64xf32, #tpu.memory_space<vmem>>, vector<4x64xf32>
    %c0_1 = arith.constant 0 : index
    %c0_2 = arith.constant 0 : index
    %1 = vector.load %arg6[%c0_1, %c0_2] : memref<16x64xf32, #tpu.memory_space<vmem>>, vector<16x64xf32>
    %c0_3 = arith.constant 0 : index
    %c0_4 = arith.constant 0 : index
    %2 = vector.load %arg7[%c0_3, %c0_4] : memref<16x16xf32, #tpu.memory_space<vmem>>, vector<16x16xf32>
    %c0_5 = arith.constant 0 : index
    %c0_6 = arith.constant 0 : index
    %3 = vector.load %arg8[%c0_5, %c0_6] : memref<64x4xf32, #tpu.memory_space<vmem>>, vector<64x4xf32>
    %c0_7 = arith.constant 0 : index
    %c0_8 = arith.constant 0 : index
    %4 = vector.load %arg9[%c0_7, %c0_8] : memref<64x32xf32, #tpu.memory_space<vmem>>, vector<64x32xf32>
    %c0_9 = arith.constant 0 : index
    %c0_10 = arith.constant 0 : index
    %5 = vector.load %arg0[%c0_9, %c0_10] : memref<16x11xf32, #tpu.memory_space<vmem>>, vector<16x11xf32>
    %6 = arith.truncf %5 : vector<16x11xf32> to vector<16x11xbf16>
    %c0_11 = arith.constant 0 : index
    %c0_12 = arith.constant 0 : index
    %7 = vector.load %arg10[%c0_11, %c0_12] : memref<11x160xbf16, #tpu.memory_space<vmem>>, vector<11x160xbf16>
    %cst = arith.constant dense<0.000000e+00> : vector<16x160xf32>
    %8 = tpu.matmul %6, %7, %cst {dimension_numbers = #tpu.dot_dimension_numbers<[1], [0], [0], [1], [0, 0, 1, 1], [], []>} : vector<16x11xbf16>, vector<11x160xbf16>, vector<16x160xf32> -> vector<16x160xf32>
    %c0_13 = arith.constant 0 : index
    %c0_14 = arith.constant 0 : index
    %9 = vector.load %arg11[%c0_13, %c0_14] : memref<1x160xf32, #tpu.memory_space<vmem>>, vector<1x160xf32>
    %10 = vector.broadcast %9 : vector<1x160xf32> to vector<16x160xf32>
    %11 = arith.addf %8, %10 : vector<16x160xf32>
    %12 = vector.extract_strided_slice %11 {offsets = [0, 0], sizes = [16, 32], strides = [1, 1]} : vector<16x160xf32> to vector<16x32xf32>
    %13 = vector.extract_strided_slice %11 {offsets = [0, 64], sizes = [16, 4], strides = [1, 1]} : vector<16x160xf32> to vector<16x4xf32>
    %14 = vector.extract_strided_slice %11 {offsets = [0, 72], sizes = [16, 4], strides = [1, 1]} : vector<16x160xf32> to vector<16x4xf32>
    %cst_15 = arith.constant dense<0.000000e+00> : vector<16x64xf32>
    %15 = tpu.matmul %14, %0, %cst_15 {dimension_numbers = #tpu.dot_dimension_numbers<[1], [0], [0], [1], [0, 0, 1, 1], [], []>} : vector<16x4xf32>, vector<4x64xf32>, vector<16x64xf32> -> vector<16x64xf32>
    %cst_16 = arith.constant dense<0.000000e+00> : vector<16x64xf32>
    %16 = tpu.matmul %13, %0, %cst_16 {dimension_numbers = #tpu.dot_dimension_numbers<[1], [0], [0], [1], [0, 0, 1, 1], [], []>} : vector<16x4xf32>, vector<4x64xf32>, vector<16x64xf32> -> vector<16x64xf32>
    %17 = arith.mulf %16, %1 : vector<16x64xf32>
    %cst_17 = arith.constant dense<0.000000e+00> : vector<16x64xf32>
    %18 = tpu.matmul %2, %17, %cst_17 {dimension_numbers = #tpu.dot_dimension_numbers<[1], [0], [0], [1], [0, 0, 1, 1], [], []>} : vector<16x16xf32>, vector<16x64xf32>, vector<16x64xf32> -> vector<16x64xf32>
    %19 = arith.addf %15, %18 : vector<16x64xf32>
    %cst_18 = arith.constant 0.000000e+00 : f32
    %20 = vector.broadcast %cst_18 : f32 to vector<16x64xf32>
    %21 = arith.cmpf oge, %19, %20 : vector<16x64xf32>
    %cst_19 = arith.constant 2.000000e-01 : f32
    %22 = vector.broadcast %cst_19 : f32 to vector<16x64xf32>
    %23 = arith.mulf %22, %19 : vector<16x64xf32>
    %24 = arith.select %21, %19, %23 : vector<16x64xi1>, vector<16x64xf32>
    %c0_20 = arith.constant 0 : index
    %c0_21 = arith.constant 0 : index
    %25 = vector.load %arg1[%c0_20, %c0_21] : memref<16x64xf32, #tpu.memory_space<vmem>>, vector<16x64xf32>
    %26 = arith.addf %24, %25 : vector<16x64xf32>
    %cst_22 = arith.constant dense<0xFF800000> : vector<16xf32>
    %27 = vector.multi_reduction <maximumf>, %26, %cst_22 [1] : vector<16x64xf32> to vector<16xf32>
    %28 = vector.shape_cast %27 : vector<16xf32> to vector<16x1xf32>
    %29 = vector.broadcast %28 : vector<16x1xf32> to vector<16x64xf32>
    %30 = arith.subf %26, %29 : vector<16x64xf32>
    %31 = math.exp %30 : vector<16x64xf32>
    %cst_23 = arith.constant dense<0.000000e+00> : vector<16x4xf32>
    %32 = tpu.matmul %31, %3, %cst_23 {dimension_numbers = #tpu.dot_dimension_numbers<[1], [0], [0], [1], [0, 0, 1, 1], [], []>} : vector<16x64xf32>, vector<64x4xf32>, vector<16x4xf32> -> vector<16x4xf32>
    %33 = tpu.reciprocal %32 {approx = true} : vector<16x4xf32> -> vector<16x4xf32>
    %cst_24 = arith.constant dense<0.000000e+00> : vector<16x64xf32>
    %34 = tpu.matmul %33, %0, %cst_24 {dimension_numbers = #tpu.dot_dimension_numbers<[1], [0], [0], [1], [0, 0, 1, 1], [], []>} : vector<16x4xf32>, vector<4x64xf32>, vector<16x64xf32> -> vector<16x64xf32>
    %35 = arith.mulf %31, %34 : vector<16x64xf32>
    %36 = tpu.concatenate %12, %12, %12, %12 in 0 : vector<16x32xf32>, vector<16x32xf32>, vector<16x32xf32>, vector<16x32xf32> -> vector<64x32xf32>
    %37 = arith.mulf %36, %4 : vector<64x32xf32>
    %38 = arith.truncf %35 : vector<16x64xf32> to vector<16x64xbf16>
    %39 = arith.truncf %37 : vector<64x32xf32> to vector<64x32xbf16>
    %cst_25 = arith.constant dense<0.000000e+00> : vector<16x32xf32>
    %40 = tpu.matmul %38, %39, %cst_25 {dimension_numbers = #tpu.dot_dimension_numbers<[1], [0], [0], [1], [0, 0, 1, 1], [], []>} : vector<16x64xbf16>, vector<64x32xbf16>, vector<16x32xf32> -> vector<16x32xf32>
    %41 = vector.extract_strided_slice %11 {offsets = [0, 32], sizes = [16, 32], strides = [1, 1]} : vector<16x160xf32> to vector<16x32xf32>
    %42 = vector.extract_strided_slice %11 {offsets = [0, 68], sizes = [16, 4], strides = [1, 1]} : vector<16x160xf32> to vector<16x4xf32>
    %43 = vector.extract_strided_slice %11 {offsets = [0, 152], sizes = [16, 4], strides = [1, 1]} : vector<16x160xf32> to vector<16x4xf32>
    %cst_26 = arith.constant dense<0.000000e+00> : vector<16x64xf32>
    %44 = tpu.matmul %43, %0, %cst_26 {dimension_numbers = #tpu.dot_dimension_numbers<[1], [0], [0], [1], [0, 0, 1, 1], [], []>} : vector<16x4xf32>, vector<4x64xf32>, vector<16x64xf32> -> vector<16x64xf32>
    %cst_27 = arith.constant dense<0.000000e+00> : vector<16x64xf32>
    %45 = tpu.matmul %42, %0, %cst_27 {dimension_numbers = #tpu.dot_dimension_numbers<[1], [0], [0], [1], [0, 0, 1, 1], [], []>} : vector<16x4xf32>, vector<4x64xf32>, vector<16x64xf32> -> vector<16x64xf32>
    %46 = arith.mulf %45, %1 : vector<16x64xf32>
    %cst_28 = arith.constant dense<0.000000e+00> : vector<16x64xf32>
    %47 = tpu.matmul %2, %46, %cst_28 {dimension_numbers = #tpu.dot_dimension_numbers<[1], [0], [0], [1], [0, 0, 1, 1], [], []>} : vector<16x16xf32>, vector<16x64xf32>, vector<16x64xf32> -> vector<16x64xf32>
    %48 = arith.addf %44, %47 : vector<16x64xf32>
    %cst_29 = arith.constant 0.000000e+00 : f32
    %49 = vector.broadcast %cst_29 : f32 to vector<16x64xf32>
    %50 = arith.cmpf oge, %48, %49 : vector<16x64xf32>
    %cst_30 = arith.constant 2.000000e-01 : f32
    %51 = vector.broadcast %cst_30 : f32 to vector<16x64xf32>
    %52 = arith.mulf %51, %48 : vector<16x64xf32>
    %53 = arith.select %50, %48, %52 : vector<16x64xi1>, vector<16x64xf32>
    %c0_31 = arith.constant 0 : index
    %c0_32 = arith.constant 0 : index
    %54 = vector.load %arg2[%c0_31, %c0_32] : memref<16x64xf32, #tpu.memory_space<vmem>>, vector<16x64xf32>
    %55 = arith.addf %53, %54 : vector<16x64xf32>
    %cst_33 = arith.constant dense<0xFF800000> : vector<16xf32>
    %56 = vector.multi_reduction <maximumf>, %55, %cst_33 [1] : vector<16x64xf32> to vector<16xf32>
    %57 = vector.shape_cast %56 : vector<16xf32> to vector<16x1xf32>
    %58 = vector.broadcast %57 : vector<16x1xf32> to vector<16x64xf32>
    %59 = arith.subf %55, %58 : vector<16x64xf32>
    %60 = math.exp %59 : vector<16x64xf32>
    %cst_34 = arith.constant dense<0.000000e+00> : vector<16x4xf32>
    %61 = tpu.matmul %60, %3, %cst_34 {dimension_numbers = #tpu.dot_dimension_numbers<[1], [0], [0], [1], [0, 0, 1, 1], [], []>} : vector<16x64xf32>, vector<64x4xf32>, vector<16x4xf32> -> vector<16x4xf32>
    %62 = tpu.reciprocal %61 {approx = true} : vector<16x4xf32> -> vector<16x4xf32>
    %cst_35 = arith.constant dense<0.000000e+00> : vector<16x64xf32>
    %63 = tpu.matmul %62, %0, %cst_35 {dimension_numbers = #tpu.dot_dimension_numbers<[1], [0], [0], [1], [0, 0, 1, 1], [], []>} : vector<16x4xf32>, vector<4x64xf32>, vector<16x64xf32> -> vector<16x64xf32>
    %64 = arith.mulf %60, %63 : vector<16x64xf32>
    %65 = tpu.concatenate %41, %41, %41, %41 in 0 : vector<16x32xf32>, vector<16x32xf32>, vector<16x32xf32>, vector<16x32xf32> -> vector<64x32xf32>
    %66 = arith.mulf %65, %4 : vector<64x32xf32>
    %67 = arith.truncf %64 : vector<16x64xf32> to vector<16x64xbf16>
    %68 = arith.truncf %66 : vector<64x32xf32> to vector<64x32xbf16>
    %cst_36 = arith.constant dense<0.000000e+00> : vector<16x32xf32>
    %69 = tpu.matmul %67, %68, %cst_36 {dimension_numbers = #tpu.dot_dimension_numbers<[1], [0], [0], [1], [0, 0, 1, 1], [], []>} : vector<16x64xbf16>, vector<64x32xbf16>, vector<16x32xf32> -> vector<16x32xf32>
    %70 = vector.extract_strided_slice %11 {offsets = [0, 80], sizes = [16, 32], strides = [1, 1]} : vector<16x160xf32> to vector<16x32xf32>
    %71 = vector.extract_strided_slice %11 {offsets = [0, 144], sizes = [16, 4], strides = [1, 1]} : vector<16x160xf32> to vector<16x4xf32>
    %72 = vector.extract_strided_slice %11 {offsets = [0, 76], sizes = [16, 4], strides = [1, 1]} : vector<16x160xf32> to vector<16x4xf32>
    %cst_37 = arith.constant dense<0.000000e+00> : vector<16x64xf32>
    %73 = tpu.matmul %72, %0, %cst_37 {dimension_numbers = #tpu.dot_dimension_numbers<[1], [0], [0], [1], [0, 0, 1, 1], [], []>} : vector<16x4xf32>, vector<4x64xf32>, vector<16x64xf32> -> vector<16x64xf32>
    %cst_38 = arith.constant dense<0.000000e+00> : vector<16x64xf32>
    %74 = tpu.matmul %71, %0, %cst_38 {dimension_numbers = #tpu.dot_dimension_numbers<[1], [0], [0], [1], [0, 0, 1, 1], [], []>} : vector<16x4xf32>, vector<4x64xf32>, vector<16x64xf32> -> vector<16x64xf32>
    %75 = arith.mulf %74, %1 : vector<16x64xf32>
    %cst_39 = arith.constant dense<0.000000e+00> : vector<16x64xf32>
    %76 = tpu.matmul %2, %75, %cst_39 {dimension_numbers = #tpu.dot_dimension_numbers<[1], [0], [0], [1], [0, 0, 1, 1], [], []>} : vector<16x16xf32>, vector<16x64xf32>, vector<16x64xf32> -> vector<16x64xf32>
    %77 = arith.addf %73, %76 : vector<16x64xf32>
    %cst_40 = arith.constant 0.000000e+00 : f32
    %78 = vector.broadcast %cst_40 : f32 to vector<16x64xf32>
    %79 = arith.cmpf oge, %77, %78 : vector<16x64xf32>
    %cst_41 = arith.constant 2.000000e-01 : f32
    %80 = vector.broadcast %cst_41 : f32 to vector<16x64xf32>
    %81 = arith.mulf %80, %77 : vector<16x64xf32>
    %82 = arith.select %79, %77, %81 : vector<16x64xi1>, vector<16x64xf32>
    %c0_42 = arith.constant 0 : index
    %c0_43 = arith.constant 0 : index
    %83 = vector.load %arg3[%c0_42, %c0_43] : memref<16x64xf32, #tpu.memory_space<vmem>>, vector<16x64xf32>
    %84 = arith.addf %82, %83 : vector<16x64xf32>
    %cst_44 = arith.constant dense<0xFF800000> : vector<16xf32>
    %85 = vector.multi_reduction <maximumf>, %84, %cst_44 [1] : vector<16x64xf32> to vector<16xf32>
    %86 = vector.shape_cast %85 : vector<16xf32> to vector<16x1xf32>
    %87 = vector.broadcast %86 : vector<16x1xf32> to vector<16x64xf32>
    %88 = arith.subf %84, %87 : vector<16x64xf32>
    %89 = math.exp %88 : vector<16x64xf32>
    %cst_45 = arith.constant dense<0.000000e+00> : vector<16x4xf32>
    %90 = tpu.matmul %89, %3, %cst_45 {dimension_numbers = #tpu.dot_dimension_numbers<[1], [0], [0], [1], [0, 0, 1, 1], [], []>} : vector<16x64xf32>, vector<64x4xf32>, vector<16x4xf32> -> vector<16x4xf32>
    %91 = tpu.reciprocal %90 {approx = true} : vector<16x4xf32> -> vector<16x4xf32>
    %cst_46 = arith.constant dense<0.000000e+00> : vector<16x64xf32>
    %92 = tpu.matmul %91, %0, %cst_46 {dimension_numbers = #tpu.dot_dimension_numbers<[1], [0], [0], [1], [0, 0, 1, 1], [], []>} : vector<16x4xf32>, vector<4x64xf32>, vector<16x64xf32> -> vector<16x64xf32>
    %93 = arith.mulf %89, %92 : vector<16x64xf32>
    %94 = tpu.concatenate %70, %70, %70, %70 in 0 : vector<16x32xf32>, vector<16x32xf32>, vector<16x32xf32>, vector<16x32xf32> -> vector<64x32xf32>
    %95 = arith.mulf %94, %4 : vector<64x32xf32>
    %96 = arith.truncf %93 : vector<16x64xf32> to vector<16x64xbf16>
    %97 = arith.truncf %95 : vector<64x32xf32> to vector<64x32xbf16>
    %cst_47 = arith.constant dense<0.000000e+00> : vector<16x32xf32>
    %98 = tpu.matmul %96, %97, %cst_47 {dimension_numbers = #tpu.dot_dimension_numbers<[1], [0], [0], [1], [0, 0, 1, 1], [], []>} : vector<16x64xbf16>, vector<64x32xbf16>, vector<16x32xf32> -> vector<16x32xf32>
    %99 = arith.addf %40, %98 : vector<16x32xf32>
    %100 = vector.extract_strided_slice %11 {offsets = [0, 112], sizes = [16, 32], strides = [1, 1]} : vector<16x160xf32> to vector<16x32xf32>
    %101 = vector.extract_strided_slice %11 {offsets = [0, 148], sizes = [16, 4], strides = [1, 1]} : vector<16x160xf32> to vector<16x4xf32>
    %102 = vector.extract_strided_slice %11 {offsets = [0, 156], sizes = [16, 4], strides = [1, 1]} : vector<16x160xf32> to vector<16x4xf32>
    %cst_48 = arith.constant dense<0.000000e+00> : vector<16x64xf32>
    %103 = tpu.matmul %102, %0, %cst_48 {dimension_numbers = #tpu.dot_dimension_numbers<[1], [0], [0], [1], [0, 0, 1, 1], [], []>} : vector<16x4xf32>, vector<4x64xf32>, vector<16x64xf32> -> vector<16x64xf32>
    %cst_49 = arith.constant dense<0.000000e+00> : vector<16x64xf32>
    %104 = tpu.matmul %101, %0, %cst_49 {dimension_numbers = #tpu.dot_dimension_numbers<[1], [0], [0], [1], [0, 0, 1, 1], [], []>} : vector<16x4xf32>, vector<4x64xf32>, vector<16x64xf32> -> vector<16x64xf32>
    %105 = arith.mulf %104, %1 : vector<16x64xf32>
    %cst_50 = arith.constant dense<0.000000e+00> : vector<16x64xf32>
    %106 = tpu.matmul %2, %105, %cst_50 {dimension_numbers = #tpu.dot_dimension_numbers<[1], [0], [0], [1], [0, 0, 1, 1], [], []>} : vector<16x16xf32>, vector<16x64xf32>, vector<16x64xf32> -> vector<16x64xf32>
    %107 = arith.addf %103, %106 : vector<16x64xf32>
    %cst_51 = arith.constant 0.000000e+00 : f32
    %108 = vector.broadcast %cst_51 : f32 to vector<16x64xf32>
    %109 = arith.cmpf oge, %107, %108 : vector<16x64xf32>
    %cst_52 = arith.constant 2.000000e-01 : f32
    %110 = vector.broadcast %cst_52 : f32 to vector<16x64xf32>
    %111 = arith.mulf %110, %107 : vector<16x64xf32>
    %112 = arith.select %109, %107, %111 : vector<16x64xi1>, vector<16x64xf32>
    %c0_53 = arith.constant 0 : index
    %c0_54 = arith.constant 0 : index
    %113 = vector.load %arg4[%c0_53, %c0_54] : memref<16x64xf32, #tpu.memory_space<vmem>>, vector<16x64xf32>
    %114 = arith.addf %112, %113 : vector<16x64xf32>
    %cst_55 = arith.constant dense<0xFF800000> : vector<16xf32>
    %115 = vector.multi_reduction <maximumf>, %114, %cst_55 [1] : vector<16x64xf32> to vector<16xf32>
    %116 = vector.shape_cast %115 : vector<16xf32> to vector<16x1xf32>
    %117 = vector.broadcast %116 : vector<16x1xf32> to vector<16x64xf32>
    %118 = arith.subf %114, %117 : vector<16x64xf32>
    %119 = math.exp %118 : vector<16x64xf32>
    %cst_56 = arith.constant dense<0.000000e+00> : vector<16x4xf32>
    %120 = tpu.matmul %119, %3, %cst_56 {dimension_numbers = #tpu.dot_dimension_numbers<[1], [0], [0], [1], [0, 0, 1, 1], [], []>} : vector<16x64xf32>, vector<64x4xf32>, vector<16x4xf32> -> vector<16x4xf32>
    %121 = tpu.reciprocal %120 {approx = true} : vector<16x4xf32> -> vector<16x4xf32>
    %cst_57 = arith.constant dense<0.000000e+00> : vector<16x64xf32>
    %122 = tpu.matmul %121, %0, %cst_57 {dimension_numbers = #tpu.dot_dimension_numbers<[1], [0], [0], [1], [0, 0, 1, 1], [], []>} : vector<16x4xf32>, vector<4x64xf32>, vector<16x64xf32> -> vector<16x64xf32>
    %123 = arith.mulf %119, %122 : vector<16x64xf32>
    %124 = tpu.concatenate %100, %100, %100, %100 in 0 : vector<16x32xf32>, vector<16x32xf32>, vector<16x32xf32>, vector<16x32xf32> -> vector<64x32xf32>
    %125 = arith.mulf %124, %4 : vector<64x32xf32>
    %126 = arith.truncf %123 : vector<16x64xf32> to vector<16x64xbf16>
    %127 = arith.truncf %125 : vector<64x32xf32> to vector<64x32xbf16>
    %cst_58 = arith.constant dense<0.000000e+00> : vector<16x32xf32>
    %128 = tpu.matmul %126, %127, %cst_58 {dimension_numbers = #tpu.dot_dimension_numbers<[1], [0], [0], [1], [0, 0, 1, 1], [], []>} : vector<16x64xbf16>, vector<64x32xbf16>, vector<16x32xf32> -> vector<16x32xf32>
    %129 = arith.addf %69, %128 : vector<16x32xf32>
    %cst_59 = arith.constant 0.000000e+00 : f32
    %130 = vector.broadcast %cst_59 : f32 to vector<16x32xf32>
    %131 = arith.maximumf %99, %130 : vector<16x32xf32>
    %cst_60 = arith.constant 0.000000e+00 : f32
    %132 = vector.broadcast %cst_60 : f32 to vector<16x32xf32>
    %133 = arith.maximumf %129, %132 : vector<16x32xf32>
    %134 = tpu.concatenate %131, %133 in 1 : vector<16x32xf32>, vector<16x32xf32> -> vector<16x64xf32>
    %135 = arith.truncf %134 : vector<16x64xf32> to vector<16x64xbf16>
    %c0_61 = arith.constant 0 : index
    %c0_62 = arith.constant 0 : index
    %136 = vector.load %arg12[%c0_61, %c0_62] : memref<64x160xbf16, #tpu.memory_space<vmem>>, vector<64x160xbf16>
    %cst_63 = arith.constant dense<0.000000e+00> : vector<16x160xf32>
    %137 = tpu.matmul %135, %136, %cst_63 {dimension_numbers = #tpu.dot_dimension_numbers<[1], [0], [0], [1], [0, 0, 1, 1], [], []>} : vector<16x64xbf16>, vector<64x160xbf16>, vector<16x160xf32> -> vector<16x160xf32>
    %c0_64 = arith.constant 0 : index
    %c0_65 = arith.constant 0 : index
    %138 = vector.load %arg13[%c0_64, %c0_65] : memref<1x160xf32, #tpu.memory_space<vmem>>, vector<1x160xf32>
    %139 = vector.broadcast %138 : vector<1x160xf32> to vector<16x160xf32>
    %140 = arith.addf %137, %139 : vector<16x160xf32>
    %141 = vector.extract_strided_slice %140 {offsets = [0, 0], sizes = [16, 32], strides = [1, 1]} : vector<16x160xf32> to vector<16x32xf32>
    %142 = vector.extract_strided_slice %140 {offsets = [0, 64], sizes = [16, 4], strides = [1, 1]} : vector<16x160xf32> to vector<16x4xf32>
    %143 = vector.extract_strided_slice %140 {offsets = [0, 72], sizes = [16, 4], strides = [1, 1]} : vector<16x160xf32> to vector<16x4xf32>
    %cst_66 = arith.constant dense<0.000000e+00> : vector<16x64xf32>
    %144 = tpu.matmul %143, %0, %cst_66 {dimension_numbers = #tpu.dot_dimension_numbers<[1], [0], [0], [1], [0, 0, 1, 1], [], []>} : vector<16x4xf32>, vector<4x64xf32>, vector<16x64xf32> -> vector<16x64xf32>
    %cst_67 = arith.constant dense<0.000000e+00> : vector<16x64xf32>
    %145 = tpu.matmul %142, %0, %cst_67 {dimension_numbers = #tpu.dot_dimension_numbers<[1], [0], [0], [1], [0, 0, 1, 1], [], []>} : vector<16x4xf32>, vector<4x64xf32>, vector<16x64xf32> -> vector<16x64xf32>
    %146 = arith.mulf %145, %1 : vector<16x64xf32>
    %cst_68 = arith.constant dense<0.000000e+00> : vector<16x64xf32>
    %147 = tpu.matmul %2, %146, %cst_68 {dimension_numbers = #tpu.dot_dimension_numbers<[1], [0], [0], [1], [0, 0, 1, 1], [], []>} : vector<16x16xf32>, vector<16x64xf32>, vector<16x64xf32> -> vector<16x64xf32>
    %148 = arith.addf %144, %147 : vector<16x64xf32>
    %cst_69 = arith.constant 0.000000e+00 : f32
    %149 = vector.broadcast %cst_69 : f32 to vector<16x64xf32>
    %150 = arith.cmpf oge, %148, %149 : vector<16x64xf32>
    %cst_70 = arith.constant 2.000000e-01 : f32
    %151 = vector.broadcast %cst_70 : f32 to vector<16x64xf32>
    %152 = arith.mulf %151, %148 : vector<16x64xf32>
    %153 = arith.select %150, %148, %152 : vector<16x64xi1>, vector<16x64xf32>
    %c0_71 = arith.constant 0 : index
    %c0_72 = arith.constant 0 : index
    %154 = vector.load %arg1[%c0_71, %c0_72] : memref<16x64xf32, #tpu.memory_space<vmem>>, vector<16x64xf32>
    %155 = arith.addf %153, %154 : vector<16x64xf32>
    %cst_73 = arith.constant dense<0xFF800000> : vector<16xf32>
    %156 = vector.multi_reduction <maximumf>, %155, %cst_73 [1] : vector<16x64xf32> to vector<16xf32>
    %157 = vector.shape_cast %156 : vector<16xf32> to vector<16x1xf32>
    %158 = vector.broadcast %157 : vector<16x1xf32> to vector<16x64xf32>
    %159 = arith.subf %155, %158 : vector<16x64xf32>
    %160 = math.exp %159 : vector<16x64xf32>
    %cst_74 = arith.constant dense<0.000000e+00> : vector<16x4xf32>
    %161 = tpu.matmul %160, %3, %cst_74 {dimension_numbers = #tpu.dot_dimension_numbers<[1], [0], [0], [1], [0, 0, 1, 1], [], []>} : vector<16x64xf32>, vector<64x4xf32>, vector<16x4xf32> -> vector<16x4xf32>
    %162 = tpu.reciprocal %161 {approx = true} : vector<16x4xf32> -> vector<16x4xf32>
    %cst_75 = arith.constant dense<0.000000e+00> : vector<16x64xf32>
    %163 = tpu.matmul %162, %0, %cst_75 {dimension_numbers = #tpu.dot_dimension_numbers<[1], [0], [0], [1], [0, 0, 1, 1], [], []>} : vector<16x4xf32>, vector<4x64xf32>, vector<16x64xf32> -> vector<16x64xf32>
    %164 = arith.mulf %160, %163 : vector<16x64xf32>
    %165 = tpu.concatenate %141, %141, %141, %141 in 0 : vector<16x32xf32>, vector<16x32xf32>, vector<16x32xf32>, vector<16x32xf32> -> vector<64x32xf32>
    %166 = arith.mulf %165, %4 : vector<64x32xf32>
    %167 = arith.truncf %164 : vector<16x64xf32> to vector<16x64xbf16>
    %168 = arith.truncf %166 : vector<64x32xf32> to vector<64x32xbf16>
    %cst_76 = arith.constant dense<0.000000e+00> : vector<16x32xf32>
    %169 = tpu.matmul %167, %168, %cst_76 {dimension_numbers = #tpu.dot_dimension_numbers<[1], [0], [0], [1], [0, 0, 1, 1], [], []>} : vector<16x64xbf16>, vector<64x32xbf16>, vector<16x32xf32> -> vector<16x32xf32>
    %170 = vector.extract_strided_slice %140 {offsets = [0, 32], sizes = [16, 32], strides = [1, 1]} : vector<16x160xf32> to vector<16x32xf32>
    %171 = vector.extract_strided_slice %140 {offsets = [0, 68], sizes = [16, 4], strides = [1, 1]} : vector<16x160xf32> to vector<16x4xf32>
    %172 = vector.extract_strided_slice %140 {offsets = [0, 152], sizes = [16, 4], strides = [1, 1]} : vector<16x160xf32> to vector<16x4xf32>
    %cst_77 = arith.constant dense<0.000000e+00> : vector<16x64xf32>
    %173 = tpu.matmul %172, %0, %cst_77 {dimension_numbers = #tpu.dot_dimension_numbers<[1], [0], [0], [1], [0, 0, 1, 1], [], []>} : vector<16x4xf32>, vector<4x64xf32>, vector<16x64xf32> -> vector<16x64xf32>
    %cst_78 = arith.constant dense<0.000000e+00> : vector<16x64xf32>
    %174 = tpu.matmul %171, %0, %cst_78 {dimension_numbers = #tpu.dot_dimension_numbers<[1], [0], [0], [1], [0, 0, 1, 1], [], []>} : vector<16x4xf32>, vector<4x64xf32>, vector<16x64xf32> -> vector<16x64xf32>
    %175 = arith.mulf %174, %1 : vector<16x64xf32>
    %cst_79 = arith.constant dense<0.000000e+00> : vector<16x64xf32>
    %176 = tpu.matmul %2, %175, %cst_79 {dimension_numbers = #tpu.dot_dimension_numbers<[1], [0], [0], [1], [0, 0, 1, 1], [], []>} : vector<16x16xf32>, vector<16x64xf32>, vector<16x64xf32> -> vector<16x64xf32>
    %177 = arith.addf %173, %176 : vector<16x64xf32>
    %cst_80 = arith.constant 0.000000e+00 : f32
    %178 = vector.broadcast %cst_80 : f32 to vector<16x64xf32>
    %179 = arith.cmpf oge, %177, %178 : vector<16x64xf32>
    %cst_81 = arith.constant 2.000000e-01 : f32
    %180 = vector.broadcast %cst_81 : f32 to vector<16x64xf32>
    %181 = arith.mulf %180, %177 : vector<16x64xf32>
    %182 = arith.select %179, %177, %181 : vector<16x64xi1>, vector<16x64xf32>
    %c0_82 = arith.constant 0 : index
    %c0_83 = arith.constant 0 : index
    %183 = vector.load %arg2[%c0_82, %c0_83] : memref<16x64xf32, #tpu.memory_space<vmem>>, vector<16x64xf32>
    %184 = arith.addf %182, %183 : vector<16x64xf32>
    %cst_84 = arith.constant dense<0xFF800000> : vector<16xf32>
    %185 = vector.multi_reduction <maximumf>, %184, %cst_84 [1] : vector<16x64xf32> to vector<16xf32>
    %186 = vector.shape_cast %185 : vector<16xf32> to vector<16x1xf32>
    %187 = vector.broadcast %186 : vector<16x1xf32> to vector<16x64xf32>
    %188 = arith.subf %184, %187 : vector<16x64xf32>
    %189 = math.exp %188 : vector<16x64xf32>
    %cst_85 = arith.constant dense<0.000000e+00> : vector<16x4xf32>
    %190 = tpu.matmul %189, %3, %cst_85 {dimension_numbers = #tpu.dot_dimension_numbers<[1], [0], [0], [1], [0, 0, 1, 1], [], []>} : vector<16x64xf32>, vector<64x4xf32>, vector<16x4xf32> -> vector<16x4xf32>
    %191 = tpu.reciprocal %190 {approx = true} : vector<16x4xf32> -> vector<16x4xf32>
    %cst_86 = arith.constant dense<0.000000e+00> : vector<16x64xf32>
    %192 = tpu.matmul %191, %0, %cst_86 {dimension_numbers = #tpu.dot_dimension_numbers<[1], [0], [0], [1], [0, 0, 1, 1], [], []>} : vector<16x4xf32>, vector<4x64xf32>, vector<16x64xf32> -> vector<16x64xf32>
    %193 = arith.mulf %189, %192 : vector<16x64xf32>
    %194 = tpu.concatenate %170, %170, %170, %170 in 0 : vector<16x32xf32>, vector<16x32xf32>, vector<16x32xf32>, vector<16x32xf32> -> vector<64x32xf32>
    %195 = arith.mulf %194, %4 : vector<64x32xf32>
    %196 = arith.truncf %193 : vector<16x64xf32> to vector<16x64xbf16>
    %197 = arith.truncf %195 : vector<64x32xf32> to vector<64x32xbf16>
    %cst_87 = arith.constant dense<0.000000e+00> : vector<16x32xf32>
    %198 = tpu.matmul %196, %197, %cst_87 {dimension_numbers = #tpu.dot_dimension_numbers<[1], [0], [0], [1], [0, 0, 1, 1], [], []>} : vector<16x64xbf16>, vector<64x32xbf16>, vector<16x32xf32> -> vector<16x32xf32>
    %199 = vector.extract_strided_slice %140 {offsets = [0, 80], sizes = [16, 32], strides = [1, 1]} : vector<16x160xf32> to vector<16x32xf32>
    %200 = vector.extract_strided_slice %140 {offsets = [0, 144], sizes = [16, 4], strides = [1, 1]} : vector<16x160xf32> to vector<16x4xf32>
    %201 = vector.extract_strided_slice %140 {offsets = [0, 76], sizes = [16, 4], strides = [1, 1]} : vector<16x160xf32> to vector<16x4xf32>
    %cst_88 = arith.constant dense<0.000000e+00> : vector<16x64xf32>
    %202 = tpu.matmul %201, %0, %cst_88 {dimension_numbers = #tpu.dot_dimension_numbers<[1], [0], [0], [1], [0, 0, 1, 1], [], []>} : vector<16x4xf32>, vector<4x64xf32>, vector<16x64xf32> -> vector<16x64xf32>
    %cst_89 = arith.constant dense<0.000000e+00> : vector<16x64xf32>
    %203 = tpu.matmul %200, %0, %cst_89 {dimension_numbers = #tpu.dot_dimension_numbers<[1], [0], [0], [1], [0, 0, 1, 1], [], []>} : vector<16x4xf32>, vector<4x64xf32>, vector<16x64xf32> -> vector<16x64xf32>
    %204 = arith.mulf %203, %1 : vector<16x64xf32>
    %cst_90 = arith.constant dense<0.000000e+00> : vector<16x64xf32>
    %205 = tpu.matmul %2, %204, %cst_90 {dimension_numbers = #tpu.dot_dimension_numbers<[1], [0], [0], [1], [0, 0, 1, 1], [], []>} : vector<16x16xf32>, vector<16x64xf32>, vector<16x64xf32> -> vector<16x64xf32>
    %206 = arith.addf %202, %205 : vector<16x64xf32>
    %cst_91 = arith.constant 0.000000e+00 : f32
    %207 = vector.broadcast %cst_91 : f32 to vector<16x64xf32>
    %208 = arith.cmpf oge, %206, %207 : vector<16x64xf32>
    %cst_92 = arith.constant 2.000000e-01 : f32
    %209 = vector.broadcast %cst_92 : f32 to vector<16x64xf32>
    %210 = arith.mulf %209, %206 : vector<16x64xf32>
    %211 = arith.select %208, %206, %210 : vector<16x64xi1>, vector<16x64xf32>
    %c0_93 = arith.constant 0 : index
    %c0_94 = arith.constant 0 : index
    %212 = vector.load %arg3[%c0_93, %c0_94] : memref<16x64xf32, #tpu.memory_space<vmem>>, vector<16x64xf32>
    %213 = arith.addf %211, %212 : vector<16x64xf32>
    %cst_95 = arith.constant dense<0xFF800000> : vector<16xf32>
    %214 = vector.multi_reduction <maximumf>, %213, %cst_95 [1] : vector<16x64xf32> to vector<16xf32>
    %215 = vector.shape_cast %214 : vector<16xf32> to vector<16x1xf32>
    %216 = vector.broadcast %215 : vector<16x1xf32> to vector<16x64xf32>
    %217 = arith.subf %213, %216 : vector<16x64xf32>
    %218 = math.exp %217 : vector<16x64xf32>
    %cst_96 = arith.constant dense<0.000000e+00> : vector<16x4xf32>
    %219 = tpu.matmul %218, %3, %cst_96 {dimension_numbers = #tpu.dot_dimension_numbers<[1], [0], [0], [1], [0, 0, 1, 1], [], []>} : vector<16x64xf32>, vector<64x4xf32>, vector<16x4xf32> -> vector<16x4xf32>
    %220 = tpu.reciprocal %219 {approx = true} : vector<16x4xf32> -> vector<16x4xf32>
    %cst_97 = arith.constant dense<0.000000e+00> : vector<16x64xf32>
    %221 = tpu.matmul %220, %0, %cst_97 {dimension_numbers = #tpu.dot_dimension_numbers<[1], [0], [0], [1], [0, 0, 1, 1], [], []>} : vector<16x4xf32>, vector<4x64xf32>, vector<16x64xf32> -> vector<16x64xf32>
    %222 = arith.mulf %218, %221 : vector<16x64xf32>
    %223 = tpu.concatenate %199, %199, %199, %199 in 0 : vector<16x32xf32>, vector<16x32xf32>, vector<16x32xf32>, vector<16x32xf32> -> vector<64x32xf32>
    %224 = arith.mulf %223, %4 : vector<64x32xf32>
    %225 = arith.truncf %222 : vector<16x64xf32> to vector<16x64xbf16>
    %226 = arith.truncf %224 : vector<64x32xf32> to vector<64x32xbf16>
    %cst_98 = arith.constant dense<0.000000e+00> : vector<16x32xf32>
    %227 = tpu.matmul %225, %226, %cst_98 {dimension_numbers = #tpu.dot_dimension_numbers<[1], [0], [0], [1], [0, 0, 1, 1], [], []>} : vector<16x64xbf16>, vector<64x32xbf16>, vector<16x32xf32> -> vector<16x32xf32>
    %228 = arith.addf %169, %227 : vector<16x32xf32>
    %229 = vector.extract_strided_slice %140 {offsets = [0, 112], sizes = [16, 32], strides = [1, 1]} : vector<16x160xf32> to vector<16x32xf32>
    %230 = vector.extract_strided_slice %140 {offsets = [0, 148], sizes = [16, 4], strides = [1, 1]} : vector<16x160xf32> to vector<16x4xf32>
    %231 = vector.extract_strided_slice %140 {offsets = [0, 156], sizes = [16, 4], strides = [1, 1]} : vector<16x160xf32> to vector<16x4xf32>
    %cst_99 = arith.constant dense<0.000000e+00> : vector<16x64xf32>
    %232 = tpu.matmul %231, %0, %cst_99 {dimension_numbers = #tpu.dot_dimension_numbers<[1], [0], [0], [1], [0, 0, 1, 1], [], []>} : vector<16x4xf32>, vector<4x64xf32>, vector<16x64xf32> -> vector<16x64xf32>
    %cst_100 = arith.constant dense<0.000000e+00> : vector<16x64xf32>
    %233 = tpu.matmul %230, %0, %cst_100 {dimension_numbers = #tpu.dot_dimension_numbers<[1], [0], [0], [1], [0, 0, 1, 1], [], []>} : vector<16x4xf32>, vector<4x64xf32>, vector<16x64xf32> -> vector<16x64xf32>
    %234 = arith.mulf %233, %1 : vector<16x64xf32>
    %cst_101 = arith.constant dense<0.000000e+00> : vector<16x64xf32>
    %235 = tpu.matmul %2, %234, %cst_101 {dimension_numbers = #tpu.dot_dimension_numbers<[1], [0], [0], [1], [0, 0, 1, 1], [], []>} : vector<16x16xf32>, vector<16x64xf32>, vector<16x64xf32> -> vector<16x64xf32>
    %236 = arith.addf %232, %235 : vector<16x64xf32>
    %cst_102 = arith.constant 0.000000e+00 : f32
    %237 = vector.broadcast %cst_102 : f32 to vector<16x64xf32>
    %238 = arith.cmpf oge, %236, %237 : vector<16x64xf32>
    %cst_103 = arith.constant 2.000000e-01 : f32
    %239 = vector.broadcast %cst_103 : f32 to vector<16x64xf32>
    %240 = arith.mulf %239, %236 : vector<16x64xf32>
    %241 = arith.select %238, %236, %240 : vector<16x64xi1>, vector<16x64xf32>
    %c0_104 = arith.constant 0 : index
    %c0_105 = arith.constant 0 : index
    %242 = vector.load %arg4[%c0_104, %c0_105] : memref<16x64xf32, #tpu.memory_space<vmem>>, vector<16x64xf32>
    %243 = arith.addf %241, %242 : vector<16x64xf32>
    %cst_106 = arith.constant dense<0xFF800000> : vector<16xf32>
    %244 = vector.multi_reduction <maximumf>, %243, %cst_106 [1] : vector<16x64xf32> to vector<16xf32>
    %245 = vector.shape_cast %244 : vector<16xf32> to vector<16x1xf32>
    %246 = vector.broadcast %245 : vector<16x1xf32> to vector<16x64xf32>
    %247 = arith.subf %243, %246 : vector<16x64xf32>
    %248 = math.exp %247 : vector<16x64xf32>
    %cst_107 = arith.constant dense<0.000000e+00> : vector<16x4xf32>
    %249 = tpu.matmul %248, %3, %cst_107 {dimension_numbers = #tpu.dot_dimension_numbers<[1], [0], [0], [1], [0, 0, 1, 1], [], []>} : vector<16x64xf32>, vector<64x4xf32>, vector<16x4xf32> -> vector<16x4xf32>
    %250 = tpu.reciprocal %249 {approx = true} : vector<16x4xf32> -> vector<16x4xf32>
    %cst_108 = arith.constant dense<0.000000e+00> : vector<16x64xf32>
    %251 = tpu.matmul %250, %0, %cst_108 {dimension_numbers = #tpu.dot_dimension_numbers<[1], [0], [0], [1], [0, 0, 1, 1], [], []>} : vector<16x4xf32>, vector<4x64xf32>, vector<16x64xf32> -> vector<16x64xf32>
    %252 = arith.mulf %248, %251 : vector<16x64xf32>
    %253 = tpu.concatenate %229, %229, %229, %229 in 0 : vector<16x32xf32>, vector<16x32xf32>, vector<16x32xf32>, vector<16x32xf32> -> vector<64x32xf32>
    %254 = arith.mulf %253, %4 : vector<64x32xf32>
    %255 = arith.truncf %252 : vector<16x64xf32> to vector<16x64xbf16>
    %256 = arith.truncf %254 : vector<64x32xf32> to vector<64x32xbf16>
    %cst_109 = arith.constant dense<0.000000e+00> : vector<16x32xf32>
    %257 = tpu.matmul %255, %256, %cst_109 {dimension_numbers = #tpu.dot_dimension_numbers<[1], [0], [0], [1], [0, 0, 1, 1], [], []>} : vector<16x64xbf16>, vector<64x32xbf16>, vector<16x32xf32> -> vector<16x32xf32>
    %258 = arith.addf %198, %257 : vector<16x32xf32>
    %cst_110 = arith.constant 0.000000e+00 : f32
    %259 = vector.broadcast %cst_110 : f32 to vector<16x32xf32>
    %260 = arith.maximumf %228, %259 : vector<16x32xf32>
    %cst_111 = arith.constant 0.000000e+00 : f32
    %261 = vector.broadcast %cst_111 : f32 to vector<16x32xf32>
    %262 = arith.maximumf %258, %261 : vector<16x32xf32>
    %263 = tpu.concatenate %260, %262 in 1 : vector<16x32xf32>, vector<16x32xf32> -> vector<16x64xf32>
    %264 = arith.truncf %263 : vector<16x64xf32> to vector<16x64xbf16>
    %c0_112 = arith.constant 0 : index
    %c0_113 = arith.constant 0 : index
    %265 = vector.load %arg14[%c0_112, %c0_113] : memref<64x160xbf16, #tpu.memory_space<vmem>>, vector<64x160xbf16>
    %cst_114 = arith.constant dense<0.000000e+00> : vector<16x160xf32>
    %266 = tpu.matmul %264, %265, %cst_114 {dimension_numbers = #tpu.dot_dimension_numbers<[1], [0], [0], [1], [0, 0, 1, 1], [], []>} : vector<16x64xbf16>, vector<64x160xbf16>, vector<16x160xf32> -> vector<16x160xf32>
    %c0_115 = arith.constant 0 : index
    %c0_116 = arith.constant 0 : index
    %267 = vector.load %arg15[%c0_115, %c0_116] : memref<1x160xf32, #tpu.memory_space<vmem>>, vector<1x160xf32>
    %268 = vector.broadcast %267 : vector<1x160xf32> to vector<16x160xf32>
    %269 = arith.addf %266, %268 : vector<16x160xf32>
    %270 = vector.extract_strided_slice %269 {offsets = [0, 0], sizes = [16, 32], strides = [1, 1]} : vector<16x160xf32> to vector<16x32xf32>
    %271 = vector.extract_strided_slice %269 {offsets = [0, 64], sizes = [16, 4], strides = [1, 1]} : vector<16x160xf32> to vector<16x4xf32>
    %272 = vector.extract_strided_slice %269 {offsets = [0, 72], sizes = [16, 4], strides = [1, 1]} : vector<16x160xf32> to vector<16x4xf32>
    %cst_117 = arith.constant dense<0.000000e+00> : vector<16x64xf32>
    %273 = tpu.matmul %272, %0, %cst_117 {dimension_numbers = #tpu.dot_dimension_numbers<[1], [0], [0], [1], [0, 0, 1, 1], [], []>} : vector<16x4xf32>, vector<4x64xf32>, vector<16x64xf32> -> vector<16x64xf32>
    %cst_118 = arith.constant dense<0.000000e+00> : vector<16x64xf32>
    %274 = tpu.matmul %271, %0, %cst_118 {dimension_numbers = #tpu.dot_dimension_numbers<[1], [0], [0], [1], [0, 0, 1, 1], [], []>} : vector<16x4xf32>, vector<4x64xf32>, vector<16x64xf32> -> vector<16x64xf32>
    %275 = arith.mulf %274, %1 : vector<16x64xf32>
    %cst_119 = arith.constant dense<0.000000e+00> : vector<16x64xf32>
    %276 = tpu.matmul %2, %275, %cst_119 {dimension_numbers = #tpu.dot_dimension_numbers<[1], [0], [0], [1], [0, 0, 1, 1], [], []>} : vector<16x16xf32>, vector<16x64xf32>, vector<16x64xf32> -> vector<16x64xf32>
    %277 = arith.addf %273, %276 : vector<16x64xf32>
    %cst_120 = arith.constant 0.000000e+00 : f32
    %278 = vector.broadcast %cst_120 : f32 to vector<16x64xf32>
    %279 = arith.cmpf oge, %277, %278 : vector<16x64xf32>
    %cst_121 = arith.constant 2.000000e-01 : f32
    %280 = vector.broadcast %cst_121 : f32 to vector<16x64xf32>
    %281 = arith.mulf %280, %277 : vector<16x64xf32>
    %282 = arith.select %279, %277, %281 : vector<16x64xi1>, vector<16x64xf32>
    %c0_122 = arith.constant 0 : index
    %c0_123 = arith.constant 0 : index
    %283 = vector.load %arg1[%c0_122, %c0_123] : memref<16x64xf32, #tpu.memory_space<vmem>>, vector<16x64xf32>
    %284 = arith.addf %282, %283 : vector<16x64xf32>
    %cst_124 = arith.constant dense<0xFF800000> : vector<16xf32>
    %285 = vector.multi_reduction <maximumf>, %284, %cst_124 [1] : vector<16x64xf32> to vector<16xf32>
    %286 = vector.shape_cast %285 : vector<16xf32> to vector<16x1xf32>
    %287 = vector.broadcast %286 : vector<16x1xf32> to vector<16x64xf32>
    %288 = arith.subf %284, %287 : vector<16x64xf32>
    %289 = math.exp %288 : vector<16x64xf32>
    %cst_125 = arith.constant dense<0.000000e+00> : vector<16x4xf32>
    %290 = tpu.matmul %289, %3, %cst_125 {dimension_numbers = #tpu.dot_dimension_numbers<[1], [0], [0], [1], [0, 0, 1, 1], [], []>} : vector<16x64xf32>, vector<64x4xf32>, vector<16x4xf32> -> vector<16x4xf32>
    %291 = tpu.reciprocal %290 {approx = true} : vector<16x4xf32> -> vector<16x4xf32>
    %cst_126 = arith.constant dense<0.000000e+00> : vector<16x64xf32>
    %292 = tpu.matmul %291, %0, %cst_126 {dimension_numbers = #tpu.dot_dimension_numbers<[1], [0], [0], [1], [0, 0, 1, 1], [], []>} : vector<16x4xf32>, vector<4x64xf32>, vector<16x64xf32> -> vector<16x64xf32>
    %293 = arith.mulf %289, %292 : vector<16x64xf32>
    %294 = tpu.concatenate %270, %270, %270, %270 in 0 : vector<16x32xf32>, vector<16x32xf32>, vector<16x32xf32>, vector<16x32xf32> -> vector<64x32xf32>
    %295 = arith.mulf %294, %4 : vector<64x32xf32>
    %296 = arith.truncf %293 : vector<16x64xf32> to vector<16x64xbf16>
    %297 = arith.truncf %295 : vector<64x32xf32> to vector<64x32xbf16>
    %cst_127 = arith.constant dense<0.000000e+00> : vector<16x32xf32>
    %298 = tpu.matmul %296, %297, %cst_127 {dimension_numbers = #tpu.dot_dimension_numbers<[1], [0], [0], [1], [0, 0, 1, 1], [], []>} : vector<16x64xbf16>, vector<64x32xbf16>, vector<16x32xf32> -> vector<16x32xf32>
    %299 = vector.extract_strided_slice %269 {offsets = [0, 32], sizes = [16, 32], strides = [1, 1]} : vector<16x160xf32> to vector<16x32xf32>
    %300 = vector.extract_strided_slice %269 {offsets = [0, 68], sizes = [16, 4], strides = [1, 1]} : vector<16x160xf32> to vector<16x4xf32>
    %301 = vector.extract_strided_slice %269 {offsets = [0, 152], sizes = [16, 4], strides = [1, 1]} : vector<16x160xf32> to vector<16x4xf32>
    %cst_128 = arith.constant dense<0.000000e+00> : vector<16x64xf32>
    %302 = tpu.matmul %301, %0, %cst_128 {dimension_numbers = #tpu.dot_dimension_numbers<[1], [0], [0], [1], [0, 0, 1, 1], [], []>} : vector<16x4xf32>, vector<4x64xf32>, vector<16x64xf32> -> vector<16x64xf32>
    %cst_129 = arith.constant dense<0.000000e+00> : vector<16x64xf32>
    %303 = tpu.matmul %300, %0, %cst_129 {dimension_numbers = #tpu.dot_dimension_numbers<[1], [0], [0], [1], [0, 0, 1, 1], [], []>} : vector<16x4xf32>, vector<4x64xf32>, vector<16x64xf32> -> vector<16x64xf32>
    %304 = arith.mulf %303, %1 : vector<16x64xf32>
    %cst_130 = arith.constant dense<0.000000e+00> : vector<16x64xf32>
    %305 = tpu.matmul %2, %304, %cst_130 {dimension_numbers = #tpu.dot_dimension_numbers<[1], [0], [0], [1], [0, 0, 1, 1], [], []>} : vector<16x16xf32>, vector<16x64xf32>, vector<16x64xf32> -> vector<16x64xf32>
    %306 = arith.addf %302, %305 : vector<16x64xf32>
    %cst_131 = arith.constant 0.000000e+00 : f32
    %307 = vector.broadcast %cst_131 : f32 to vector<16x64xf32>
    %308 = arith.cmpf oge, %306, %307 : vector<16x64xf32>
    %cst_132 = arith.constant 2.000000e-01 : f32
    %309 = vector.broadcast %cst_132 : f32 to vector<16x64xf32>
    %310 = arith.mulf %309, %306 : vector<16x64xf32>
    %311 = arith.select %308, %306, %310 : vector<16x64xi1>, vector<16x64xf32>
    %c0_133 = arith.constant 0 : index
    %c0_134 = arith.constant 0 : index
    %312 = vector.load %arg2[%c0_133, %c0_134] : memref<16x64xf32, #tpu.memory_space<vmem>>, vector<16x64xf32>
    %313 = arith.addf %311, %312 : vector<16x64xf32>
    %cst_135 = arith.constant dense<0xFF800000> : vector<16xf32>
    %314 = vector.multi_reduction <maximumf>, %313, %cst_135 [1] : vector<16x64xf32> to vector<16xf32>
    %315 = vector.shape_cast %314 : vector<16xf32> to vector<16x1xf32>
    %316 = vector.broadcast %315 : vector<16x1xf32> to vector<16x64xf32>
    %317 = arith.subf %313, %316 : vector<16x64xf32>
    %318 = math.exp %317 : vector<16x64xf32>
    %cst_136 = arith.constant dense<0.000000e+00> : vector<16x4xf32>
    %319 = tpu.matmul %318, %3, %cst_136 {dimension_numbers = #tpu.dot_dimension_numbers<[1], [0], [0], [1], [0, 0, 1, 1], [], []>} : vector<16x64xf32>, vector<64x4xf32>, vector<16x4xf32> -> vector<16x4xf32>
    %320 = tpu.reciprocal %319 {approx = true} : vector<16x4xf32> -> vector<16x4xf32>
    %cst_137 = arith.constant dense<0.000000e+00> : vector<16x64xf32>
    %321 = tpu.matmul %320, %0, %cst_137 {dimension_numbers = #tpu.dot_dimension_numbers<[1], [0], [0], [1], [0, 0, 1, 1], [], []>} : vector<16x4xf32>, vector<4x64xf32>, vector<16x64xf32> -> vector<16x64xf32>
    %322 = arith.mulf %318, %321 : vector<16x64xf32>
    %323 = tpu.concatenate %299, %299, %299, %299 in 0 : vector<16x32xf32>, vector<16x32xf32>, vector<16x32xf32>, vector<16x32xf32> -> vector<64x32xf32>
    %324 = arith.mulf %323, %4 : vector<64x32xf32>
    %325 = arith.truncf %322 : vector<16x64xf32> to vector<16x64xbf16>
    %326 = arith.truncf %324 : vector<64x32xf32> to vector<64x32xbf16>
    %cst_138 = arith.constant dense<0.000000e+00> : vector<16x32xf32>
    %327 = tpu.matmul %325, %326, %cst_138 {dimension_numbers = #tpu.dot_dimension_numbers<[1], [0], [0], [1], [0, 0, 1, 1], [], []>} : vector<16x64xbf16>, vector<64x32xbf16>, vector<16x32xf32> -> vector<16x32xf32>
    %328 = vector.extract_strided_slice %269 {offsets = [0, 80], sizes = [16, 32], strides = [1, 1]} : vector<16x160xf32> to vector<16x32xf32>
    %329 = vector.extract_strided_slice %269 {offsets = [0, 144], sizes = [16, 4], strides = [1, 1]} : vector<16x160xf32> to vector<16x4xf32>
    %330 = vector.extract_strided_slice %269 {offsets = [0, 76], sizes = [16, 4], strides = [1, 1]} : vector<16x160xf32> to vector<16x4xf32>
    %cst_139 = arith.constant dense<0.000000e+00> : vector<16x64xf32>
    %331 = tpu.matmul %330, %0, %cst_139 {dimension_numbers = #tpu.dot_dimension_numbers<[1], [0], [0], [1], [0, 0, 1, 1], [], []>} : vector<16x4xf32>, vector<4x64xf32>, vector<16x64xf32> -> vector<16x64xf32>
    %cst_140 = arith.constant dense<0.000000e+00> : vector<16x64xf32>
    %332 = tpu.matmul %329, %0, %cst_140 {dimension_numbers = #tpu.dot_dimension_numbers<[1], [0], [0], [1], [0, 0, 1, 1], [], []>} : vector<16x4xf32>, vector<4x64xf32>, vector<16x64xf32> -> vector<16x64xf32>
    %333 = arith.mulf %332, %1 : vector<16x64xf32>
    %cst_141 = arith.constant dense<0.000000e+00> : vector<16x64xf32>
    %334 = tpu.matmul %2, %333, %cst_141 {dimension_numbers = #tpu.dot_dimension_numbers<[1], [0], [0], [1], [0, 0, 1, 1], [], []>} : vector<16x16xf32>, vector<16x64xf32>, vector<16x64xf32> -> vector<16x64xf32>
    %335 = arith.addf %331, %334 : vector<16x64xf32>
    %cst_142 = arith.constant 0.000000e+00 : f32
    %336 = vector.broadcast %cst_142 : f32 to vector<16x64xf32>
    %337 = arith.cmpf oge, %335, %336 : vector<16x64xf32>
    %cst_143 = arith.constant 2.000000e-01 : f32
    %338 = vector.broadcast %cst_143 : f32 to vector<16x64xf32>
    %339 = arith.mulf %338, %335 : vector<16x64xf32>
    %340 = arith.select %337, %335, %339 : vector<16x64xi1>, vector<16x64xf32>
    %c0_144 = arith.constant 0 : index
    %c0_145 = arith.constant 0 : index
    %341 = vector.load %arg3[%c0_144, %c0_145] : memref<16x64xf32, #tpu.memory_space<vmem>>, vector<16x64xf32>
    %342 = arith.addf %340, %341 : vector<16x64xf32>
    %cst_146 = arith.constant dense<0xFF800000> : vector<16xf32>
    %343 = vector.multi_reduction <maximumf>, %342, %cst_146 [1] : vector<16x64xf32> to vector<16xf32>
    %344 = vector.shape_cast %343 : vector<16xf32> to vector<16x1xf32>
    %345 = vector.broadcast %344 : vector<16x1xf32> to vector<16x64xf32>
    %346 = arith.subf %342, %345 : vector<16x64xf32>
    %347 = math.exp %346 : vector<16x64xf32>
    %cst_147 = arith.constant dense<0.000000e+00> : vector<16x4xf32>
    %348 = tpu.matmul %347, %3, %cst_147 {dimension_numbers = #tpu.dot_dimension_numbers<[1], [0], [0], [1], [0, 0, 1, 1], [], []>} : vector<16x64xf32>, vector<64x4xf32>, vector<16x4xf32> -> vector<16x4xf32>
    %349 = tpu.reciprocal %348 {approx = true} : vector<16x4xf32> -> vector<16x4xf32>
    %cst_148 = arith.constant dense<0.000000e+00> : vector<16x64xf32>
    %350 = tpu.matmul %349, %0, %cst_148 {dimension_numbers = #tpu.dot_dimension_numbers<[1], [0], [0], [1], [0, 0, 1, 1], [], []>} : vector<16x4xf32>, vector<4x64xf32>, vector<16x64xf32> -> vector<16x64xf32>
    %351 = arith.mulf %347, %350 : vector<16x64xf32>
    %352 = tpu.concatenate %328, %328, %328, %328 in 0 : vector<16x32xf32>, vector<16x32xf32>, vector<16x32xf32>, vector<16x32xf32> -> vector<64x32xf32>
    %353 = arith.mulf %352, %4 : vector<64x32xf32>
    %354 = arith.truncf %351 : vector<16x64xf32> to vector<16x64xbf16>
    %355 = arith.truncf %353 : vector<64x32xf32> to vector<64x32xbf16>
    %cst_149 = arith.constant dense<0.000000e+00> : vector<16x32xf32>
    %356 = tpu.matmul %354, %355, %cst_149 {dimension_numbers = #tpu.dot_dimension_numbers<[1], [0], [0], [1], [0, 0, 1, 1], [], []>} : vector<16x64xbf16>, vector<64x32xbf16>, vector<16x32xf32> -> vector<16x32xf32>
    %357 = arith.addf %298, %356 : vector<16x32xf32>
    %358 = vector.extract_strided_slice %269 {offsets = [0, 112], sizes = [16, 32], strides = [1, 1]} : vector<16x160xf32> to vector<16x32xf32>
    %359 = vector.extract_strided_slice %269 {offsets = [0, 148], sizes = [16, 4], strides = [1, 1]} : vector<16x160xf32> to vector<16x4xf32>
    %360 = vector.extract_strided_slice %269 {offsets = [0, 156], sizes = [16, 4], strides = [1, 1]} : vector<16x160xf32> to vector<16x4xf32>
    %cst_150 = arith.constant dense<0.000000e+00> : vector<16x64xf32>
    %361 = tpu.matmul %360, %0, %cst_150 {dimension_numbers = #tpu.dot_dimension_numbers<[1], [0], [0], [1], [0, 0, 1, 1], [], []>} : vector<16x4xf32>, vector<4x64xf32>, vector<16x64xf32> -> vector<16x64xf32>
    %cst_151 = arith.constant dense<0.000000e+00> : vector<16x64xf32>
    %362 = tpu.matmul %359, %0, %cst_151 {dimension_numbers = #tpu.dot_dimension_numbers<[1], [0], [0], [1], [0, 0, 1, 1], [], []>} : vector<16x4xf32>, vector<4x64xf32>, vector<16x64xf32> -> vector<16x64xf32>
    %363 = arith.mulf %362, %1 : vector<16x64xf32>
    %cst_152 = arith.constant dense<0.000000e+00> : vector<16x64xf32>
    %364 = tpu.matmul %2, %363, %cst_152 {dimension_numbers = #tpu.dot_dimension_numbers<[1], [0], [0], [1], [0, 0, 1, 1], [], []>} : vector<16x16xf32>, vector<16x64xf32>, vector<16x64xf32> -> vector<16x64xf32>
    %365 = arith.addf %361, %364 : vector<16x64xf32>
    %cst_153 = arith.constant 0.000000e+00 : f32
    %366 = vector.broadcast %cst_153 : f32 to vector<16x64xf32>
    %367 = arith.cmpf oge, %365, %366 : vector<16x64xf32>
    %cst_154 = arith.constant 2.000000e-01 : f32
    %368 = vector.broadcast %cst_154 : f32 to vector<16x64xf32>
    %369 = arith.mulf %368, %365 : vector<16x64xf32>
    %370 = arith.select %367, %365, %369 : vector<16x64xi1>, vector<16x64xf32>
    %c0_155 = arith.constant 0 : index
    %c0_156 = arith.constant 0 : index
    %371 = vector.load %arg4[%c0_155, %c0_156] : memref<16x64xf32, #tpu.memory_space<vmem>>, vector<16x64xf32>
    %372 = arith.addf %370, %371 : vector<16x64xf32>
    %cst_157 = arith.constant dense<0xFF800000> : vector<16xf32>
    %373 = vector.multi_reduction <maximumf>, %372, %cst_157 [1] : vector<16x64xf32> to vector<16xf32>
    %374 = vector.shape_cast %373 : vector<16xf32> to vector<16x1xf32>
    %375 = vector.broadcast %374 : vector<16x1xf32> to vector<16x64xf32>
    %376 = arith.subf %372, %375 : vector<16x64xf32>
    %377 = math.exp %376 : vector<16x64xf32>
    %cst_158 = arith.constant dense<0.000000e+00> : vector<16x4xf32>
    %378 = tpu.matmul %377, %3, %cst_158 {dimension_numbers = #tpu.dot_dimension_numbers<[1], [0], [0], [1], [0, 0, 1, 1], [], []>} : vector<16x64xf32>, vector<64x4xf32>, vector<16x4xf32> -> vector<16x4xf32>
    %379 = tpu.reciprocal %378 {approx = true} : vector<16x4xf32> -> vector<16x4xf32>
    %cst_159 = arith.constant dense<0.000000e+00> : vector<16x64xf32>
    %380 = tpu.matmul %379, %0, %cst_159 {dimension_numbers = #tpu.dot_dimension_numbers<[1], [0], [0], [1], [0, 0, 1, 1], [], []>} : vector<16x4xf32>, vector<4x64xf32>, vector<16x64xf32> -> vector<16x64xf32>
    %381 = arith.mulf %377, %380 : vector<16x64xf32>
    %382 = tpu.concatenate %358, %358, %358, %358 in 0 : vector<16x32xf32>, vector<16x32xf32>, vector<16x32xf32>, vector<16x32xf32> -> vector<64x32xf32>
    %383 = arith.mulf %382, %4 : vector<64x32xf32>
    %384 = arith.truncf %381 : vector<16x64xf32> to vector<16x64xbf16>
    %385 = arith.truncf %383 : vector<64x32xf32> to vector<64x32xbf16>
    %cst_160 = arith.constant dense<0.000000e+00> : vector<16x32xf32>
    %386 = tpu.matmul %384, %385, %cst_160 {dimension_numbers = #tpu.dot_dimension_numbers<[1], [0], [0], [1], [0, 0, 1, 1], [], []>} : vector<16x64xbf16>, vector<64x32xbf16>, vector<16x32xf32> -> vector<16x32xf32>
    %387 = arith.addf %327, %386 : vector<16x32xf32>
    %cst_161 = arith.constant 0.000000e+00 : f32
    %388 = vector.broadcast %cst_161 : f32 to vector<16x32xf32>
    %389 = arith.maximumf %357, %388 : vector<16x32xf32>
    %cst_162 = arith.constant 0.000000e+00 : f32
    %390 = vector.broadcast %cst_162 : f32 to vector<16x32xf32>
    %391 = arith.maximumf %387, %390 : vector<16x32xf32>
    %392 = tpu.concatenate %389, %391 in 1 : vector<16x32xf32>, vector<16x32xf32> -> vector<16x64xf32>
    %393 = arith.truncf %392 : vector<16x64xf32> to vector<16x64xbf16>
    %c0_163 = arith.constant 0 : index
    %c0_164 = arith.constant 0 : index
    %394 = vector.load %arg16[%c0_163, %c0_164] : memref<64x128xbf16, #tpu.memory_space<vmem>>, vector<64x128xbf16>
    %cst_165 = arith.constant dense<0.000000e+00> : vector<16x128xf32>
    %395 = tpu.matmul %393, %394, %cst_165 {dimension_numbers = #tpu.dot_dimension_numbers<[1], [0], [0], [1], [0, 0, 1, 1], [], []>} : vector<16x64xbf16>, vector<64x128xbf16>, vector<16x128xf32> -> vector<16x128xf32>
    %c0_166 = arith.constant 0 : index
    %c0_167 = arith.constant 0 : index
    %396 = vector.load %arg17[%c0_166, %c0_167] : memref<1x128xf32, #tpu.memory_space<vmem>>, vector<1x128xf32>
    %397 = vector.broadcast %396 : vector<1x128xf32> to vector<16x128xf32>
    %398 = arith.addf %395, %397 : vector<16x128xf32>
    %399 = vector.extract_strided_slice %398 {offsets = [0, 0], sizes = [16, 32], strides = [1, 1]} : vector<16x128xf32> to vector<16x32xf32>
    %400 = vector.extract_strided_slice %398 {offsets = [0, 48], sizes = [16, 4], strides = [1, 1]} : vector<16x128xf32> to vector<16x4xf32>
    %401 = vector.extract_strided_slice %398 {offsets = [0, 56], sizes = [16, 4], strides = [1, 1]} : vector<16x128xf32> to vector<16x4xf32>
    %cst_168 = arith.constant dense<0.000000e+00> : vector<16x64xf32>
    %402 = tpu.matmul %401, %0, %cst_168 {dimension_numbers = #tpu.dot_dimension_numbers<[1], [0], [0], [1], [0, 0, 1, 1], [], []>} : vector<16x4xf32>, vector<4x64xf32>, vector<16x64xf32> -> vector<16x64xf32>
    %cst_169 = arith.constant dense<0.000000e+00> : vector<16x64xf32>
    %403 = tpu.matmul %400, %0, %cst_169 {dimension_numbers = #tpu.dot_dimension_numbers<[1], [0], [0], [1], [0, 0, 1, 1], [], []>} : vector<16x4xf32>, vector<4x64xf32>, vector<16x64xf32> -> vector<16x64xf32>
    %404 = arith.mulf %403, %1 : vector<16x64xf32>
    %cst_170 = arith.constant dense<0.000000e+00> : vector<16x64xf32>
    %405 = tpu.matmul %2, %404, %cst_170 {dimension_numbers = #tpu.dot_dimension_numbers<[1], [0], [0], [1], [0, 0, 1, 1], [], []>} : vector<16x16xf32>, vector<16x64xf32>, vector<16x64xf32> -> vector<16x64xf32>
    %406 = arith.addf %402, %405 : vector<16x64xf32>
    %cst_171 = arith.constant 0.000000e+00 : f32
    %407 = vector.broadcast %cst_171 : f32 to vector<16x64xf32>
    %408 = arith.cmpf oge, %406, %407 : vector<16x64xf32>
    %cst_172 = arith.constant 2.000000e-01 : f32
    %409 = vector.broadcast %cst_172 : f32 to vector<16x64xf32>
    %410 = arith.mulf %409, %406 : vector<16x64xf32>
    %411 = arith.select %408, %406, %410 : vector<16x64xi1>, vector<16x64xf32>
    %c0_173 = arith.constant 0 : index
    %c0_174 = arith.constant 0 : index
    %412 = vector.load %arg1[%c0_173, %c0_174] : memref<16x64xf32, #tpu.memory_space<vmem>>, vector<16x64xf32>
    %413 = arith.addf %411, %412 : vector<16x64xf32>
    %cst_175 = arith.constant dense<0xFF800000> : vector<16xf32>
    %414 = vector.multi_reduction <maximumf>, %413, %cst_175 [1] : vector<16x64xf32> to vector<16xf32>
    %415 = vector.shape_cast %414 : vector<16xf32> to vector<16x1xf32>
    %416 = vector.broadcast %415 : vector<16x1xf32> to vector<16x64xf32>
    %417 = arith.subf %413, %416 : vector<16x64xf32>
    %418 = math.exp %417 : vector<16x64xf32>
    %cst_176 = arith.constant dense<0.000000e+00> : vector<16x4xf32>
    %419 = tpu.matmul %418, %3, %cst_176 {dimension_numbers = #tpu.dot_dimension_numbers<[1], [0], [0], [1], [0, 0, 1, 1], [], []>} : vector<16x64xf32>, vector<64x4xf32>, vector<16x4xf32> -> vector<16x4xf32>
    %420 = tpu.reciprocal %419 {approx = true} : vector<16x4xf32> -> vector<16x4xf32>
    %cst_177 = arith.constant dense<0.000000e+00> : vector<16x64xf32>
    %421 = tpu.matmul %420, %0, %cst_177 {dimension_numbers = #tpu.dot_dimension_numbers<[1], [0], [0], [1], [0, 0, 1, 1], [], []>} : vector<16x4xf32>, vector<4x64xf32>, vector<16x64xf32> -> vector<16x64xf32>
    %422 = arith.mulf %418, %421 : vector<16x64xf32>
    %423 = vector.extract_strided_slice %399 {offsets = [0, 0], sizes = [16, 8], strides = [1, 1]} : vector<16x32xf32> to vector<16x8xf32>
    %424 = vector.extract_strided_slice %399 {offsets = [0, 8], sizes = [16, 8], strides = [1, 1]} : vector<16x32xf32> to vector<16x8xf32>
    %425 = vector.extract_strided_slice %399 {offsets = [0, 16], sizes = [16, 8], strides = [1, 1]} : vector<16x32xf32> to vector<16x8xf32>
    %426 = vector.extract_strided_slice %399 {offsets = [0, 24], sizes = [16, 8], strides = [1, 1]} : vector<16x32xf32> to vector<16x8xf32>
    %427 = tpu.concatenate %423, %424, %425, %426 in 0 : vector<16x8xf32>, vector<16x8xf32>, vector<16x8xf32>, vector<16x8xf32> -> vector<64x8xf32>
    %428 = arith.truncf %422 : vector<16x64xf32> to vector<16x64xbf16>
    %429 = arith.truncf %427 : vector<64x8xf32> to vector<64x8xbf16>
    %cst_178 = arith.constant dense<0.000000e+00> : vector<16x8xf32>
    %430 = tpu.matmul %428, %429, %cst_178 {dimension_numbers = #tpu.dot_dimension_numbers<[1], [0], [0], [1], [0, 0, 1, 1], [], []>} : vector<16x64xbf16>, vector<64x8xbf16>, vector<16x8xf32> -> vector<16x8xf32>
    %431 = vector.extract_strided_slice %398 {offsets = [0, 32], sizes = [16, 16], strides = [1, 1]} : vector<16x128xf32> to vector<16x16xf32>
    %432 = vector.extract_strided_slice %398 {offsets = [0, 52], sizes = [16, 4], strides = [1, 1]} : vector<16x128xf32> to vector<16x4xf32>
    %433 = vector.extract_strided_slice %398 {offsets = [0, 120], sizes = [16, 4], strides = [1, 1]} : vector<16x128xf32> to vector<16x4xf32>
    %cst_179 = arith.constant dense<0.000000e+00> : vector<16x64xf32>
    %434 = tpu.matmul %433, %0, %cst_179 {dimension_numbers = #tpu.dot_dimension_numbers<[1], [0], [0], [1], [0, 0, 1, 1], [], []>} : vector<16x4xf32>, vector<4x64xf32>, vector<16x64xf32> -> vector<16x64xf32>
    %cst_180 = arith.constant dense<0.000000e+00> : vector<16x64xf32>
    %435 = tpu.matmul %432, %0, %cst_180 {dimension_numbers = #tpu.dot_dimension_numbers<[1], [0], [0], [1], [0, 0, 1, 1], [], []>} : vector<16x4xf32>, vector<4x64xf32>, vector<16x64xf32> -> vector<16x64xf32>
    %436 = arith.mulf %435, %1 : vector<16x64xf32>
    %cst_181 = arith.constant dense<0.000000e+00> : vector<16x64xf32>
    %437 = tpu.matmul %2, %436, %cst_181 {dimension_numbers = #tpu.dot_dimension_numbers<[1], [0], [0], [1], [0, 0, 1, 1], [], []>} : vector<16x16xf32>, vector<16x64xf32>, vector<16x64xf32> -> vector<16x64xf32>
    %438 = arith.addf %434, %437 : vector<16x64xf32>
    %cst_182 = arith.constant 0.000000e+00 : f32
    %439 = vector.broadcast %cst_182 : f32 to vector<16x64xf32>
    %440 = arith.cmpf oge, %438, %439 : vector<16x64xf32>
    %cst_183 = arith.constant 2.000000e-01 : f32
    %441 = vector.broadcast %cst_183 : f32 to vector<16x64xf32>
    %442 = arith.mulf %441, %438 : vector<16x64xf32>
    %443 = arith.select %440, %438, %442 : vector<16x64xi1>, vector<16x64xf32>
    %c0_184 = arith.constant 0 : index
    %c0_185 = arith.constant 0 : index
    %444 = vector.load %arg2[%c0_184, %c0_185] : memref<16x64xf32, #tpu.memory_space<vmem>>, vector<16x64xf32>
    %445 = arith.addf %443, %444 : vector<16x64xf32>
    %cst_186 = arith.constant dense<0xFF800000> : vector<16xf32>
    %446 = vector.multi_reduction <maximumf>, %445, %cst_186 [1] : vector<16x64xf32> to vector<16xf32>
    %447 = vector.shape_cast %446 : vector<16xf32> to vector<16x1xf32>
    %448 = vector.broadcast %447 : vector<16x1xf32> to vector<16x64xf32>
    %449 = arith.subf %445, %448 : vector<16x64xf32>
    %450 = math.exp %449 : vector<16x64xf32>
    %cst_187 = arith.constant dense<0.000000e+00> : vector<16x4xf32>
    %451 = tpu.matmul %450, %3, %cst_187 {dimension_numbers = #tpu.dot_dimension_numbers<[1], [0], [0], [1], [0, 0, 1, 1], [], []>} : vector<16x64xf32>, vector<64x4xf32>, vector<16x4xf32> -> vector<16x4xf32>
    %452 = tpu.reciprocal %451 {approx = true} : vector<16x4xf32> -> vector<16x4xf32>
    %cst_188 = arith.constant dense<0.000000e+00> : vector<16x64xf32>
    %453 = tpu.matmul %452, %0, %cst_188 {dimension_numbers = #tpu.dot_dimension_numbers<[1], [0], [0], [1], [0, 0, 1, 1], [], []>} : vector<16x4xf32>, vector<4x64xf32>, vector<16x64xf32> -> vector<16x64xf32>
    %454 = arith.mulf %450, %453 : vector<16x64xf32>
    %455 = vector.extract_strided_slice %431 {offsets = [0, 0], sizes = [16, 4], strides = [1, 1]} : vector<16x16xf32> to vector<16x4xf32>
    %456 = vector.extract_strided_slice %431 {offsets = [0, 4], sizes = [16, 4], strides = [1, 1]} : vector<16x16xf32> to vector<16x4xf32>
    %457 = vector.extract_strided_slice %431 {offsets = [0, 8], sizes = [16, 4], strides = [1, 1]} : vector<16x16xf32> to vector<16x4xf32>
    %458 = vector.extract_strided_slice %431 {offsets = [0, 12], sizes = [16, 4], strides = [1, 1]} : vector<16x16xf32> to vector<16x4xf32>
    %459 = tpu.concatenate %455, %456, %457, %458 in 0 : vector<16x4xf32>, vector<16x4xf32>, vector<16x4xf32>, vector<16x4xf32> -> vector<64x4xf32>
    %460 = arith.truncf %454 : vector<16x64xf32> to vector<16x64xbf16>
    %461 = arith.truncf %459 : vector<64x4xf32> to vector<64x4xbf16>
    %cst_189 = arith.constant dense<0.000000e+00> : vector<16x4xf32>
    %462 = tpu.matmul %460, %461, %cst_189 {dimension_numbers = #tpu.dot_dimension_numbers<[1], [0], [0], [1], [0, 0, 1, 1], [], []>} : vector<16x64xbf16>, vector<64x4xbf16>, vector<16x4xf32> -> vector<16x4xf32>
    %463 = vector.extract_strided_slice %398 {offsets = [0, 64], sizes = [16, 32], strides = [1, 1]} : vector<16x128xf32> to vector<16x32xf32>
    %464 = vector.extract_strided_slice %398 {offsets = [0, 112], sizes = [16, 4], strides = [1, 1]} : vector<16x128xf32> to vector<16x4xf32>
    %465 = vector.extract_strided_slice %398 {offsets = [0, 60], sizes = [16, 4], strides = [1, 1]} : vector<16x128xf32> to vector<16x4xf32>
    %cst_190 = arith.constant dense<0.000000e+00> : vector<16x64xf32>
    %466 = tpu.matmul %465, %0, %cst_190 {dimension_numbers = #tpu.dot_dimension_numbers<[1], [0], [0], [1], [0, 0, 1, 1], [], []>} : vector<16x4xf32>, vector<4x64xf32>, vector<16x64xf32> -> vector<16x64xf32>
    %cst_191 = arith.constant dense<0.000000e+00> : vector<16x64xf32>
    %467 = tpu.matmul %464, %0, %cst_191 {dimension_numbers = #tpu.dot_dimension_numbers<[1], [0], [0], [1], [0, 0, 1, 1], [], []>} : vector<16x4xf32>, vector<4x64xf32>, vector<16x64xf32> -> vector<16x64xf32>
    %468 = arith.mulf %467, %1 : vector<16x64xf32>
    %cst_192 = arith.constant dense<0.000000e+00> : vector<16x64xf32>
    %469 = tpu.matmul %2, %468, %cst_192 {dimension_numbers = #tpu.dot_dimension_numbers<[1], [0], [0], [1], [0, 0, 1, 1], [], []>} : vector<16x16xf32>, vector<16x64xf32>, vector<16x64xf32> -> vector<16x64xf32>
    %470 = arith.addf %466, %469 : vector<16x64xf32>
    %cst_193 = arith.constant 0.000000e+00 : f32
    %471 = vector.broadcast %cst_193 : f32 to vector<16x64xf32>
    %472 = arith.cmpf oge, %470, %471 : vector<16x64xf32>
    %cst_194 = arith.constant 2.000000e-01 : f32
    %473 = vector.broadcast %cst_194 : f32 to vector<16x64xf32>
    %474 = arith.mulf %473, %470 : vector<16x64xf32>
    %475 = arith.select %472, %470, %474 : vector<16x64xi1>, vector<16x64xf32>
    %c0_195 = arith.constant 0 : index
    %c0_196 = arith.constant 0 : index
    %476 = vector.load %arg3[%c0_195, %c0_196] : memref<16x64xf32, #tpu.memory_space<vmem>>, vector<16x64xf32>
    %477 = arith.addf %475, %476 : vector<16x64xf32>
    %cst_197 = arith.constant dense<0xFF800000> : vector<16xf32>
    %478 = vector.multi_reduction <maximumf>, %477, %cst_197 [1] : vector<16x64xf32> to vector<16xf32>
    %479 = vector.shape_cast %478 : vector<16xf32> to vector<16x1xf32>
    %480 = vector.broadcast %479 : vector<16x1xf32> to vector<16x64xf32>
    %481 = arith.subf %477, %480 : vector<16x64xf32>
    %482 = math.exp %481 : vector<16x64xf32>
    %cst_198 = arith.constant dense<0.000000e+00> : vector<16x4xf32>
    %483 = tpu.matmul %482, %3, %cst_198 {dimension_numbers = #tpu.dot_dimension_numbers<[1], [0], [0], [1], [0, 0, 1, 1], [], []>} : vector<16x64xf32>, vector<64x4xf32>, vector<16x4xf32> -> vector<16x4xf32>
    %484 = tpu.reciprocal %483 {approx = true} : vector<16x4xf32> -> vector<16x4xf32>
    %cst_199 = arith.constant dense<0.000000e+00> : vector<16x64xf32>
    %485 = tpu.matmul %484, %0, %cst_199 {dimension_numbers = #tpu.dot_dimension_numbers<[1], [0], [0], [1], [0, 0, 1, 1], [], []>} : vector<16x4xf32>, vector<4x64xf32>, vector<16x64xf32> -> vector<16x64xf32>
    %486 = arith.mulf %482, %485 : vector<16x64xf32>
    %487 = vector.extract_strided_slice %463 {offsets = [0, 0], sizes = [16, 8], strides = [1, 1]} : vector<16x32xf32> to vector<16x8xf32>
    %488 = vector.extract_strided_slice %463 {offsets = [0, 8], sizes = [16, 8], strides = [1, 1]} : vector<16x32xf32> to vector<16x8xf32>
    %489 = vector.extract_strided_slice %463 {offsets = [0, 16], sizes = [16, 8], strides = [1, 1]} : vector<16x32xf32> to vector<16x8xf32>
    %490 = vector.extract_strided_slice %463 {offsets = [0, 24], sizes = [16, 8], strides = [1, 1]} : vector<16x32xf32> to vector<16x8xf32>
    %491 = tpu.concatenate %487, %488, %489, %490 in 0 : vector<16x8xf32>, vector<16x8xf32>, vector<16x8xf32>, vector<16x8xf32> -> vector<64x8xf32>
    %492 = arith.truncf %486 : vector<16x64xf32> to vector<16x64xbf16>
    %493 = arith.truncf %491 : vector<64x8xf32> to vector<64x8xbf16>
    %cst_200 = arith.constant dense<0.000000e+00> : vector<16x8xf32>
    %494 = tpu.matmul %492, %493, %cst_200 {dimension_numbers = #tpu.dot_dimension_numbers<[1], [0], [0], [1], [0, 0, 1, 1], [], []>} : vector<16x64xbf16>, vector<64x8xbf16>, vector<16x8xf32> -> vector<16x8xf32>
    %495 = arith.addf %430, %494 : vector<16x8xf32>
    %496 = vector.extract_strided_slice %398 {offsets = [0, 96], sizes = [16, 16], strides = [1, 1]} : vector<16x128xf32> to vector<16x16xf32>
    %497 = vector.extract_strided_slice %398 {offsets = [0, 116], sizes = [16, 4], strides = [1, 1]} : vector<16x128xf32> to vector<16x4xf32>
    %498 = vector.extract_strided_slice %398 {offsets = [0, 124], sizes = [16, 4], strides = [1, 1]} : vector<16x128xf32> to vector<16x4xf32>
    %cst_201 = arith.constant dense<0.000000e+00> : vector<16x64xf32>
    %499 = tpu.matmul %498, %0, %cst_201 {dimension_numbers = #tpu.dot_dimension_numbers<[1], [0], [0], [1], [0, 0, 1, 1], [], []>} : vector<16x4xf32>, vector<4x64xf32>, vector<16x64xf32> -> vector<16x64xf32>
    %cst_202 = arith.constant dense<0.000000e+00> : vector<16x64xf32>
    %500 = tpu.matmul %497, %0, %cst_202 {dimension_numbers = #tpu.dot_dimension_numbers<[1], [0], [0], [1], [0, 0, 1, 1], [], []>} : vector<16x4xf32>, vector<4x64xf32>, vector<16x64xf32> -> vector<16x64xf32>
    %501 = arith.mulf %500, %1 : vector<16x64xf32>
    %cst_203 = arith.constant dense<0.000000e+00> : vector<16x64xf32>
    %502 = tpu.matmul %2, %501, %cst_203 {dimension_numbers = #tpu.dot_dimension_numbers<[1], [0], [0], [1], [0, 0, 1, 1], [], []>} : vector<16x16xf32>, vector<16x64xf32>, vector<16x64xf32> -> vector<16x64xf32>
    %503 = arith.addf %499, %502 : vector<16x64xf32>
    %cst_204 = arith.constant 0.000000e+00 : f32
    %504 = vector.broadcast %cst_204 : f32 to vector<16x64xf32>
    %505 = arith.cmpf oge, %503, %504 : vector<16x64xf32>
    %cst_205 = arith.constant 2.000000e-01 : f32
    %506 = vector.broadcast %cst_205 : f32 to vector<16x64xf32>
    %507 = arith.mulf %506, %503 : vector<16x64xf32>
    %508 = arith.select %505, %503, %507 : vector<16x64xi1>, vector<16x64xf32>
    %c0_206 = arith.constant 0 : index
    %c0_207 = arith.constant 0 : index
    %509 = vector.load %arg4[%c0_206, %c0_207] : memref<16x64xf32, #tpu.memory_space<vmem>>, vector<16x64xf32>
    %510 = arith.addf %508, %509 : vector<16x64xf32>
    %cst_208 = arith.constant dense<0xFF800000> : vector<16xf32>
    %511 = vector.multi_reduction <maximumf>, %510, %cst_208 [1] : vector<16x64xf32> to vector<16xf32>
    %512 = vector.shape_cast %511 : vector<16xf32> to vector<16x1xf32>
    %513 = vector.broadcast %512 : vector<16x1xf32> to vector<16x64xf32>
    %514 = arith.subf %510, %513 : vector<16x64xf32>
    %515 = math.exp %514 : vector<16x64xf32>
    %cst_209 = arith.constant dense<0.000000e+00> : vector<16x4xf32>
    %516 = tpu.matmul %515, %3, %cst_209 {dimension_numbers = #tpu.dot_dimension_numbers<[1], [0], [0], [1], [0, 0, 1, 1], [], []>} : vector<16x64xf32>, vector<64x4xf32>, vector<16x4xf32> -> vector<16x4xf32>
    %517 = tpu.reciprocal %516 {approx = true} : vector<16x4xf32> -> vector<16x4xf32>
    %cst_210 = arith.constant dense<0.000000e+00> : vector<16x64xf32>
    %518 = tpu.matmul %517, %0, %cst_210 {dimension_numbers = #tpu.dot_dimension_numbers<[1], [0], [0], [1], [0, 0, 1, 1], [], []>} : vector<16x4xf32>, vector<4x64xf32>, vector<16x64xf32> -> vector<16x64xf32>
    %519 = arith.mulf %515, %518 : vector<16x64xf32>
    %520 = vector.extract_strided_slice %496 {offsets = [0, 0], sizes = [16, 4], strides = [1, 1]} : vector<16x16xf32> to vector<16x4xf32>
    %521 = vector.extract_strided_slice %496 {offsets = [0, 4], sizes = [16, 4], strides = [1, 1]} : vector<16x16xf32> to vector<16x4xf32>
    %522 = vector.extract_strided_slice %496 {offsets = [0, 8], sizes = [16, 4], strides = [1, 1]} : vector<16x16xf32> to vector<16x4xf32>
    %523 = vector.extract_strided_slice %496 {offsets = [0, 12], sizes = [16, 4], strides = [1, 1]} : vector<16x16xf32> to vector<16x4xf32>
    %524 = tpu.concatenate %520, %521, %522, %523 in 0 : vector<16x4xf32>, vector<16x4xf32>, vector<16x4xf32>, vector<16x4xf32> -> vector<64x4xf32>
    %525 = arith.truncf %519 : vector<16x64xf32> to vector<16x64xbf16>
    %526 = arith.truncf %524 : vector<64x4xf32> to vector<64x4xbf16>
    %cst_211 = arith.constant dense<0.000000e+00> : vector<16x4xf32>
    %527 = tpu.matmul %525, %526, %cst_211 {dimension_numbers = #tpu.dot_dimension_numbers<[1], [0], [0], [1], [0, 0, 1, 1], [], []>} : vector<16x64xbf16>, vector<64x4xbf16>, vector<16x4xf32> -> vector<16x4xf32>
    %528 = arith.addf %462, %527 : vector<16x4xf32>
    %cst_212 = arith.constant 0.000000e+00 : f32
    %529 = vector.broadcast %cst_212 : f32 to vector<16x120xf32>
    %530 = tpu.concatenate %495, %529 in 1 : vector<16x8xf32>, vector<16x120xf32> -> vector<16x128xf32>
    %531 = vector.extract_strided_slice %530 {offsets = [0, 0], sizes = [8, 128], strides = [1, 1]} : vector<16x128xf32> to vector<8x128xf32>
    %c0_213 = arith.constant 0 : index
    %c0_214 = arith.constant 0 : index
    %532 = vector.load %arg18[%c0_213, %c0_214] : memref<8x128xf32, #tpu.memory_space<vmem>>, vector<8x128xf32>
    tpu.vector_store %arg18[%c0_213, %c0_214], %531 {strides = array<i32>} : memref<8x128xf32, #tpu.memory_space<vmem>>, vector<8x128xf32>,
    %cst_215 = arith.constant 0.000000e+00 : f32
    %533 = vector.broadcast %cst_215 : f32 to vector<16x124xf32>
    %534 = tpu.concatenate %528, %533 in 1 : vector<16x4xf32>, vector<16x124xf32> -> vector<16x128xf32>
    %535 = vector.extract_strided_slice %534 {offsets = [8, 0], sizes = [8, 128], strides = [1, 1]} : vector<16x128xf32> to vector<8x128xf32>
    %c0_216 = arith.constant 0 : index
    %c0_217 = arith.constant 0 : index
    %536 = vector.load %arg19[%c0_216, %c0_217] : memref<8x128xf32, #tpu.memory_space<vmem>>, vector<8x128xf32>
    tpu.vector_store %arg19[%c0_216, %c0_217], %535 {strides = array<i32>} : memref<8x128xf32, #tpu.memory_space<vmem>>, vector<8x128xf32>,
    return
  }
}

</mosaic_0001>

<bundles_post_ra>
// kernel: tpu_custom_call.1
= control target key start
LH: loop header
LB: loop body
LE: loop exit
PB: predicated region body
PF: predicated region fallthrough
CT: control target
= control target key end

     0   :  { %s13155_s0 = inlined_call_operand.hbm [shape: f32[16,11], index: 0, kind: input, shape index: {}]   ;;  %s13156_s1 = inlined_call_operand.hbm [shape: f32[16,64], index: 1, kind: input, shape index: {}]   ;;  %s13157_s2 = inlined_call_operand.hbm [shape: f32[16,64], index: 2, kind: input, shape index: {}]   ;;  %s13158_s3 = inlined_call_operand.hbm [shape: f32[16,64], index: 3, kind: input, shape index: {}]   ;;  %s13159_s4 = inlined_call_operand.hbm [shape: f32[16,64], index: 4, kind: input, shape index: {}]   ;;  %s13160_s5 = inlined_call_operand.hbm [shape: f32[4,64], index: 5, kind: input, shape index: {}]   ;;  %s13161_s6 = inlined_call_operand.hbm [shape: f32[16,64], index: 6, kind: input, shape index: {}]   ;;  %s13162_s7 = inlined_call_operand.hbm [shape: f32[16,16], index: 7, kind: input, shape index: {}]   ;;  %s13163_s8 = inlined_call_operand.vmem [shape: f32[64,4], index: 8, kind: input, shape index: {}]   ;;  %s13164_s9 = inlined_call_operand.vmem [shape: f32[64,32], index: 9, kind: input, shape index: {}]   ;;  %s13165_s10 = inlined_call_operand.hbm [shape: bf16[11,160], index: 10, kind: input, shape index: {}]   ;;  %s13166_s11 = inlined_call_operand.hbm [shape: f32[1,160], index: 11, kind: input, shape index: {}]   ;;  %s13167_s12 = inlined_call_operand.vmem [shape: bf16[64,160], index: 12, kind: input, shape index: {}]   ;;  %s13168_s13 = inlined_call_operand.hbm [shape: f32[1,160], index: 13, kind: input, shape index: {}]   ;;  %s13169_s14 = inlined_call_operand.vmem [shape: bf16[64,160], index: 14, kind: input, shape index: {}]   ;;  %s13170_s15 = inlined_call_operand.hbm [shape: f32[1,160], index: 15, kind: input, shape index: {}]   ;;  %s13171_s16 = inlined_call_operand.vmem [shape: bf16[64,128], index: 16, kind: input, shape index: {}]   ;;  %s13172_s17 = inlined_call_operand.vmem [shape: f32[1,128], index: 17, kind: input, shape index: {}]   ;;  %s13173_s18 = inlined_call_operand.hbm [shape: f32[8,128], index: 18, kind: output, shape index: {0}]   ;;  %s13174_s19 = inlined_call_operand.hbm [shape: f32[8,128], index: 19, kind: output, shape index: {1}]  }
   0x1   :  { %13178 = sst [smem:[#allocation34_spill]] %s13155_s0 }
   0x2   :  { %13179 = sst [smem:[#allocation35_spill]] %s13156_s1 }
   0x3   :  { %13180 = sst [smem:[#allocation36_spill]] %s13157_s2 }
   0x4   :  { %13181 = sst [smem:[#allocation37_spill]] %s13158_s3 }
   0x5   :  { %25 = vsyncpa [#allocation3], 0 }
   0x6   :  { %26 = vsyncpa [#allocation6], 0 }
   0x7   :  { %27 = vsyncpa [#allocation9], 0 }
   0x8   :  { %28 = vsyncpa [#allocation12], 0 }
   0x9   :  { %29 = vsyncpa [#allocation15], 0 }
   0xa   :  { %30 = vsyncpa [#allocation18], 0 }
   0xb   :  { %31 = vsyncpa [#allocation21], 0 }
   0xc   :  { %32 = vsyncpa [#allocation4], 0 }
   0xd   :  { %33 = vsyncpa [#allocation24], 0  ;;  %s11030_s0 = smov [#allocation5]   ;;  %s11031_s20 = smov [#allocation8]  }
   0xe   :  { %s51_s30 = sshll.u32 %s11030_s0, 4  ;;  %s75_s21 = sshll.u32 %s11031_s20, 4  ;;  %s52_s30 = int_to_ptr.vmem [resolvable:$true] %s51_s30  ;;  %s76_s21 = int_to_ptr.vmem [resolvable:$true] %s75_s21 }
   0xf   :  { %s10740_s1 = scalar_lea.vmem %s52_s30, 256  ;;  %p10745_p1 = scmp.lt.s32.totalorder %s52_s30, %s52_s30 }
  0x10   :  { %p10741_p0 = scmp.ne.s32.totalorder %s52_s30, %s10740_s1  ;;  %p10746_p2 = scmp.lt.s32.totalorder %s10740_s1, %s10740_s1 }
  0x12   :  { %p10747_p3 = por %p10746_p2, %p10745_p1 }
  0x14   :  { %p10748_p4 = pnand %p10747_p3, %p10741_p0 }
  0x16   :  { %10751 = shalt.err (!%p10748_p4)
}
  0x17   :  { %s11032_s22 = smov 128   ;;  %s13175_s2 = smov 8  }
  0x18   :  { %s13182_s25 = sld [smem:[#allocation35_spill]]  ;;  %s10760_s3 = scalar_lea.vmem %s76_s21, 256 }
  0x19   :  { %p10761_p5 = scmp.ne.s32.totalorder %s76_s21, %s10760_s3  ;;  %p10765_p6 = scmp.lt.s32.totalorder %s76_s21, %s76_s21 }
  0x1a   :  { %p10766_p7 = scmp.lt.s32.totalorder %s10760_s3, %s10760_s3 }
  0x1c   :  { %p10767_p8 = por %p10766_p7, %p10765_p6 }
  0x1e   :  { %57 = dma.hbm_to_vmem [thread:$0]  %s13182_s25, 256, %s52_s30, [#allocation6], %s11032_s22, %s11032_s22, %s13175_s2  }
  0x1f   :  { %p10768_p9 = pnand %p10767_p8, %p10761_p5 }
  0x21   :  { %10771 = shalt.err (!%p10768_p9)
}
  0x22   :  { %s13183_s28 = sld [smem:[#allocation37_spill]]  ;;  %s11034_s29 = smov [#allocation11]  }
  0x23   :  { %s100_s0 = sshll.u32 %s11034_s29, 4  ;;  %s11035_s20 = smov [#allocation14]   ;;  %s101_s0 = int_to_ptr.vmem [resolvable:$true] %s100_s0 }
  0x24   :  { %s121_s1 = sshll.u32 %s11035_s20, 4  ;;  %s10780_s30 = scalar_lea.vmem %s101_s0, 64  ;;  %s122_s1 = int_to_ptr.vmem [resolvable:$true] %s121_s1 }
  0x25   :  { %p10781_p10 = scmp.ne.s32.totalorder %s101_s0, %s10780_s30  ;;  %p10785_p11 = scmp.lt.s32.totalorder %s101_s0, %s101_s0 }
  0x26   :  { %p10786_p12 = scmp.lt.s32.totalorder %s10780_s30, %s10780_s30 }
  0x28   :  { %81 = dma.hbm_to_vmem [thread:$0]  %s13183_s28, 256, %s76_s21, [#allocation9], %s11032_s22, %s11032_s22, %s13175_s2  }
  0x29   :  { %p10787_p13 = por %p10786_p12, %p10785_p11 }
  0x2b   :  { %p10788_p0 = pnand %p10787_p13, %p10781_p10 }
  0x2d   :  { %10791 = shalt.err (!%p10788_p0)
}
  0x2e   :  { %103 = dma.hbm_to_vmem [thread:$0]  %s13160_s5, 64, %s101_s0, [#allocation12]  }
  0x2f   :  { %s10800_s25 = scalar_lea.vmem %s122_s1, 256  ;;  %p10805_p2 = scmp.lt.s32.totalorder %s122_s1, %s122_s1 }
  0x30   :  { %p10801_p1 = scmp.ne.s32.totalorder %s122_s1, %s10800_s25  ;;  %p10806_p3 = scmp.lt.s32.totalorder %s10800_s25, %s10800_s25 }
  0x32   :  { %p10807_p4 = por %p10806_p3, %p10805_p2 }
  0x34   :  { %p10808_p5 = pnand %p10807_p4, %p10801_p1 }
  0x36   :  { %10811 = shalt.err (!%p10808_p5)
}
  0x37   :  { %127 = dma.hbm_to_vmem [thread:$0]  %s13162_s7, 256, %s122_s1, [#allocation15], %s11032_s22, %s11032_s22, %s13175_s2  }
  0x38   :  { %s11036_s26 = smov [#allocation17]   ;;  %s11037_s28 = smov [#allocation2]  }
  0x39   :  { %s150_s27 = sshll.u32 %s11036_s26, 4  ;;  %s39_s29 = sshll.u32 %s11037_s28, 4  ;;  %s151_s27 = int_to_ptr.vmem [resolvable:$true] %s150_s27  ;;  %s40_s29 = int_to_ptr.vmem [resolvable:$true] %s39_s29 }
  0x3a   :  { %s10820_s5 = scalar_lea.vmem %s151_s27, 32  ;;  %p10825_p7 = scmp.lt.s32.totalorder %s151_s27, %s151_s27 }
  0x3b   :  { %p10821_p6 = scmp.ne.s32.totalorder %s151_s27, %s10820_s5  ;;  %p10826_p8 = scmp.lt.s32.totalorder %s10820_s5, %s10820_s5 }
  0x3d   :  { %p10827_p9 = por %p10826_p8, %p10825_p7 }
  0x3f   :  { %p10828_p10 = pnand %p10827_p9, %p10821_p6 }
  0x41   :  { %10831 = shalt.err (!%p10828_p10)
}
  0x42   :  { %153 = dma.hbm_to_vmem [thread:$0]  %s13166_s11, 32, %s151_s27, [#allocation18]  }
  0x43   :  { %s10840_s30 = scalar_lea.vmem %s40_s29, 256  ;;  %p10845_p12 = scmp.lt.s32.totalorder %s40_s29, %s40_s29 }
  0x44   :  { %p10841_p11 = scmp.ne.s32.totalorder %s40_s29, %s10840_s30  ;;  %p10846_p13 = scmp.lt.s32.totalorder %s10840_s30, %s10840_s30 }
  0x46   :  { %p10847_p0 = por %p10846_p13, %p10845_p12 }
  0x48   :  { %p10848_p1 = pnand %p10847_p0, %p10841_p11 }
  0x4a   :  { %10851 = shalt.err (!%p10848_p1)
}
  0x4b   :  { %s13184_s23 = sld [smem:[#allocation34_spill]]  ;;  %s11038_s24 = smov [#allocation7]  }
  0x4c   :  { %s63_s25 = sshll.u32 %s11038_s24, 4  ;;  %s11039_s21 = smov [#allocation10]   ;;  %s64_s25 = int_to_ptr.vmem [resolvable:$true] %s63_s25 }
  0x4d   :  { %s87_s3 = sshll.u32 %s11039_s21, 4  ;;  %s10860_s11 = scalar_lea.vmem %s64_s25, 256  ;;  %s88_s3 = int_to_ptr.vmem [resolvable:$true] %s87_s3 }
  0x4e   :  { %p10861_p2 = scmp.ne.s32.totalorder %s64_s25, %s10860_s11  ;;  %p10865_p3 = scmp.lt.s32.totalorder %s64_s25, %s64_s25 }
  0x4f   :  { %p10866_p4 = scmp.lt.s32.totalorder %s10860_s11, %s10860_s11 }
  0x51   :  { %45 = dma.hbm_to_vmem [thread:$0]  %s13184_s23, 256, %s40_s29, [#allocation3], %s11032_s22, %s11032_s22, %s13175_s2  }
  0x52   :  { %p10867_p5 = por %p10866_p4, %p10865_p3 }
  0x54   :  { %p10868_p6 = pnand %p10867_p5, %p10861_p2 }
  0x56   :  { %10871 = shalt.err (!%p10868_p6)
}
  0x57   :  { %s13185_s28 = sld [smem:[#allocation36_spill]]  ;;  %s10880_s29 = scalar_lea.vmem %s88_s3, 256 }
  0x58   :  { %p10881_p7 = scmp.ne.s32.totalorder %s88_s3, %s10880_s29  ;;  %p10885_p8 = scmp.lt.s32.totalorder %s88_s3, %s88_s3 }
  0x59   :  { %p10886_p9 = scmp.lt.s32.totalorder %s10880_s29, %s10880_s29 }
  0x5b   :  { %p10887_p10 = por %p10886_p9, %p10885_p8 }
  0x5d   :  { %69 = dma.hbm_to_vmem [thread:$0]  %s13185_s28, 256, %s64_s25, [#allocation6], %s11032_s22, %s11032_s22, %s13175_s2  }
  0x5e   :  { %p10888_p11 = pnand %p10887_p10, %p10881_p7 }
  0x60   :  { %10891 = shalt.err (!%p10888_p11)
}
  0x61   :  { %93 = dma.hbm_to_vmem [thread:$0]  %s13159_s4, 256, %s88_s3, [#allocation9], %s11032_s22, %s11032_s22, %s13175_s2  }
  0x62   :  { %s11040_s20 = smov [#allocation13]   ;;  %s11041_s7 = smov [#allocation16]  }
  0x63   :  { %s109_s30 = sshll.u32 %s11040_s20, 4  ;;  %s137_s1 = sshll.u32 %s11041_s7, 4  ;;  %s110_s30 = int_to_ptr.vmem [resolvable:$true] %s109_s30  ;;  %s138_s1 = int_to_ptr.vmem [resolvable:$true] %s137_s1 }
  0x64   :  { %s10900_s23 = scalar_lea.vmem %s110_s30, 256  ;;  %p10905_p13 = scmp.lt.s32.totalorder %s110_s30, %s110_s30 }
  0x65   :  { %p10901_p12 = scmp.ne.s32.totalorder %s110_s30, %s10900_s23  ;;  %p10906_p0 = scmp.lt.s32.totalorder %s10900_s23, %s10900_s23 }
  0x67   :  { %p10907_p1 = por %p10906_p0, %p10905_p13 }
  0x69   :  { %p10908_p2 = pnand %p10907_p1, %p10901_p12 }
  0x6b   :  { %10911 = shalt.err (!%p10908_p2)
}
  0x6c   :  { %115 = dma.hbm_to_vmem [thread:$0]  %s13161_s6, 256, %s110_s30, [#allocation12], %s11032_s22, %s11032_s22, %s13175_s2  }
  0x6d   :  { %s10920_s4 = scalar_lea.vmem %s138_s1, 256  ;;  %p10925_p4 = scmp.lt.s32.totalorder %s138_s1, %s138_s1 }
  0x6e   :  { %p10921_p3 = scmp.ne.s32.totalorder %s138_s1, %s10920_s4  ;;  %p10926_p5 = scmp.lt.s32.totalorder %s10920_s4, %s10920_s4 }
  0x70   :  { %p10927_p6 = por %p10926_p5, %p10925_p4 }
  0x72   :  { %p10928_p7 = pnand %p10927_p6, %p10921_p3 }
  0x74   :  { %10931 = shalt.err (!%p10928_p7)
}
  0x75   :  { %143 = dma.hbm_to_vmem [thread:$0]  %s13165_s10, 256, %s138_s1, [#allocation15], %s11032_s22, %s11032_s22, %s13175_s2  }
  0x76   :  { %s11042_s11 = smov [#allocation19]   ;;  %s11043_s27 = smov [#allocation20]  }
  0x77   :  { %s162_s26 = sshll.u32 %s11042_s11, 4  ;;  %s174_s28 = sshll.u32 %s11043_s27, 4  ;;  %s163_s26 = int_to_ptr.vmem [resolvable:$true] %s162_s26  ;;  %s175_s28 = int_to_ptr.vmem [resolvable:$true] %s174_s28 }
  0x78   :  { %s10940_s6 = scalar_lea.vmem %s163_s26, 32  ;;  %p10945_p9 = scmp.lt.s32.totalorder %s163_s26, %s163_s26 }
  0x79   :  { %p10941_p8 = scmp.ne.s32.totalorder %s163_s26, %s10940_s6  ;;  %p10946_p10 = scmp.lt.s32.totalorder %s10940_s6, %s10940_s6 }
  0x7b   :  { %p10947_p11 = por %p10946_p10, %p10945_p9 }
  0x7d   :  { %p10948_p12 = pnand %p10947_p11, %p10941_p8 }
  0x7f   :  { %10951 = shalt.err (!%p10948_p12)
}
  0x80   :  { %165 = dma.hbm_to_vmem [thread:$0]  %s13168_s13, 32, %s163_s26, [#allocation18]  }
  0x81   :  { %s10960_s0 = scalar_lea.vmem %s175_s28, 32  ;;  %p10965_p0 = scmp.lt.s32.totalorder %s175_s28, %s175_s28 }
  0x82   :  { %p10961_p13 = scmp.ne.s32.totalorder %s175_s28, %s10960_s0  ;;  %p10966_p1 = scmp.lt.s32.totalorder %s10960_s0, %s10960_s0 }
  0x84   :  { %p10967_p2 = por %p10966_p1, %p10965_p0 }
  0x86   :  { %p10968_p3 = pnand %p10967_p2, %p10961_p13 }
  0x88   :  { %10971 = shalt.err (!%p10968_p3)
}
  0x89   :  { %177 = dma.hbm_to_vmem [thread:$0]  %s13170_s15, 32, %s175_s28, [#allocation21]  }
  0x8a   :  { %11012 = dma.done.wait [#allocation3], 256  }
  0x8b   :  { %11013 = vsyncadd [#allocation3], 4294967040 }
  0x8c   :  { %11014 = dma.done.wait [#allocation6], 512  }
  0x8d   :  { %11015 = vsyncadd [#allocation6], 4294966784 }
  0x8e   :  { %11016 = dma.done.wait [#allocation9], 512  }
  0x8f   :  { %11017 = vsyncadd [#allocation9], 4294966784 }
  0x90   :  { %11018 = dma.done.wait [#allocation12], 320  }
  0x91   :  { %11019 = vsyncadd [#allocation12], 4294966976 }
  0x92   :  { %11020 = dma.done.wait [#allocation15], 512  }
  0x93   :  { %11021 = vsyncadd [#allocation15], 4294966784 }
  0x94   :  { %11022 = dma.done.wait [#allocation18], 64  }
  0x95   :  { %11023 = vsyncadd [#allocation18], 4294967232 }
  0x96   :  { %11024 = dma.done.wait [#allocation21], 32  }
  0x97   :  { %11025 = vsyncadd [#allocation21], 4294967264  ;;  %vm269_vm0 = vcmask 1044480   ;;  %v13177_v0 = vmov 0   ;;  %vm270_vm1 = vcmask 1045504   ;;  %v11045_v1 = vmov 65535  }
  0x98   :  { %311 = vmatprep.mubr.bf16.mxu0 %v13177_v0  ;;  %v271_v2 = vsel %vm269_vm0, 4294967295, %v11045_v1  ;;  %v10494_v4 = vld [vmem:[#allocation16 + $0x4] ss:$8 sps:$4 sm:$0x3f]   ;;  %v241_v7 = vld [vmem:[#allocation2 + $0x8] sm:$0xff]  ;;  %vm265_vm2 = vcmask 89088   ;;  %v247_v11 = vlaneseq }
  0x99   :  { %v272_v3 = vsel %vm270_vm1, %v271_v2, 0  ;;  %v10496_v5 = vld [vmem:[#allocation16] ss:$8 sps:$4 sm:$0x3f]   ;;  %v240_v6 = vld [vmem:[#allocation2] sm:$0xff]  ;;  %vm333_vm3 = vcmask 1043456  }
  0x9a   :  { %v277_v8 = vand.u32 %v10494_v4, %v272_v3  ;;  %v274_v9 = vand.u32 %v10496_v5, %v272_v3  ;;  %v242_v10 = vpack.c.bf16 %v241_v7, %v240_v6  ;;  %v11232_v12 = vshrl.u32 %v247_v11, 7  ;;  %v11234_v13 = vld [vmem:[#allocation11] sm:$0xf]  ;;  %v11243_v15 = vld [vmem:[#allocation17] sm:$0x3]  ;;  %s11046_s13 = smov 56  }
  0x9b   :  { %9553 = vmatprep.subr.msk.mxu1 %vm333_vm3, %v11234_v13  ;;  %s11047_s15 = smov 64   ;;  %vm328_vm4 = vcmask 31744   ;;  %v11263_v24 = vld [vmem:[#allocation14] sm:$0xff]  ;;  %vm414_vm5 = vcmask 130048   ;;  %v11267_v25 = vld [vmem:[#allocation13 + $0x8] sm:$0xff]  ;;  %v11269_v27 = vld [vmem:[#allocation13] sm:$0xff] }
  0x9c   :  { %293 = vmatprep.subr.bf16.mxu0 %v277_v8  ;;  %9554 = vmatpush3.msk.msra.mxu1 %vm333_vm3, %v11234_v13  ;;  %v11241_v14 = vsub.s32 0, %v11232_v12  ;;  %v11273_v32 = vld [vmem:[#allocation14 + $0x8] sm:$0xff]  ;;  %v586_v41 = vld [vmem:[#allocation5 + $0x8] sm:$0xff]  ;;  %vm589_vm8 = vcmask 523264   ;;  %v11290_v50 = vsub.s32 1, %v11232_v12  ;;  %s11048_s23 = smov 60  }
  0x9d   :  { %294 = vmatpush1.bf16.msra.mxu0 %v274_v9  ;;  %v585_v44 = vld [vmem:[#allocation5] sm:$0xff]  ;;  %v11295_v51 = vld [vmem:[%s13163_s8 + $0x38] sm:$0xff]  ;;  %v11312_v55 = vld [vmem:[%s13163_s8 + $0x28] sm:$0xff]  ;;  %s11049_s26 = smov 104   ;;  %s11050_s10 = smov 112   ;;  %vm11056_vm13 = vmmov 0  }
  0x9e   :  { %v250_v16 = vrot.slane %v11243_v15, %v11241_v14  ;;  %9570 = vmatprep.subr.mxu0 %v11295_v51  ;;  %v11302_v53 = vld [vmem:[%s13163_s8 + $0x30] sm:$0xff]  ;;  %v254_v54 = vrot.slane %v11243_v15, %v11290_v50  ;;  %v11321_v57 = vld [vmem:[%s13163_s8 + $0x20] sm:$0xff]  ;;  %v11327_v58 = vld [vmem:[%s13163_s8 + $0x18] sm:$0xff]  ;;  %s11051_s22 = smov 52   ;;  %s11052_s7 = smov 80   ;;  %vm2460_vm0 = vcmask 261120  }
  0x9f   :  { %v11336_v59 = vld [vmem:[%s13163_s8 + $0x10] sm:$0xff]  ;;  %v11345_v60 = vld [vmem:[%s13163_s8 + $0x8] sm:$0xff]  ;;  %v11355_v62 = vld [vmem:[%s13163_s8] sm:$0xff]  ;;  %s11054_s30 = smov 48   ;;  %s11055_s1 = smov 108  }
  0xa0   :  { %8851 = vmatmul.mubr.msk.bf16.vlgmr.msra.gmra.mxu0 %vm265_vm2, %v242_v10  ;;  %s11057_s24 = smov 100   ;;  %s11058_s25 = smov 32  }
  0xa1   :  { %9571 = vmatpush3.msra.mxu0 %v11295_v51  ;;  %s11059_s4 = smov 16   ;;  %s11060_s21 = smov 96  }
  0xa2   :  { %9572 = vmatprep.subr.mxu0 %v11302_v53 }
  0xa3   :  { %9573 = vmatpush3.msra.mxu0 %v11302_v53 }
  0xa4   :  { %9574 = vmatprep.subr.mxu0 %v11312_v55 }
  0xa5   :  { %9575 = vmatpush3.msra.mxu0 %v11312_v55 }
  0xa6   :  { %9576 = vmatprep.subr.mxu0 %v11321_v57 }
  0xa7   :  { %9577 = vmatpush3.msra.mxu0 %v11321_v57 }
  0xa8   :  { %9578 = vmatprep.subr.mxu0 %v11327_v58 }
  0xa9   :  { %9579 = vmatpush3.msra.mxu0 %v11327_v58 }
  0xaa   :  { %9580 = vmatprep.subr.mxu0 %v11336_v59 }
  0xab   :  { %9581 = vmatpush3.msra.mxu0 %v11336_v59 }
  0xac   :  { %9582 = vmatprep.subr.mxu0 %v11345_v60 }
  0xad   :  { %9583 = vmatpush3.msra.mxu0 %v11345_v60 }
  0xae   :  { %9584 = vmatprep.subr.mxu0 %v11355_v62 }
  0xaf   :  { %9585 = vmatpush3.msra.mxu0 %v11355_v62 }
  0xb0   :  { %9589 = vmatprep.subr.msk.mxu0 %vm333_vm3, %v11234_v13 }
 0x160   :  { %v313_v17 = vpop.f32.mrf.mxu0 }
 0x161   :  { %v11247_v18 = vadd.f32 %v313_v17, %v250_v16 }
 0x162   :  { %v11249_v19 = vpop.f32.mrf.mxu0 }
 0x163   :  { %496 = vrot.lane.b32.xlu1 %v11247_v18, %s11046_s13  ;;  %324 = vrot.lane.b32.xlu0 %v11247_v18, %s11047_s15  ;;  %v11349_v61 = vadd.f32 %v11249_v19, %v254_v54 }
 0x164   :  { %v317_v20 = vpop.f32.mrf.mxu0 }
 0x165   :  { %v11255_v21 = vadd.f32 %v317_v20, %v250_v16 }
 0x166   :  { %v319_v52 = vpop.f32.mrf.mxu0 }
 0x167   :  { %498 = vrot.lane.b32.xlu1 %v11255_v21, %s11046_s13  ;;  %326 = vrot.lane.b32.xlu0 %v11255_v21, %s11047_s15  ;;  %v11315_v56 = vadd.f32 %v319_v52, %v254_v54 }
 0x1d5   :  { %v325_v22 = vpop.permute.xlu0 %324  ;;  %v497_v31 = vpop.permute.xlu1 %496 }
 0x1d6   :  { %9555 = vmatprep.mubr.msk.f32.mxu1 %vm328_vm4, %v325_v22 }
 0x1d9   :  { %v327_v23 = vpop.permute.xlu0 %326  ;;  %v499_v33 = vpop.permute.xlu1 %498 }
 0x1da   :  { %9556 = vmatmul.mubr.msk.f32.vlgmr.msra.gmra.mxu1 %vm328_vm4, %v327_v23 }
 0x1db   :  { %9562 = vmatprep.mubr.msk.f32.mxu1 %vm414_vm5, %v11263_v24 }
 0x29a   :  { %v9557_v26 = vpop.f32.mrf.mxu1 }
 0x29b   :  { %v413_v28 = vmul.f32 %v9557_v26, %v11267_v25 }
 0x29c   :  { %v403_v29 = vpop.f32.mrf.mxu1 }
 0x29d   :  { %v412_v30 = vmul.f32 %v403_v29, %v11269_v27  ;;  %9558 = vmatprep.subr.mxu1 %v413_v28 }
 0x29e   :  { %9559 = vmatpush3.msra.mxu1 %v413_v28 }
 0x29f   :  { %9560 = vmatprep.subr.mxu1 %v412_v30 }
 0x2a0   :  { %9561 = vmatpush3.msra.mxu1 %v412_v30 }
 0x2a1   :  { %9563 = vmatmul.mubr.msk.f32.vlgmr.msra.gmra.mxu1 %vm414_vm5, %v11273_v32  ;;  %9565 = vmatprep.subr.msk.mxu1 %vm333_vm3, %v11234_v13 }
 0x2a2   :  { %9566 = vmatpush3.msk.msra.mxu1 %vm333_vm3, %v11234_v13  ;;  %9567 = vmatprep.mubr.msk.f32.mxu1 %vm328_vm4, %v497_v31 }
 0x2a3   :  { %9594 = vmatprep.subr.msk.mxu1 %vm333_vm3, %v11234_v13 }
 0x2a5   :  { %9568 = vmatmul.mubr.msk.f32.vlgmr.msra.gmra.mxu1 %vm328_vm4, %v499_v33 }
 0x2a6   :  { %9595 = vmatpush3.msk.msra.mxu1 %vm333_vm3, %v11234_v13 }
 0x361   :  { %v9564_v34 = vpop.f32.mrf.mxu1 }
 0x363   :  { %v487_v35 = vpop.f32.mrf.mxu1 }
 0x365   :  { %v9569_v36 = vpop.f32.mrf.mxu1 }
 0x366   :  { %v576_v37 = vadd.f32 %v9569_v36, %v9564_v34 }
 0x367   :  { %v570_v38 = vpop.f32.mrf.mxu1 }
 0x368   :  { %vm580_vm6 = vcmp.ge.f32.partialorder %v576_v37, 0.0  ;;  %v582_v39 = vmul.f32 0.2, %v576_v37  ;;  %v571_v40 = vadd.f32 %v570_v38, %v487_v35 }
 0x36a   :  { %vm579_vm7 = vcmp.ge.f32.partialorder %v571_v40, 0.0  ;;  %v581_v42 = vmul.f32 0.2, %v571_v40  ;;  %v584_v43 = vsel %vm580_vm6, %v576_v37, %v582_v39  ;;  %v1033_v37 = vld [vmem:[#allocation7 + $0x8] sm:$0xff] }
 0x36b   :  { %v588_v45 = vadd.f32 %v586_v41, %v584_v43 }
 0x36c   :  { %v583_v46 = vsel %vm579_vm7, %v571_v40, %v581_v42  ;;  %v1032_v40 = vld [vmem:[#allocation7] sm:$0xff] }
 0x36d   :  { %v593_v47 = vsel %vm589_vm8, %v588_v45, -inf  ;;  %v587_v48 = vadd.f32 %v585_v44, %v583_v46 }
 0x36e   :  { %594 = vmax.xlane.f32.xlu1 %v593_v47 }
 0x36f   :  { %v590_v49 = vsel %vm589_vm8, %v587_v48, -inf }
 0x370   :  { %591 = vmax.xlane.f32.xlu0 %v590_v49 }
 0x37f   :  { %783 = vrot.lane.b32.xlu1 %v11255_v21, %s11048_s23 }
 0x383   :  { %945 = vrot.lane.b32.xlu1 %v11315_v56, %s11049_s26 }
 0x386   :  { %781 = vrot.lane.b32.xlu0 %v11247_v18, %s11048_s23 }
 0x38a   :  { %943 = vrot.lane.b32.xlu0 %v11349_v61, %s11049_s26 }
 0x3f7   :  { %v595_v63 = vpop.xlane.xlu1 %594 }
 0x3f8   :  { %v597_v1 = vsub.f32 %v588_v45, %v595_v63 }
 0x3f9   :  { %v592_v2 = vpop.xlane.xlu0 %591 }
 0x3fa   :  { %v596_v3 = vsub.f32 %v587_v48, %v592_v2  ;;  %v600_v4 = vmul.f32 1.442695, %v597_v1 }
 0x3fb   :  { %v784_v7 = vpop.permute.xlu1 %783 }
 0x3fc   :  { %v598_v5 = vmul.f32 1.442695, %v596_v3 }
 0x3fd   :  { %v782_v6 = vpop.permute.xlu0 %781 }
 0x3fe   :  { %10525 = vpow2.f32 %v598_v5  ;;  %9596 = vmatprep.mubr.msk.f32.mxu1 %vm328_vm4, %v782_v6 }
 0x3ff   :  { %10527 = vpow2.f32 %v600_v4  ;;  %9597 = vmatmul.mubr.msk.f32.vlgmr.msra.gmra.mxu1 %vm328_vm4, %v784_v7  ;;  %v946_v23 = vpop.permute.xlu1 %945 }
 0x400   :  { %9603 = vmatprep.mubr.msk.f32.mxu1 %vm414_vm5, %v11263_v24 }
 0x401   :  { %v944_v22 = vpop.permute.xlu0 %943 }
 0x40b   :  { %v11369_v8 = vpop.eup %10525 }
 0x40c   :  { %v11371_v9 = vpop.eup %10527  ;;  %9586 = vmatprep.mubr.msk.f32.mxu0 %vm589_vm8, %v11369_v8 }
 0x40d   :  { %9587 = vmatmul.mubr.msk.f32.vlgmr.msra.gmra.mxu0 %vm589_vm8, %v11371_v9 }
 0x40e   :  { %9590 = vmatpush3.msk.msra.mxu0 %vm333_vm3, %v11234_v13 }
 0x40f   :  { %9606 = vmatprep.subr.msk.mxu0 %vm333_vm3, %v11234_v13 }
 0x4bf   :  { %v9598_v10 = vpop.f32.mrf.mxu1 }
 0x4c0   :  { %v865_v11 = vmul.f32 %v9598_v10, %v11267_v25 }
 0x4c1   :  { %v855_v12 = vpop.f32.mrf.mxu1 }
 0x4c2   :  { %v864_v15 = vmul.f32 %v855_v12, %v11269_v27  ;;  %9599 = vmatprep.subr.mxu1 %v865_v11 }
 0x4c3   :  { %9600 = vmatpush3.msra.mxu1 %v865_v11 }
 0x4c4   :  { %9601 = vmatprep.subr.mxu1 %v864_v15 }
 0x4c5   :  { %9602 = vmatpush3.msra.mxu1 %v864_v15 }
 0x4c6   :  { %9604 = vmatmul.mubr.msk.f32.vlgmr.msra.gmra.mxu1 %vm414_vm5, %v11273_v32  ;;  %9611 = vmatprep.subr.mxu1 %v11295_v51 }
 0x4c7   :  { %9612 = vmatpush3.msra.mxu1 %v11295_v51 }
 0x4c8   :  { %9613 = vmatprep.subr.mxu1 %v11302_v53 }
 0x4c9   :  { %9614 = vmatpush3.msra.mxu1 %v11302_v53 }
 0x4ca   :  { %9615 = vmatprep.subr.mxu1 %v11312_v55 }
 0x4cb   :  { %9616 = vmatpush3.msra.mxu1 %v11312_v55 }
 0x4cc   :  { %9617 = vmatprep.subr.mxu1 %v11321_v57 }
 0x4cd   :  { %v9588_v16 = vpop.f32.mrf.mxu0  ;;  %9618 = vmatpush3.msra.mxu1 %v11321_v57 }
 0x4ce   :  { %9619 = vmatprep.subr.mxu1 %v11327_v58 }
 0x4cf   :  { %v674_v17 = vpop.f32.mrf.mxu0  ;;  %9620 = vmatpush3.msra.mxu1 %v11327_v58 }
 0x4d0   :  { %10529 = vrcp.f32 %v674_v17  ;;  %9621 = vmatprep.subr.mxu1 %v11336_v59 }
 0x4d1   :  { %10531 = vrcp.f32 %v9588_v16  ;;  %9622 = vmatpush3.msra.mxu1 %v11336_v59 }
 0x4d2   :  { %9623 = vmatprep.subr.mxu1 %v11345_v60 }
 0x4d3   :  { %9624 = vmatpush3.msra.mxu1 %v11345_v60 }
 0x4d4   :  { %9625 = vmatprep.subr.mxu1 %v11355_v62 }
 0x4d5   :  { %9626 = vmatpush3.msra.mxu1 %v11355_v62 }
 0x4d6   :  { %9652 = vmatprep.subr.mxu1 %v11295_v51 }
 0x4dd   :  { %v10530_v19 = vpop.eup %10529 }
 0x4de   :  { %v10532_v20 = vpop.eup %10531  ;;  %9591 = vmatprep.mubr.msk.f32.mxu0 %vm328_vm4, %v10530_v19 }
 0x4df   :  { %9592 = vmatmul.mubr.msk.f32.vlgmr.msra.gmra.mxu0 %vm328_vm4, %v10532_v20 }
 0x4e0   :  { %9607 = vmatpush3.msk.msra.mxu0 %vm333_vm3, %v11234_v13  ;;  %9608 = vmatprep.mubr.msk.f32.mxu0 %vm328_vm4, %v944_v22 }
 0x4e1   :  { %9630 = vmatprep.subr.msk.mxu0 %vm333_vm3, %v11234_v13 }
 0x4e3   :  { %9609 = vmatmul.mubr.msk.f32.vlgmr.msra.gmra.mxu0 %vm328_vm4, %v946_v23 }
 0x4e4   :  { %9631 = vmatpush3.msk.msra.mxu0 %vm333_vm3, %v11234_v13 }
 0x4e5   :  { %9635 = vmatprep.subr.msk.mxu0 %vm333_vm3, %v11234_v13 }
 0x586   :  { %v9605_v29 = vpop.f32.mrf.mxu1 }
 0x588   :  { %v932_v33 = vpop.f32.mrf.mxu1 }
 0x59f   :  { %v11414_v26 = vpop.f32.mrf.mxu0 }
 0x5a1   :  { %v11416_v28 = vpop.f32.mrf.mxu0 }
 0x5a3   :  { %v9610_v30 = vpop.f32.mrf.mxu0 }
 0x5a4   :  { %v1023_v31 = vadd.f32 %v9610_v30, %v9605_v29 }
 0x5a5   :  { %v1017_v34 = vpop.f32.mrf.mxu0 }
 0x5a6   :  { %vm1027_vm9 = vcmp.ge.f32.partialorder %v1023_v31, 0.0  ;;  %v1029_v35 = vmul.f32 0.2, %v1023_v31  ;;  %v1018_v36 = vadd.f32 %v1017_v34, %v932_v33 }
 0x5a8   :  { %v1028_v38 = vmul.f32 0.2, %v1018_v36  ;;  %v1031_v39 = vsel %vm1027_vm9, %v1023_v31, %v1029_v35  ;;  %vm1026_vm10 = vcmp.ge.f32.partialorder %v1018_v36, 0.0 }
 0x5a9   :  { %v1035_v41 = vadd.f32 %v1033_v37, %v1031_v39 }
 0x5aa   :  { %v1030_v42 = vsel %vm1026_vm10, %v1018_v36, %v1028_v38  ;;  %v1509_v38 = vld [vmem:[#allocation8 + $0x8] sm:$0xff] }
 0x5ab   :  { %v1039_v43 = vsel %vm589_vm8, %v1035_v41, -inf  ;;  %v1034_v44 = vadd.f32 %v1032_v40, %v1030_v42 }
 0x5ac   :  { %1040 = vmax.xlane.f32.xlu1 %v1039_v43 }
 0x5ad   :  { %v1036_v45 = vsel %vm589_vm8, %v1034_v44, -inf }
 0x5ae   :  { %1037 = vmax.xlane.f32.xlu0 %v1036_v45 }
 0x5bd   :  { %1261 = vrot.lane.b32.xlu1 %v11315_v56, %s11050_s10 }
 0x5c1   :  { %1421 = vrot.lane.b32.xlu1 %v11255_v21, %s11051_s22 }
 0x5c4   :  { %1259 = vrot.lane.b32.xlu0 %v11349_v61, %s11050_s10 }
 0x5c8   :  { %1419 = vrot.lane.b32.xlu0 %v11247_v18, %s11051_s22 }
 0x635   :  { %v1041_v46 = vpop.xlane.xlu1 %1040 }
 0x636   :  { %v1043_v47 = vsub.f32 %v1035_v41, %v1041_v46  ;;  %v1508_v41 = vld [vmem:[#allocation8] sm:$0xff] }
 0x637   :  { %v1038_v48 = vpop.xlane.xlu0 %1037 }
 0x638   :  { %v1042_v49 = vsub.f32 %v1034_v44, %v1038_v48  ;;  %v1046_v52 = vmul.f32 1.442695, %v1043_v47  ;;  %v11478_v47 = vld [vmem:[%s13164_s9 + $0x38] sm:$0xff]  ;;  %v11485_v48 = vld [vmem:[%s13164_s9 + $0x28] sm:$0xff] }
 0x639   :  { %v1262_v7 = vpop.permute.xlu1 %1261 }
 0x63a   :  { %v1044_v54 = vmul.f32 1.442695, %v1042_v49  ;;  %v11492_v49 = vld [vmem:[%s13164_s9 + $0x30] sm:$0xff] }
 0x63b   :  { %v1260_v6 = vpop.permute.xlu0 %1259 }
 0x63c   :  { %10533 = vpow2.f32 %v1044_v54  ;;  %v11506_v54 = vld [vmem:[%s13164_s9 + $0x20] sm:$0xff] }
 0x63d   :  { %10535 = vpow2.f32 %v1046_v52  ;;  %v1422_v29 = vpop.permute.xlu1 %1421  ;;  %v11499_v52 = vld [vmem:[%s13164_s9 + $0x18] sm:$0xff] }
 0x63f   :  { %v1420_v23 = vpop.permute.xlu0 %1419 }
 0x649   :  { %v10534_v63 = vpop.eup %10533 }
 0x64a   :  { %v10536_v1 = vpop.eup %10535  ;;  %9627 = vmatprep.mubr.msk.f32.mxu1 %vm589_vm8, %v10534_v63 }
 0x64b   :  { %9628 = vmatmul.mubr.msk.f32.vlgmr.msra.gmra.mxu1 %vm589_vm8, %v10536_v1 }
 0x64c   :  { %9653 = vmatpush3.msra.mxu1 %v11295_v51 }
 0x64d   :  { %9654 = vmatprep.subr.mxu1 %v11302_v53 }
 0x64e   :  { %9655 = vmatpush3.msra.mxu1 %v11302_v53 }
 0x64f   :  { %9656 = vmatprep.subr.mxu1 %v11312_v55 }
 0x650   :  { %9657 = vmatpush3.msra.mxu1 %v11312_v55 }
 0x651   :  { %9658 = vmatprep.subr.mxu1 %v11321_v57 }
 0x652   :  { %9659 = vmatpush3.msra.mxu1 %v11321_v57 }
 0x653   :  { %9660 = vmatprep.subr.mxu1 %v11327_v58 }
 0x654   :  { %9661 = vmatpush3.msra.mxu1 %v11327_v58 }
 0x655   :  { %9662 = vmatprep.subr.mxu1 %v11336_v59 }
 0x656   :  { %9663 = vmatpush3.msra.mxu1 %v11336_v59 }
 0x657   :  { %9664 = vmatprep.subr.mxu1 %v11345_v60 }
 0x658   :  { %9665 = vmatpush3.msra.mxu1 %v11345_v60 }
 0x659   :  { %9666 = vmatprep.subr.mxu1 %v11355_v62 }
 0x65a   :  { %9667 = vmatpush3.msra.mxu1 %v11355_v62 }
 0x70b   :  { %v9629_v2 = vpop.f32.mrf.mxu1 }
 0x70d   :  { %v1120_v3 = vpop.f32.mrf.mxu1 }
 0x70e   :  { %10537 = vrcp.f32 %v1120_v3  ;;  %v11529_v3 = vld [vmem:[%s13164_s9] sm:$0xff] }
 0x70f   :  { %10539 = vrcp.f32 %v9629_v2  ;;  %v11522_v2 = vld [vmem:[%s13164_s9 + $0x10] sm:$0xff] }
 0x71b   :  { %v10538_v4 = vpop.eup %10537 }
 0x71c   :  { %v10540_v5 = vpop.eup %10539  ;;  %9632 = vmatprep.mubr.msk.f32.mxu0 %vm328_vm4, %v10538_v4 }
 0x71d   :  { %9633 = vmatmul.mubr.msk.f32.vlgmr.msra.gmra.mxu0 %vm328_vm4, %v10540_v5 }
 0x71e   :  { %9636 = vmatpush3.msk.msra.mxu0 %vm333_vm3, %v11234_v13  ;;  %9637 = vmatprep.mubr.msk.f32.mxu0 %vm328_vm4, %v1260_v6 }
 0x721   :  { %9638 = vmatmul.mubr.msk.f32.vlgmr.msra.gmra.mxu0 %vm328_vm4, %v1262_v7 }
 0x722   :  { %9644 = vmatprep.mubr.msk.f32.mxu0 %vm414_vm5, %v11263_v24 }
 0x7dd   :  { %v9634_v10 = vpop.f32.mrf.mxu0 }
 0x7de   :  { %v11453_v12 = vmul.f32 %v10536_v1, %v9634_v10  ;;  %v11053_v1 = vmov 0.0  }
 0x7df   :  { %v1203_v11 = vpop.f32.mrf.mxu0  ;;  %9688 = vmatprep.subr.bf16.mxu1 %v11053_v1 }
 0x7e0   :  { %v11455_v15 = vmul.f32 %v10534_v63, %v1203_v11  ;;  %v11513_v63 = vld [vmem:[%s13164_s9 + $0x8] sm:$0xff] }
 0x7e1   :  { %v9639_v16 = vpop.f32.mrf.mxu0 }
 0x7e2   :  { %v1254_v17 = vpack.c.bf16 %v11453_v12, %v11455_v15  ;;  %v1343_v19 = vmul.f32 %v9639_v16, %v11267_v25 }
 0x7e3   :  { %v1333_v20 = vpop.f32.mrf.mxu0 }
 0x7e4   :  { %v1342_v22 = vmul.f32 %v1333_v20, %v11269_v27  ;;  %9640 = vmatprep.subr.mxu0 %v1343_v19 }
 0x7e5   :  { %9641 = vmatpush3.msra.mxu0 %v1343_v19 }
 0x7e6   :  { %9642 = vmatprep.subr.mxu0 %v1342_v22 }
 0x7e7   :  { %9643 = vmatpush3.msra.mxu0 %v1342_v22 }
 0x7e8   :  { %9645 = vmatmul.mubr.msk.f32.vlgmr.msra.gmra.mxu0 %vm414_vm5, %v11273_v32  ;;  %9647 = vmatprep.subr.msk.mxu0 %vm333_vm3, %v11234_v13 }
 0x7e9   :  { %9648 = vmatpush3.msk.msra.mxu0 %vm333_vm3, %v11234_v13  ;;  %9649 = vmatprep.mubr.msk.f32.mxu0 %vm328_vm4, %v1420_v23 }
 0x7ea   :  { %9671 = vmatprep.subr.msk.mxu0 %vm333_vm3, %v11234_v13 }
 0x7ec   :  { %9650 = vmatmul.mubr.msk.f32.vlgmr.msra.gmra.mxu0 %vm328_vm4, %v1422_v29 }
 0x7ed   :  { %9672 = vmatpush3.msk.msra.mxu0 %vm333_vm3, %v11234_v13 }
 0x7ee   :  { %9676 = vmatprep.subr.bf16.mxu0 %v11053_v1 }
 0x8a8   :  { %v9646_v30 = vpop.f32.mrf.mxu0 }
 0x8aa   :  { %v1410_v31 = vpop.f32.mrf.mxu0 }
 0x8ac   :  { %v9651_v33 = vpop.f32.mrf.mxu0 }
 0x8ad   :  { %v1499_v34 = vadd.f32 %v9651_v33, %v9646_v30 }
 0x8ae   :  { %v1493_v35 = vpop.f32.mrf.mxu0 }
 0x8af   :  { %vm1503_vm11 = vcmp.ge.f32.partialorder %v1499_v34, 0.0  ;;  %v1505_v36 = vmul.f32 0.2, %v1499_v34  ;;  %v1494_v37 = vadd.f32 %v1493_v35, %v1410_v31 }
 0x8b1   :  { %v1504_v39 = vmul.f32 0.2, %v1494_v37  ;;  %v1507_v40 = vsel %vm1503_vm11, %v1499_v34, %v1505_v36  ;;  %vm1502_vm12 = vcmp.ge.f32.partialorder %v1494_v37, 0.0 }
 0x8b2   :  { %v1511_v42 = vadd.f32 %v1509_v38, %v1507_v40 }
 0x8b3   :  { %v1506_v43 = vsel %vm1502_vm12, %v1494_v37, %v1504_v39 }
 0x8b4   :  { %v1515_v44 = vsel %vm589_vm8, %v1511_v42, -inf  ;;  %v1510_v45 = vadd.f32 %v1508_v41, %v1506_v43  ;;  %v775_v41 = vmul.f32 %v11255_v21, %v11478_v47 }
 0x8b5   :  { %1516 = vmax.xlane.f32.xlu1 %v1515_v44 }
 0x8b6   :  { %v1512_v46 = vsel %vm589_vm8, %v1510_v45, -inf }
 0x8b7   :  { %1513 = vmax.xlane.f32.xlu0 %v1512_v46 }
 0x8c6   :  { %1704 = vrot.lane.b32.xlu1 %v11478_v47, %s11052_s7 }
 0x8ca   :  { %1700 = vrot.lane.b32.xlu1 %v11485_v48, %s11052_s7 }
 0x8cd   :  { %1702 = vrot.lane.b32.xlu0 %v11492_v49, %s11052_s7 }
 0x8ce   :  { %1696 = vrot.lane.b32.xlu1 %v11499_v52, %s11052_s7 }
 0x8d1   :  { %1698 = vrot.lane.b32.xlu0 %v11506_v54, %s11052_s7 }
 0x8d2   :  { %1692 = vrot.lane.b32.xlu1 %v11513_v63, %s11052_s7 }
 0x8d5   :  { %1694 = vrot.lane.b32.xlu0 %v11522_v2, %s11052_s7 }
 0x8d9   :  { %1690 = vrot.lane.b32.xlu0 %v11529_v3, %s11052_s7 }
 0x93e   :  { %v1517_v4 = vpop.xlane.xlu1 %1516 }
 0x93f   :  { %v1519_v5 = vsub.f32 %v1511_v42, %v1517_v4 }
 0x940   :  { %v1514_v6 = vpop.xlane.xlu0 %1513 }
 0x941   :  { %v1518_v7 = vsub.f32 %v1510_v45, %v1514_v6  ;;  %v1522_v10 = vmul.f32 1.442695, %v1519_v5  ;;  %v774_v45 = vmul.f32 %v11247_v18, %v11492_v49 }
 0x942   :  { %v11533_v11 = vpop.permute.xlu1 %1704 }
 0x943   :  { %v1520_v16 = vmul.f32 1.442695, %v1518_v7  ;;  %v1721_v20 = vmul.f32 %v11533_v11, %v11255_v21  ;;  %v780_v5 = vpack.c.bf16 %v775_v41, %v774_v45  ;;  %v773_v7 = vmul.f32 %v11255_v21, %v11485_v48 }
 0x944   :  { %v11535_v19 = vpop.permute.xlu0 %1702 }
 0x945   :  { %10541 = vpow2.f32 %v1520_v16  ;;  %v1720_v22 = vmul.f32 %v11535_v19, %v11247_v18 }
 0x946   :  { %10543 = vpow2.f32 %v1522_v10  ;;  %v11541_v23 = vpop.permute.xlu1 %1700  ;;  %v772_v10 = vmul.f32 %v11247_v18, %v11506_v54 }
 0x947   :  { %v1726_v29 = vpack.c.bf16 %v1721_v20, %v1720_v22  ;;  %v1719_v31 = vmul.f32 %v11541_v23, %v11255_v21  ;;  %v771_v20 = vmul.f32 %v11255_v21, %v11499_v52  ;;  %v770_v22 = vmul.f32 %v11247_v18, %v11522_v2 }
 0x948   :  { %v11543_v30 = vpop.permute.xlu0 %1698  ;;  %v779_v16 = vpack.c.bf16 %v773_v7, %v772_v10 }
 0x949   :  { %v1718_v33 = vmul.f32 %v11543_v30, %v11247_v18  ;;  %1737 = vrot.lane.b32.xlu0 %v1726_v29, %s11054_s30  ;;  %v778_v29 = vpack.c.bf16 %v771_v20, %v770_v22 }
 0x94a   :  { %v11550_v34 = vpop.permute.xlu1 %1696 }
 0x94b   :  { %v1725_v35 = vpack.c.bf16 %v1719_v31, %v1718_v33  ;;  %v1717_v37 = vmul.f32 %v11550_v34, %v11255_v21  ;;  %v769_v31 = vmul.f32 %v11255_v21, %v11513_v63  ;;  %v768_v33 = vmul.f32 %v11247_v18, %v11529_v3 }
 0x94c   :  { %v11552_v36 = vpop.permute.xlu0 %1694 }
 0x94d   :  { %v1716_v38 = vmul.f32 %v11552_v36, %v11247_v18  ;;  %1735 = vrot.lane.b32.xlu1 %v1725_v35, %s11054_s30  ;;  %v766_v35 = vmul.f32 %v11369_v8, %v11416_v28 }
 0x94e   :  { %v11559_v39 = vpop.permute.xlu1 %1692 }
 0x94f   :  { %v1724_v40 = vpack.c.bf16 %v1717_v37, %v1716_v38  ;;  %v1715_v43 = vmul.f32 %v11559_v39, %v11255_v21  ;;  %v777_v37 = vpack.c.bf16 %v769_v31, %v768_v33  ;;  %v767_v38 = vmul.f32 %v11371_v9, %v11414_v26 }
 0x950   :  { %v11563_v42 = vpop.permute.xlu0 %1690 }
 0x951   :  { %v1714_v44 = vmul.f32 %v11563_v42, %v11247_v18  ;;  %1733 = vrot.lane.b32.xlu0 %v1724_v40, %s11054_s30  ;;  %v776_v40 = vpack.c.bf16 %v767_v38, %v766_v35 }
 0x952   :  { %v11572_v46 = vpop.eup %10541 }
 0x953   :  { %v11574_v4 = vpop.eup %10543  ;;  %9668 = vmatprep.mubr.msk.f32.mxu1 %vm589_vm8, %v11572_v46  ;;  %v1723_v6 = vpack.c.bf16 %v1715_v43, %v1714_v44 }
 0x954   :  { %9669 = vmatmul.mubr.msk.f32.vlgmr.msra.gmra.mxu1 %vm589_vm8, %v11574_v4 }
 0x955   :  { %9689 = vmatpush3.bf16.msra.mxu1 %v780_v5  ;;  %1831 = vrot.lane.b32.xlu0 %v11349_v61, %s11055_s1 }
 0x956   :  { %1731 = vrot.lane.b32.xlu1 %v1723_v6, %s11054_s30  ;;  %9690 = vmatprep.subr.bf16.mxu1 %v11053_v1 }
 0x957   :  { %9696 = vmatprep.mubr.msk.bf16.mxu1 %vm11056_vm13, %v11053_v1 }
 0x959   :  { %9691 = vmatpush3.bf16.msra.mxu1 %v779_v16  ;;  %1991 = vrot.lane.b32.xlu0 %v11349_v61, %s11057_s24 }
 0x95a   :  { %1833 = vrot.lane.b32.xlu1 %v11315_v56, %s11055_s1  ;;  %9692 = vmatprep.subr.bf16.mxu1 %v11053_v1 }
 0x95d   :  { %9693 = vmatpush3.bf16.msra.mxu1 %v778_v29 }
 0x95e   :  { %1993 = vrot.lane.b32.xlu1 %v11315_v56, %s11057_s24  ;;  %9694 = vmatprep.subr.bf16.mxu1 %v11053_v1 }
 0x961   :  { %9695 = vmatpush3.bf16.msra.mxu1 %v777_v37 }
 0x962   :  { %9717 = vmatprep.subr.mxu1 %v11295_v51 }
 0x964   :  { %9697 = vmatmul.mubr.msk.bf16.vlgmr.msra.gmra.mxu1 %vm589_vm8, %v776_v40 }
 0x965   :  { %9718 = vmatpush3.msra.mxu1 %v11295_v51 }
 0x966   :  { %9719 = vmatprep.subr.mxu1 %v11302_v53 }
 0x967   :  { %9720 = vmatpush3.msra.mxu1 %v11302_v53 }
 0x968   :  { %9721 = vmatprep.subr.mxu1 %v11312_v55 }
 0x969   :  { %9722 = vmatpush3.msra.mxu1 %v11312_v55 }
 0x96a   :  { %9723 = vmatprep.subr.mxu1 %v11321_v57 }
 0x96b   :  { %9724 = vmatpush3.msra.mxu1 %v11321_v57 }
 0x96c   :  { %9725 = vmatprep.subr.mxu1 %v11327_v58 }
 0x96d   :  { %9726 = vmatpush3.msra.mxu1 %v11327_v58 }
 0x96e   :  { %9727 = vmatprep.subr.mxu1 %v11336_v59 }
 0x96f   :  { %9728 = vmatpush3.msra.mxu1 %v11336_v59 }
 0x970   :  { %9729 = vmatprep.subr.mxu1 %v11345_v60 }
 0x971   :  { %9730 = vmatpush3.msra.mxu1 %v11345_v60 }
 0x972   :  { %9731 = vmatprep.subr.mxu1 %v11355_v62 }
 0x973   :  { %9732 = vmatpush3.msra.mxu1 %v11355_v62 }
 0x974   :  { %9753 = vmatprep.subr.bf16.mxu1 %v11053_v1 }
 0x9bb   :  { %v1738_v59 = vpop.permute.xlu0 %1737 }
 0x9bf   :  { %v1736_v62 = vpop.permute.xlu1 %1735 }
 0x9c3   :  { %v1734_v26 = vpop.permute.xlu0 %1733 }
 0x9c7   :  { %v1832_v6 = vpop.permute.xlu0 %1831 }
 0x9c8   :  { %v1732_v28 = vpop.permute.xlu1 %1731 }
 0x9cb   :  { %v1992_v33 = vpop.permute.xlu0 %1991 }
 0x9cc   :  { %v1834_v7 = vpop.permute.xlu1 %1833 }
 0xa14   :  { %v9670_v51 = vpop.f32.mrf.mxu1 }
 0xa16   :  { %v1596_v53 = vpop.f32.mrf.mxu1 }
 0xa17   :  { %10545 = vrcp.f32 %v1596_v53 }
 0xa18   :  { %10547 = vrcp.f32 %v9670_v51  ;;  %v2081_v51 = vld [vmem:[#allocation10 + $0x8] sm:$0xff] }
 0xa24   :  { %v10546_v55 = vpop.eup %10545  ;;  %v11628_v57 = vpop.f32.mrf.mxu1 }
 0xa25   :  { %v10548_v58 = vpop.eup %10547  ;;  %9673 = vmatprep.mubr.msk.f32.mxu0 %vm328_vm4, %v10546_v55 }
 0xa26   :  { %v9698_v8 = vpop.f32.mrf.mxu1  ;;  %9674 = vmatmul.mubr.msk.f32.vlgmr.msra.gmra.mxu0 %vm328_vm4, %v10548_v58  ;;  %v2080_v58 = vld [vmem:[#allocation10] sm:$0xff] }
 0xa27   :  { %9677 = vmatpush3.bf16.msra.mxu0 %v1738_v59  ;;  %9684 = vmatprep.mubr.msk.bf16.mxu0 %vm11056_vm13, %v11053_v1 }
 0xa28   :  { %v11634_v60 = vpop.f32.mrf.mxu1  ;;  %9678 = vmatprep.subr.bf16.mxu0 %v11053_v1 }
 0xa2a   :  { %v9699_v9 = vpop.f32.mrf.mxu1 }
 0xa2b   :  { %9679 = vmatpush3.bf16.msra.mxu0 %v1736_v62 }
 0xa2c   :  { %9680 = vmatprep.subr.bf16.mxu0 %v11053_v1 }
 0xa2f   :  { %9681 = vmatpush3.bf16.msra.mxu0 %v1734_v26 }
 0xa30   :  { %9682 = vmatprep.subr.bf16.mxu0 %v11053_v1 }
 0xa33   :  { %9683 = vmatpush3.bf16.msra.mxu0 %v1732_v28 }
 0xa34   :  { %9700 = vmatprep.subr.msk.mxu0 %vm333_vm3, %v11234_v13 }
 0xae6   :  { %v9675_v41 = vpop.f32.mrf.mxu0 }
 0xae7   :  { %v1689_v44 = vmul.f32 %v11574_v4, %v9675_v41 }
 0xae8   :  { %v1679_v43 = vpop.f32.mrf.mxu0 }
 0xae9   :  { %v1688_v45 = vmul.f32 %v11572_v46, %v1679_v43 }
 0xaeb   :  { %v1722_v5 = vpack.c.bf16 %v1689_v44, %v1688_v45 }
 0xaed   :  { %9685 = vmatmul.mubr.msk.bf16.vlgmr.msra.gmra.mxu0 %vm589_vm8, %v1722_v5 }
 0xaee   :  { %9701 = vmatpush3.msk.msra.mxu0 %vm333_vm3, %v11234_v13  ;;  %9702 = vmatprep.mubr.msk.f32.mxu0 %vm328_vm4, %v1832_v6 }
 0xaf5   :  { %9703 = vmatmul.mubr.msk.f32.vlgmr.msra.gmra.mxu0 %vm328_vm4, %v1834_v7 }
 0xaf6   :  { %9709 = vmatprep.mubr.msk.f32.mxu0 %vm414_vm5, %v11263_v24  ;;  %v1994_v24 = vpop.permute.xlu1 %1993 }
 0xbad   :  { %v11650_v10 = vpop.f32.mrf.mxu0 }
 0xbaf   :  { %v9686_v4 = vpop.f32.mrf.mxu0 }
 0xbb1   :  { %v11652_v16 = vpop.f32.mrf.mxu0 }
 0xbb3   :  { %v9687_v46 = vpop.f32.mrf.mxu0 }
 0xbb5   :  { %v9704_v20 = vpop.f32.mrf.mxu0 }
 0xbb6   :  { %v1915_v22 = vmul.f32 %v9704_v20, %v11267_v25 }
 0xbb7   :  { %v1905_v29 = vpop.f32.mrf.mxu0 }
 0xbb8   :  { %v1914_v31 = vmul.f32 %v1905_v29, %v11269_v27  ;;  %9705 = vmatprep.subr.mxu0 %v1915_v22 }
 0xbb9   :  { %9706 = vmatpush3.msra.mxu0 %v1915_v22 }
 0xbba   :  { %9707 = vmatprep.subr.mxu0 %v1914_v31 }
 0xbbb   :  { %9708 = vmatpush3.msra.mxu0 %v1914_v31 }
 0xbbc   :  { %9710 = vmatmul.mubr.msk.f32.vlgmr.msra.gmra.mxu0 %vm414_vm5, %v11273_v32  ;;  %9712 = vmatprep.subr.msk.mxu0 %vm333_vm3, %v11234_v13 }
 0xbbd   :  { %9713 = vmatpush3.msk.msra.mxu0 %vm333_vm3, %v11234_v13  ;;  %9714 = vmatprep.mubr.msk.f32.mxu0 %vm328_vm4, %v1992_v33 }
 0xbbe   :  { %9736 = vmatprep.subr.msk.mxu0 %vm333_vm3, %v11234_v13 }
 0xbc0   :  { %9715 = vmatmul.mubr.msk.f32.vlgmr.msra.gmra.mxu0 %vm328_vm4, %v1994_v24 }
 0xbc1   :  { %9737 = vmatpush3.msk.msra.mxu0 %vm333_vm3, %v11234_v13 }
 0xbc2   :  { %9741 = vmatprep.subr.bf16.mxu0 %v11053_v1 }
 0xc7c   :  { %v9711_v25 = vpop.f32.mrf.mxu0 }
 0xc7e   :  { %v1982_v27 = vpop.f32.mrf.mxu0 }
 0xc80   :  { %v9716_v32 = vpop.f32.mrf.mxu0 }
 0xc81   :  { %v2071_v35 = vadd.f32 %v9716_v32, %v9711_v25 }
 0xc82   :  { %v2065_v37 = vpop.f32.mrf.mxu0 }
 0xc83   :  { %vm2075_vm14 = vcmp.ge.f32.partialorder %v2071_v35, 0.0  ;;  %v2077_v38 = vmul.f32 0.2, %v2071_v35  ;;  %v2066_v40 = vadd.f32 %v2065_v37, %v1982_v27 }
 0xc85   :  { %vm2074_vm15 = vcmp.ge.f32.partialorder %v2066_v40, 0.0  ;;  %v2076_v53 = vmul.f32 0.2, %v2066_v40  ;;  %v2079_v55 = vsel %vm2075_vm14, %v2071_v35, %v2077_v38 }
 0xc86   :  { %v2083_v59 = vadd.f32 %v2081_v51, %v2079_v55 }
 0xc87   :  { %v2078_v8 = vsel %vm2074_vm15, %v2066_v40, %v2076_v53 }
 0xc88   :  { %v2087_v62 = vsel %vm589_vm8, %v2083_v59, -inf  ;;  %v2082_v13 = vadd.f32 %v2080_v58, %v2078_v8 }
 0xc89   :  { %2088 = vmax.xlane.f32.xlu1 %v2087_v62 }
 0xc8a   :  { %v2084_v9 = vsel %vm589_vm8, %v2082_v13, -inf }
 0xc8b   :  { %2085 = vmax.xlane.f32.xlu0 %v2084_v9 }
 0xc9a   :  { %2276 = vrot.lane.b32.xlu1 %v11478_v47, %s11050_s10 }
 0xc9e   :  { %1236 = vrot.lane.b32.xlu1 %v11478_v47, %s11058_s25 }
 0xca1   :  { %2274 = vrot.lane.b32.xlu0 %v11492_v49, %s11050_s10 }
 0xca2   :  { %2272 = vrot.lane.b32.xlu1 %v11485_v48, %s11050_s10 }
 0xca5   :  { %1234 = vrot.lane.b32.xlu0 %v11492_v49, %s11058_s25 }
 0xca6   :  { %1232 = vrot.lane.b32.xlu1 %v11485_v48, %s11058_s25 }
 0xca9   :  { %2270 = vrot.lane.b32.xlu0 %v11506_v54, %s11050_s10 }
 0xcaa   :  { %2268 = vrot.lane.b32.xlu1 %v11499_v52, %s11050_s10 }
 0xcad   :  { %1230 = vrot.lane.b32.xlu0 %v11506_v54, %s11058_s25 }
 0xcae   :  { %1228 = vrot.lane.b32.xlu1 %v11499_v52, %s11058_s25 }
 0xcb1   :  { %2266 = vrot.lane.b32.xlu0 %v11522_v2, %s11050_s10 }
 0xcb2   :  { %2264 = vrot.lane.b32.xlu1 %v11513_v63, %s11050_s10 }
 0xcb5   :  { %1226 = vrot.lane.b32.xlu0 %v11522_v2, %s11058_s25 }
 0xcb6   :  { %1224 = vrot.lane.b32.xlu1 %v11513_v63, %s11058_s25 }
 0xcb9   :  { %2262 = vrot.lane.b32.xlu0 %v11529_v3, %s11050_s10 }
 0xcbd   :  { %1222 = vrot.lane.b32.xlu0 %v11529_v3, %s11058_s25 }
 0xd12   :  { %v2089_v47 = vpop.xlane.xlu1 %2088 }
 0xd13   :  { %v2091_v48 = vsub.f32 %v2083_v59, %v2089_v47 }
 0xd14   :  { %v2086_v49 = vpop.xlane.xlu0 %2085 }
 0xd15   :  { %v2090_v52 = vsub.f32 %v2082_v13, %v2086_v49  ;;  %v2094_v54 = vmul.f32 1.442695, %v2091_v48 }
 0xd16   :  { %v11703_v26 = vpop.permute.xlu1 %2276 }
 0xd17   :  { %v2092_v28 = vmul.f32 1.442695, %v2090_v52  ;;  %v2301_v2 = vmul.f32 %v11703_v26, %v11315_v56  ;;  %v2300_v43 = vmul.f32 %v11703_v26, %v11255_v21 }
 0xd18   :  { %v11705_v41 = vpop.permute.xlu0 %2274 }
 0xd19   :  { %10549 = vpow2.f32 %v2092_v28  ;;  %v2299_v63 = vmul.f32 %v11705_v41, %v11349_v61  ;;  %v2298_v3 = vmul.f32 %v11705_v41, %v11247_v18 }
 0xd1a   :  { %10551 = vpow2.f32 %v2094_v54  ;;  %v11715_v44 = vpop.permute.xlu1 %1236 }
 0xd1b   :  { %v2310_v45 = vpack.c.bf16 %v2301_v2, %v2299_v63  ;;  %v2309_v5 = vpack.c.bf16 %v2300_v43, %v2298_v3  ;;  %v1253_v7 = vmul.f32 %v11715_v44, %v11255_v21 }
 0xd1c   :  { %v11717_v6 = vpop.permute.xlu0 %1234 }
 0xd1d   :  { %v1252_v4 = vmul.f32 %v11717_v6, %v11247_v18  ;;  %2333 = vrot.lane.b32.xlu1 %v2310_v45, %s11059_s4  ;;  %2331 = vrot.lane.b32.xlu0 %v2309_v5, %s11059_s4 }
 0xd1e   :  { %v11725_v46 = vpop.permute.xlu1 %2272 }
 0xd1f   :  { %v1258_v20 = vpack.c.bf16 %v1253_v7, %v1252_v4  ;;  %v2297_v31 = vmul.f32 %v11725_v46, %v11315_v56  ;;  %v2296_v24 = vmul.f32 %v11725_v46, %v11255_v21 }
 0xd20   :  { %v11727_v22 = vpop.permute.xlu0 %2270 }
 0xd21   :  { %2398 = vrot.lane.b32.xlu0 %v1258_v20, %s11060_s21  ;;  %v2295_v29 = vmul.f32 %v11727_v22, %v11349_v61  ;;  %v2294_v33 = vmul.f32 %v11727_v22, %v11247_v18 }
 0xd22   :  { %v11738_v25 = vpop.permute.xlu1 %1232 }
 0xd23   :  { %v2308_v27 = vpack.c.bf16 %v2297_v31, %v2295_v29  ;;  %v2307_v32 = vpack.c.bf16 %v2296_v24, %v2294_v33  ;;  %v1251_v37 = vmul.f32 %v11738_v25, %v11255_v21 }
 0xd24   :  { %v11740_v35 = vpop.permute.xlu0 %1230 }
 0xd25   :  { %v1250_v38 = vmul.f32 %v11740_v35, %v11247_v18  ;;  %2329 = vrot.lane.b32.xlu0 %v2308_v27, %s11059_s4  ;;  %2327 = vrot.lane.b32.xlu1 %v2307_v32, %s11059_s4 }
 0xd26   :  { %v11748_v40 = vpop.eup %10549  ;;  %v11750_v51 = vpop.permute.xlu1 %2268 }
 0xd27   :  { %v11752_v53 = vpop.eup %10551  ;;  %9733 = vmatprep.mubr.msk.f32.mxu1 %vm589_vm8, %v11748_v40  ;;  %v1257_v55 = vpack.c.bf16 %v1251_v37, %v1250_v38  ;;  %v2293_v59 = vmul.f32 %v11750_v51, %v11315_v56  ;;  %v2292_v13 = vmul.f32 %v11750_v51, %v11255_v21 }
 0xd28   :  { %9734 = vmatmul.mubr.msk.f32.vlgmr.msra.gmra.mxu1 %vm589_vm8, %v11752_v53  ;;  %v11758_v58 = vpop.permute.xlu0 %2266 }
 0xd29   :  { %2396 = vrot.lane.b32.xlu1 %v1257_v55, %s11060_s21  ;;  %v2291_v8 = vmul.f32 %v11758_v58, %v11349_v61  ;;  %v2290_v62 = vmul.f32 %v11758_v58, %v11247_v18  ;;  %9761 = vmatprep.mubr.msk.bf16.mxu1 %vm11056_vm13, %v11053_v1 }
 0xd2a   :  { %v11771_v9 = vpop.permute.xlu1 %1228 }
 0xd2b   :  { %v2306_v47 = vpack.c.bf16 %v2293_v59, %v2291_v8  ;;  %v2305_v48 = vpack.c.bf16 %v2292_v13, %v2290_v62  ;;  %v1249_v52 = vmul.f32 %v11771_v9, %v11255_v21  ;;  %v11808_v62 = vld [vmem:[#allocation11] sm:$0xf] }
 0xd2c   :  { %v11773_v49 = vpop.permute.xlu0 %1226 }
 0xd2d   :  { %v1248_v54 = vmul.f32 %v11773_v49, %v11247_v18  ;;  %2325 = vrot.lane.b32.xlu1 %v2306_v47, %s11059_s4  ;;  %2323 = vrot.lane.b32.xlu0 %v2305_v48, %s11059_s4 }
 0xd2e   :  { %v11781_v28 = vpop.permute.xlu1 %2264 }
 0xd2f   :  { %v1256_v2 = vpack.c.bf16 %v1249_v52, %v1248_v54  ;;  %v2289_v43 = vmul.f32 %v11781_v28, %v11315_v56  ;;  %v2288_v5 = vmul.f32 %v11781_v28, %v11255_v21 }
 0xd30   :  { %v11783_v63 = vpop.permute.xlu0 %2262 }
 0xd31   :  { %2394 = vrot.lane.b32.xlu0 %v1256_v2, %s11060_s21  ;;  %v2287_v3 = vmul.f32 %v11783_v63, %v11349_v61  ;;  %v2286_v45 = vmul.f32 %v11783_v63, %v11247_v18 }
 0xd32   :  { %v11794_v7 = vpop.permute.xlu1 %1224 }
 0xd33   :  { %v2304_v4 = vpack.c.bf16 %v2289_v43, %v2287_v3  ;;  %v2303_v20 = vpack.c.bf16 %v2288_v5, %v2286_v45  ;;  %v1247_v31 = vmul.f32 %v11794_v7, %v11255_v21 }
 0xd34   :  { %v11796_v29 = vpop.permute.xlu0 %1222 }
 0xd35   :  { %v1246_v61 = vmul.f32 %v11796_v29, %v11247_v18  ;;  %2321 = vrot.lane.b32.xlu0 %v2304_v4, %s11059_s4  ;;  %2319 = vrot.lane.b32.xlu1 %v2303_v20, %s11059_s4 }
 0xd37   :  { %v1255_v56 = vpack.c.bf16 %v1247_v31, %v1246_v61 }
 0xd39   :  { %2392 = vrot.lane.b32.xlu1 %v1255_v56, %s11060_s21 }
 0xd8f   :  { %v2332_v33 = vpop.permute.xlu0 %2331  ;;  %v2334_v24 = vpop.permute.xlu1 %2333 }
 0xd90   :  { %v2339_v54 = vsel %vm414_vm5, %v2332_v33, %v2334_v24  ;;  %v10497_v33 = vld [vmem:[%s13167_s12 + $0x30] ss:$8 sps:$4 sm:$0xff]   ;;  %v10499_v24 = vld [vmem:[%s13167_s12 + $0x34] ss:$8 sps:$4 sm:$0xff]  }
 0xd93   :  { %v2399_v27 = vpop.permute.xlu0 %2398 }
 0xd94   :  { %9754 = vmatpush3.bf16.msra.mxu1 %v2399_v27  ;;  %v10502_v27 = vld [vmem:[%s13167_s12 + $0x24] ss:$8 sps:$4 sm:$0xff]  }
 0xd95   :  { %9755 = vmatprep.subr.bf16.mxu1 %v11053_v1 }
 0xd97   :  { %v2328_v32 = vpop.permute.xlu1 %2327  ;;  %v2330_v37 = vpop.permute.xlu0 %2329 }
 0xd98   :  { %v2338_v12 = vsel %vm414_vm5, %v2328_v32, %v2330_v37  ;;  %v10503_v32 = vld [vmem:[%s13167_s12 + $0x10] ss:$8 sps:$4 sm:$0xff]   ;;  %v10508_v37 = vld [vmem:[%s13167_s12 + $0x4] ss:$8 sps:$4 sm:$0xff]  }
 0xd9b   :  { %v2397_v38 = vpop.permute.xlu1 %2396 }
 0xd9c   :  { %9756 = vmatpush3.bf16.msra.mxu1 %v2397_v38  ;;  %v10506_v38 = vld [vmem:[%s13167_s12] ss:$8 sps:$4 sm:$0xff]  }
 0xd9d   :  { %9757 = vmatprep.subr.bf16.mxu1 %v11053_v1 }
 0xd9f   :  { %v2324_v18 = vpop.permute.xlu0 %2323  ;;  %v2326_v21 = vpop.permute.xlu1 %2325 }
 0xda0   :  { %v2337_v15 = vsel %vm414_vm5, %v2324_v18, %v2326_v21 }
 0xda3   :  { %v2395_v55 = vpop.permute.xlu0 %2394 }
 0xda4   :  { %9758 = vmatpush3.bf16.msra.mxu1 %v2395_v55  ;;  %v11860_v55 = vld [vmem:[%s13163_s8 + $0x38] sm:$0xff] }
 0xda5   :  { %9759 = vmatprep.subr.bf16.mxu1 %v11053_v1 }
 0xda7   :  { %v2320_v59 = vpop.permute.xlu1 %2319 }
 0xdab   :  { %v2393_v8 = vpop.permute.xlu1 %2392 }
 0xdac   :  { %9760 = vmatpush3.bf16.msra.mxu1 %v2393_v8 }
 0xdad   :  { %9765 = vmatprep.subr.msk.mxu1 %vm333_vm3, %v11808_v62 }
 0xdaf   :  { %9762 = vmatmul.mubr.msk.bf16.vlgmr.msra.gmra.mxu1 %vm589_vm8, %v1254_v17  ;;  %v2322_v17 = vpop.permute.xlu0 %2321 }
 0xdb0   :  { %9766 = vmatpush3.msk.msra.mxu1 %vm333_vm3, %v11808_v62  ;;  %v2336_v2 = vsel %vm414_vm5, %v2320_v59, %v2322_v17 }
 0xde8   :  { %v9735_v13 = vpop.f32.mrf.mxu1 }
 0xdea   :  { %v2168_v47 = vpop.f32.mrf.mxu1 }
 0xdeb   :  { %10553 = vrcp.f32 %v2168_v47 }
 0xdec   :  { %10555 = vrcp.f32 %v9735_v13 }
 0xdf8   :  { %v10554_v48 = vpop.eup %10553 }
 0xdf9   :  { %v10556_v52 = vpop.eup %10555  ;;  %9738 = vmatprep.mubr.msk.f32.mxu0 %vm328_vm4, %v10554_v48 }
 0xdfa   :  { %9739 = vmatmul.mubr.msk.f32.vlgmr.msra.gmra.mxu0 %vm328_vm4, %v10556_v52 }
 0xdfb   :  { %9742 = vmatpush3.bf16.msra.mxu0 %v2339_v54  ;;  %9749 = vmatprep.mubr.msk.bf16.mxu0 %vm11056_vm13, %v11053_v1 }
 0xdfc   :  { %9743 = vmatprep.subr.bf16.mxu0 %v11053_v1 }
 0xdff   :  { %9744 = vmatpush3.bf16.msra.mxu0 %v2338_v12  ;;  %v1825_v12 = vadd.f32 %v11628_v57, %v11650_v10  ;;  %v11875_v57 = vld [vmem:[%s13163_s8 + $0x30] sm:$0xff]  ;;  %v11889_v10 = vld [vmem:[%s13163_s8 + $0x20] sm:$0xff] }
 0xe00   :  { %9745 = vmatprep.subr.bf16.mxu0 %v11053_v1 }
 0xe03   :  { %9746 = vmatpush3.bf16.msra.mxu0 %v2337_v15  ;;  %v1828_v15 = vadd.f32 %v11634_v60, %v11652_v16  ;;  %v11882_v60 = vld [vmem:[%s13163_s8 + $0x28] sm:$0xff]  ;;  %v11896_v16 = vld [vmem:[%s13163_s8 + $0x18] sm:$0xff] }
 0xe04   :  { %9747 = vmatprep.subr.bf16.mxu0 %v11053_v1 }
 0xe07   :  { %9748 = vmatpush3.bf16.msra.mxu0 %v2336_v2  ;;  %v2448_v2 = vmax.f32 %v1825_v12, 0.0  ;;  %v11948_v12 = vld [vmem:[#allocation14 + $0x8] sm:$0xff] }
 0xe08   :  { %2535 = vmatprep.subr.bf16.mxu0 %v10499_v24 }
 0xe6f   :  { %v2441_v3 = vpop.f32.mrf.mxu1 }
 0xe71   :  { %v9763_v43 = vpop.f32.mrf.mxu1 }
 0xe72   :  { %v2449_v43 = vmax.f32 %v1828_v15, 0.0 }
 0xe73   :  { %v2444_v45 = vpop.f32.mrf.mxu1 }
 0xe75   :  { %v9764_v5 = vpop.f32.mrf.mxu1 }
 0xeba   :  { %v9740_v4 = vpop.f32.mrf.mxu0 }
 0xebb   :  { %v2261_v31 = vmul.f32 %v11752_v53, %v9740_v4  ;;  %v10505_v53 = vld [vmem:[%s13167_s12 + $0x14] ss:$8 sps:$4 sm:$0xff]  }
 0xebc   :  { %v2251_v20 = vpop.f32.mrf.mxu0 }
 0xebd   :  { %v2260_v61 = vmul.f32 %v11748_v40, %v2251_v20  ;;  %v10500_v40 = vld [vmem:[%s13167_s12 + $0x20] ss:$8 sps:$4 sm:$0xff]  }
 0xebf   :  { %v2302_v56 = vpack.c.bf16 %v2261_v31, %v2260_v61  ;;  %v11903_v31 = vld [vmem:[%s13163_s8 + $0x10] sm:$0xff]  ;;  %v11910_v61 = vld [vmem:[%s13163_s8 + $0x8] sm:$0xff] }
 0xec1   :  { %9750 = vmatmul.mubr.msk.bf16.vlgmr.msra.gmra.mxu0 %vm589_vm8, %v2302_v56  ;;  %v11917_v56 = vld [vmem:[%s13163_s8] sm:$0xff] }
 0xec2   :  { %2559 = vmatprep.mubr.bf16.mxu0 %v13177_v0  ;;  %2536 = vmatpush1.bf16.msra.mxu0 %v10497_v33  ;;  %v2472_v33 = vld [vmem:[#allocation19] sm:$0x3]  ;;  %v10671_v0 = vld [vmem:[#allocation8] sm:$0xff] }
 0xec3   :  { %2537 = vmatprep.subr.bf16.mxu0 %v10502_v27  ;;  %v2477_v24 = vrot.slane %v2472_v33, %v11241_v14 }
 0xec6   :  { %2538 = vmatpush1.bf16.msra.mxu0 %v10500_v40 }
 0xec7   :  { %2539 = vmatprep.subr.bf16.mxu0 %v10505_v53 }
 0xeca   :  { %2540 = vmatpush1.bf16.msra.mxu0 %v10503_v32 }
 0xecb   :  { %2541 = vmatprep.subr.bf16.mxu0 %v10508_v37 }
 0xece   :  { %2542 = vmatpush1.bf16.msra.mxu0 %v10506_v38 }
 0xecf   :  { %9782 = vmatprep.subr.mxu0 %v11860_v55 }
 0xf81   :  { %v2381_v18 = vpop.f32.mrf.mxu0 }
 0xf82   :  { %v2442_v59 = vadd.f32 %v2441_v3, %v2381_v18 }
 0xf83   :  { %v9751_v21 = vpop.f32.mrf.mxu0 }
 0xf84   :  { %v2450_v48 = vmax.f32 %v2442_v59, 0.0  ;;  %v11938_v21 = vld [vmem:[#allocation14] sm:$0xff] }
 0xf85   :  { %v2384_v8 = vpop.f32.mrf.mxu0 }
 0xf86   :  { %v2445_v13 = vadd.f32 %v2444_v45, %v2384_v8  ;;  %v11942_v8 = vld [vmem:[#allocation13 + $0x8] sm:$0xff] }
 0xf87   :  { %v9752_v47 = vpop.f32.mrf.mxu0 }
 0xf88   :  { %v2451_v52 = vmax.f32 %v2445_v13, 0.0 }
 0xf8a   :  { %v10454_v54 = vpack.i.bf16 %v2451_v52, %v2450_v48  ;;  %v11945_v48 = vld [vmem:[#allocation13] sm:$0xff] }
 0xf8c   :  { %10455 = vrot.lane.b32.xlu0 %v10454_v54, %s11058_s25 }
 0xffe   :  { %v10456_v17 = vpop.permute.xlu0 %10455 }
 0xfff   :  { %v10458_v5 = vunpack.i.h.bf16 %v10456_v17  ;;  %v10457_v3 = vunpack.i.l.bf16 %v10456_v17 }
0x1001   :  { %v2462_v45 = vsel %vm2460_vm0, %v2449_v43, %v10458_v5  ;;  %v2461_v4 = vsel %vm2460_vm0, %v2448_v2, %v10457_v3 }
0x1002   :  { %v2463_v20 = vpack.c.bf16 %v2462_v45, %v2461_v4 }
0x1004   :  { %8916 = vmatmul.mubr.msk.bf16.vlgmr.msra.gmra.mxu0 %vm589_vm8, %v2463_v20 }
0x1005   :  { %9783 = vmatpush3.msra.mxu0 %v11860_v55 }
0x1006   :  { %9784 = vmatprep.subr.mxu0 %v11875_v57 }
0x1007   :  { %9785 = vmatpush3.msra.mxu0 %v11875_v57 }
0x1008   :  { %9786 = vmatprep.subr.mxu0 %v11882_v60 }
0x1009   :  { %9787 = vmatpush3.msra.mxu0 %v11882_v60 }
0x100a   :  { %9788 = vmatprep.subr.mxu0 %v11889_v10 }
0x100b   :  { %9789 = vmatpush3.msra.mxu0 %v11889_v10 }
0x100c   :  { %9790 = vmatprep.subr.mxu0 %v11896_v16 }
0x100d   :  { %9791 = vmatpush3.msra.mxu0 %v11896_v16 }
0x100e   :  { %9792 = vmatprep.subr.mxu0 %v11903_v31 }
0x100f   :  { %9793 = vmatpush3.msra.mxu0 %v11903_v31 }
0x1010   :  { %9794 = vmatprep.subr.mxu0 %v11910_v61 }
0x1011   :  { %9795 = vmatpush3.msra.mxu0 %v11910_v61 }
0x1012   :  { %9796 = vmatprep.subr.mxu0 %v11917_v56 }
0x1013   :  { %9797 = vmatpush3.msra.mxu0 %v11917_v56 }
0x1014   :  { %9818 = vmatprep.subr.msk.mxu0 %vm333_vm3, %v11808_v62 }
0x10c4   :  { %v2561_v27 = vpop.f32.mrf.mxu0 }
0x10c5   :  { %v11924_v40 = vadd.f32 %v2561_v27, %v2477_v24  ;;  %v10666_v27 = vld [vmem:[#allocation5 + $0x8] sm:$0xff] }
0x10c6   :  { %v2563_v53 = vpop.f32.mrf.mxu0 }
0x10c7   :  { %2572 = vrot.lane.b32.xlu1 %v11924_v40, %s11047_s15 }
0x10c8   :  { %v2565_v32 = vpop.f32.mrf.mxu0 }
0x10c9   :  { %v11928_v37 = vadd.f32 %v2565_v32, %v2477_v24 }
0x10cb   :  { %2574 = vrot.lane.b32.xlu0 %v11928_v37, %s11047_s15  ;;  %2732 = vrot.lane.b32.xlu1 %v11924_v40, %s11046_s13 }
0x10cf   :  { %2734 = vrot.lane.b32.xlu0 %v11928_v37, %s11046_s13 }
0x1139   :  { %v2573_v38 = vpop.permute.xlu1 %2572 }
0x113a   :  { %9767 = vmatprep.mubr.msk.f32.mxu1 %vm328_vm4, %v2573_v38 }
0x113d   :  { %v2575_v18 = vpop.permute.xlu0 %2574  ;;  %v2733_v54 = vpop.permute.xlu1 %2732 }
0x113e   :  { %9768 = vmatmul.mubr.msk.f32.vlgmr.msra.gmra.mxu1 %vm328_vm4, %v2575_v18 }
0x113f   :  { %9774 = vmatprep.mubr.msk.f32.mxu1 %vm414_vm5, %v11938_v21 }
0x1141   :  { %v2735_v15 = vpop.permute.xlu0 %2734 }
0x11fe   :  { %v9769_v59 = vpop.f32.mrf.mxu1 }
0x11ff   :  { %v2656_v13 = vmul.f32 %v11942_v8, %v9769_v59  ;;  %v10667_v59 = vld [vmem:[#allocation5] sm:$0xff] }
0x1200   :  { %v2646_v47 = vpop.f32.mrf.mxu1 }
0x1201   :  { %v2655_v52 = vmul.f32 %v11945_v48, %v2646_v47  ;;  %9770 = vmatprep.subr.mxu1 %v2656_v13 }
0x1202   :  { %9771 = vmatpush3.msra.mxu1 %v2656_v13 }
0x1203   :  { %9772 = vmatprep.subr.mxu1 %v2655_v52 }
0x1204   :  { %9773 = vmatpush3.msra.mxu1 %v2655_v52  ;;  %v2481_v52 = vrot.slane %v2472_v33, %v11290_v50 }
0x1205   :  { %9775 = vmatmul.mubr.msk.f32.vlgmr.msra.gmra.mxu1 %vm414_vm5, %v11948_v12  ;;  %9777 = vmatprep.subr.msk.mxu1 %vm333_vm3, %v11808_v62 }
0x1206   :  { %9778 = vmatpush3.msk.msra.mxu1 %vm333_vm3, %v11808_v62  ;;  %9779 = vmatprep.mubr.msk.f32.mxu1 %vm328_vm4, %v2733_v54  ;;  %v11969_v54 = vadd.f32 %v2563_v53, %v2481_v52 }
0x1207   :  { %9801 = vmatprep.subr.msk.mxu1 %vm333_vm3, %v11808_v62 }
0x1209   :  { %9780 = vmatmul.mubr.msk.f32.vlgmr.msra.gmra.mxu1 %vm328_vm4, %v2735_v15  ;;  %v2567_v15 = vpop.f32.mrf.mxu0 }
0x120a   :  { %9802 = vmatpush3.msk.msra.mxu1 %vm333_vm3, %v11808_v62 }
0x120b   :  { %9806 = vmatprep.subr.msk.mxu1 %vm333_vm3, %v11808_v62 }
0x12c5   :  { %v9776_v17 = vpop.f32.mrf.mxu1 }
0x12c7   :  { %v2723_v2 = vpop.f32.mrf.mxu1 }
0x12c9   :  { %v9781_v43 = vpop.f32.mrf.mxu1 }
0x12ca   :  { %v2812_v5 = vadd.f32 %v9781_v43, %v9776_v17  ;;  %v11975_v17 = vadd.f32 %v2567_v15, %v2481_v52 }
0x12cb   :  { %v2806_v3 = vpop.f32.mrf.mxu1 }
0x12cc   :  { %vm2816_vm1 = vcmp.ge.f32.partialorder %v2812_v5, 0.0  ;;  %v2818_v45 = vmul.f32 0.2, %v2812_v5  ;;  %v2807_v4 = vadd.f32 %v2806_v3, %v2723_v2 }
0x12ce   :  { %vm2815_vm2 = vcmp.ge.f32.partialorder %v2807_v4, 0.0  ;;  %v2817_v20 = vmul.f32 0.2, %v2807_v4  ;;  %v2820_v24 = vsel %vm2816_vm1, %v2812_v5, %v2818_v45 }
0x12cf   :  { %v2822_v32 = vadd.f32 %v10666_v27, %v2820_v24 }
0x12d0   :  { %v2819_v38 = vsel %vm2815_vm2, %v2807_v4, %v2817_v20 }
0x12d1   :  { %v2826_v18 = vsel %vm589_vm8, %v2822_v32, -inf  ;;  %v2821_v13 = vadd.f32 %v10667_v59, %v2819_v38 }
0x12d2   :  { %2827 = vmax.xlane.f32.xlu0 %v2826_v18 }
0x12d3   :  { %v2823_v47 = vsel %vm589_vm8, %v2821_v13, -inf }
0x12d4   :  { %2824 = vmax.xlane.f32.xlu1 %v2823_v47 }
0x12e5   :  { %3016 = vrot.lane.b32.xlu1 %v11928_v37, %s11048_s23 }
0x12e8   :  { %3014 = vrot.lane.b32.xlu0 %v11924_v40, %s11048_s23 }
0x12e9   :  { %3176 = vrot.lane.b32.xlu1 %v11969_v54, %s11049_s26 }
0x12ec   :  { %3178 = vrot.lane.b32.xlu0 %v11975_v17, %s11049_s26 }
0x135b   :  { %v2828_v2 = vpop.xlane.xlu0 %2827 }
0x135c   :  { %v2830_v43 = vsub.f32 %v2822_v32, %v2828_v2 }
0x135d   :  { %v2825_v33 = vpop.xlane.xlu1 %2824 }
0x135e   :  { %v2829_v5 = vsub.f32 %v2821_v13, %v2825_v33  ;;  %v2833_v3 = vmul.f32 1.442695, %v2830_v43 }
0x135f   :  { %v3015_v4 = vpop.permute.xlu0 %3014 }
0x1360   :  { %v2831_v45 = vmul.f32 1.442695, %v2829_v5 }
0x1361   :  { %v3017_v53 = vpop.permute.xlu1 %3016 }
0x1362   :  { %10557 = vpow2.f32 %v2831_v45 }
0x1363   :  { %10559 = vpow2.f32 %v2833_v3  ;;  %v3179_v32 = vpop.permute.xlu0 %3178 }
0x1365   :  { %v3177_v27 = vpop.permute.xlu1 %3176 }
0x136f   :  { %v10558_v20 = vpop.eup %10557 }
0x1370   :  { %v10560_v24 = vpop.eup %10559  ;;  %9798 = vmatprep.mubr.msk.f32.mxu0 %vm589_vm8, %v10558_v20 }
0x1371   :  { %9799 = vmatmul.mubr.msk.f32.vlgmr.msra.gmra.mxu0 %vm589_vm8, %v10560_v24 }
0x1372   :  { %9820 = vmatprep.mubr.msk.f32.mxu0 %vm328_vm4, %v3177_v27  ;;  %9819 = vmatpush3.msk.msra.mxu0 %vm333_vm3, %v11808_v62 }
0x1373   :  { %9842 = vmatprep.subr.msk.mxu0 %vm333_vm3, %v11808_v62 }
0x1375   :  { %9821 = vmatmul.mubr.msk.f32.vlgmr.msra.gmra.mxu0 %vm328_vm4, %v3179_v32 }
0x1376   :  { %9843 = vmatpush3.msk.msra.mxu0 %vm333_vm3, %v11808_v62 }
0x1377   :  { %9847 = vmatprep.subr.msk.mxu0 %vm333_vm3, %v11808_v62 }
0x1431   :  { %v9800_v38 = vpop.f32.mrf.mxu0 }
0x1433   :  { %v2907_v18 = vpop.f32.mrf.mxu0 }
0x1434   :  { %10561 = vrcp.f32 %v2907_v18 }
0x1435   :  { %10563 = vrcp.f32 %v9800_v38 }
0x1441   :  { %v10562_v59 = vpop.eup %10561 }
0x1442   :  { %v10564_v13 = vpop.eup %10563  ;;  %9803 = vmatprep.mubr.msk.f32.mxu1 %vm328_vm4, %v10562_v59 }
0x1443   :  { %9804 = vmatmul.mubr.msk.f32.vlgmr.msra.gmra.mxu1 %vm328_vm4, %v10564_v13  ;;  %v10668_v13 = vld [vmem:[#allocation7 + $0x8] sm:$0xff] }
0x1444   :  { %9807 = vmatpush3.msk.msra.mxu1 %vm333_vm3, %v11808_v62  ;;  %9808 = vmatprep.mubr.msk.f32.mxu1 %vm328_vm4, %v3015_v4 }
0x1447   :  { %9809 = vmatmul.mubr.msk.f32.vlgmr.msra.gmra.mxu1 %vm328_vm4, %v3017_v53  ;;  %v9822_v53 = vpop.f32.mrf.mxu0 }
0x1448   :  { %9815 = vmatprep.mubr.msk.f32.mxu1 %vm414_vm5, %v11938_v21 }
0x1503   :  { %v9805_v47 = vpop.f32.mrf.mxu1 }
0x1504   :  { %v11999_v15 = vmul.f32 %v10560_v24, %v9805_v47  ;;  %v3250_v24 = vpop.f32.mrf.mxu0 }
0x1505   :  { %v2990_v52 = vpop.f32.mrf.mxu1 }
0x1506   :  { %v12001_v2 = vmul.f32 %v10558_v20, %v2990_v52 }
0x1507   :  { %v9810_v43 = vpop.f32.mrf.mxu1 }
0x1508   :  { %v3098_v5 = vmul.f32 %v11942_v8, %v9810_v43 }
0x1509   :  { %v3088_v3 = vpop.f32.mrf.mxu1 }
0x150a   :  { %v3097_v45 = vmul.f32 %v11945_v48, %v3088_v3  ;;  %9811 = vmatprep.subr.mxu1 %v3098_v5 }
0x150b   :  { %9812 = vmatpush3.msra.mxu1 %v3098_v5  ;;  %v10669_v5 = vld [vmem:[#allocation7] sm:$0xff] }
0x150c   :  { %9813 = vmatprep.subr.mxu1 %v3097_v45 }
0x150d   :  { %9814 = vmatpush3.msra.mxu1 %v3097_v45 }
0x150e   :  { %9816 = vmatmul.mubr.msk.f32.vlgmr.msra.gmra.mxu1 %vm414_vm5, %v11948_v12  ;;  %9823 = vmatprep.subr.mxu1 %v11860_v55 }
0x150f   :  { %9824 = vmatpush3.msra.mxu1 %v11860_v55 }
0x1510   :  { %9825 = vmatprep.subr.mxu1 %v11875_v57 }
0x1511   :  { %9826 = vmatpush3.msra.mxu1 %v11875_v57 }
0x1512   :  { %9827 = vmatprep.subr.mxu1 %v11882_v60 }
0x1513   :  { %9828 = vmatpush3.msra.mxu1 %v11882_v60 }
0x1514   :  { %9829 = vmatprep.subr.mxu1 %v11889_v10 }
0x1515   :  { %9830 = vmatpush3.msra.mxu1 %v11889_v10 }
0x1516   :  { %9831 = vmatprep.subr.mxu1 %v11896_v16 }
0x1517   :  { %9832 = vmatpush3.msra.mxu1 %v11896_v16 }
0x1518   :  { %9833 = vmatprep.subr.mxu1 %v11903_v31 }
0x1519   :  { %9834 = vmatpush3.msra.mxu1 %v11903_v31 }
0x151a   :  { %9835 = vmatprep.subr.mxu1 %v11910_v61 }
0x151b   :  { %9836 = vmatpush3.msra.mxu1 %v11910_v61 }
0x151c   :  { %9837 = vmatprep.subr.mxu1 %v11917_v56 }
0x151d   :  { %9838 = vmatpush3.msra.mxu1 %v11917_v56 }
0x151e   :  { %9864 = vmatprep.subr.mxu1 %v11860_v55 }
0x15ce   :  { %v9817_v4 = vpop.f32.mrf.mxu1 }
0x15cf   :  { %v3256_v20 = vadd.f32 %v9822_v53, %v9817_v4 }
0x15d0   :  { %v3165_v27 = vpop.f32.mrf.mxu1 }
0x15d1   :  { %vm3260_vm6 = vcmp.ge.f32.partialorder %v3256_v20, 0.0  ;;  %v3262_v32 = vmul.f32 0.2, %v3256_v20  ;;  %v3251_v38 = vadd.f32 %v3250_v24, %v3165_v27 }
0x15d3   :  { %vm3259_vm7 = vcmp.ge.f32.partialorder %v3251_v38, 0.0  ;;  %v3261_v18 = vmul.f32 0.2, %v3251_v38  ;;  %v3264_v59 = vsel %vm3260_vm6, %v3256_v20, %v3262_v32 }
0x15d4   :  { %v3266_v47 = vadd.f32 %v10668_v13, %v3264_v59 }
0x15d5   :  { %v3263_v52 = vsel %vm3259_vm7, %v3251_v38, %v3261_v18 }
0x15d6   :  { %v3270_v43 = vsel %vm589_vm8, %v3266_v47, -inf  ;;  %v3265_v3 = vadd.f32 %v10669_v5, %v3263_v52 }
0x15d7   :  { %3271 = vmax.xlane.f32.xlu0 %v3270_v43 }
0x15d8   :  { %v3267_v45 = vsel %vm589_vm8, %v3265_v3, -inf }
0x15d9   :  { %3268 = vmax.xlane.f32.xlu1 %v3267_v45 }
0x15ea   :  { %3460 = vrot.lane.b32.xlu1 %v11975_v17, %s11050_s10 }
0x15ed   :  { %3458 = vrot.lane.b32.xlu0 %v11969_v54, %s11050_s10 }
0x15ee   :  { %3618 = vrot.lane.b32.xlu1 %v11924_v40, %s11051_s22 }
0x15f1   :  { %3620 = vrot.lane.b32.xlu0 %v11928_v37, %s11051_s22 }
0x1660   :  { %v3272_v53 = vpop.xlane.xlu0 %3271 }
0x1661   :  { %v3274_v4 = vsub.f32 %v3266_v47, %v3272_v53 }
0x1662   :  { %v3269_v20 = vpop.xlane.xlu1 %3268 }
0x1663   :  { %v3273_v24 = vsub.f32 %v3265_v3, %v3269_v20  ;;  %v3277_v27 = vmul.f32 1.442695, %v3274_v4 }
0x1664   :  { %v3459_v43 = vpop.permute.xlu0 %3458 }
0x1665   :  { %v3275_v32 = vmul.f32 1.442695, %v3273_v24 }
0x1666   :  { %v3461_v5 = vpop.permute.xlu1 %3460 }
0x1667   :  { %10565 = vpow2.f32 %v3275_v32 }
0x1668   :  { %10567 = vpow2.f32 %v3277_v27 }
0x1674   :  { %v10566_v38 = vpop.eup %10565 }
0x1675   :  { %v10568_v18 = vpop.eup %10567  ;;  %9839 = vmatprep.mubr.msk.f32.mxu1 %vm589_vm8, %v10566_v38 }
0x1676   :  { %9840 = vmatmul.mubr.msk.f32.vlgmr.msra.gmra.mxu1 %vm589_vm8, %v10568_v18 }
0x1677   :  { %9865 = vmatpush3.msra.mxu1 %v11860_v55 }
0x1678   :  { %9866 = vmatprep.subr.mxu1 %v11875_v57 }
0x1679   :  { %9867 = vmatpush3.msra.mxu1 %v11875_v57 }
0x167a   :  { %9868 = vmatprep.subr.mxu1 %v11882_v60 }
0x167b   :  { %9869 = vmatpush3.msra.mxu1 %v11882_v60 }
0x167c   :  { %9870 = vmatprep.subr.mxu1 %v11889_v10 }
0x167d   :  { %9871 = vmatpush3.msra.mxu1 %v11889_v10 }
0x167e   :  { %9872 = vmatprep.subr.mxu1 %v11896_v16 }
0x167f   :  { %9873 = vmatpush3.msra.mxu1 %v11896_v16 }
0x1680   :  { %9874 = vmatprep.subr.mxu1 %v11903_v31 }
0x1681   :  { %9875 = vmatpush3.msra.mxu1 %v11903_v31 }
0x1682   :  { %9876 = vmatprep.subr.mxu1 %v11910_v61 }
0x1683   :  { %9877 = vmatpush3.msra.mxu1 %v11910_v61 }
0x1684   :  { %9878 = vmatprep.subr.mxu1 %v11917_v56 }
0x1685   :  { %9879 = vmatpush3.msra.mxu1 %v11917_v56 }
0x1686   :  { %9900 = vmatprep.subr.bf16.mxu1 %v11053_v1 }
0x1736   :  { %v9841_v59 = vpop.f32.mrf.mxu1 }
0x1738   :  { %v3351_v13 = vpop.f32.mrf.mxu1 }
0x1739   :  { %10569 = vrcp.f32 %v3351_v13  ;;  %v3619_v13 = vpop.permute.xlu1 %3618 }
0x173a   :  { %10571 = vrcp.f32 %v9841_v59 }
0x1746   :  { %v10570_v47 = vpop.eup %10569 }
0x1747   :  { %v10572_v52 = vpop.eup %10571  ;;  %9844 = vmatprep.mubr.msk.f32.mxu0 %vm328_vm4, %v10570_v47 }
0x1748   :  { %9845 = vmatmul.mubr.msk.f32.vlgmr.msra.gmra.mxu0 %vm328_vm4, %v10572_v52 }
0x1749   :  { %9848 = vmatpush3.msk.msra.mxu0 %vm333_vm3, %v11808_v62  ;;  %9849 = vmatprep.mubr.msk.f32.mxu0 %vm328_vm4, %v3459_v43 }
0x174c   :  { %9850 = vmatmul.mubr.msk.f32.vlgmr.msra.gmra.mxu0 %vm328_vm4, %v3461_v5 }
0x174d   :  { %9856 = vmatprep.mubr.msk.f32.mxu0 %vm414_vm5, %v11938_v21 }
0x1808   :  { %v9846_v3 = vpop.f32.mrf.mxu0 }
0x1809   :  { %v12062_v53 = vmul.f32 %v10568_v18, %v9846_v3 }
0x180a   :  { %v3434_v45 = vpop.f32.mrf.mxu0 }
0x180b   :  { %v12064_v4 = vmul.f32 %v10566_v38, %v3434_v45  ;;  %v3621_v38 = vpop.permute.xlu0 %3620 }
0x180c   :  { %v9851_v20 = vpop.f32.mrf.mxu0 }
0x180d   :  { %v3542_v27 = vmul.f32 %v11942_v8, %v9851_v20 }
0x180e   :  { %v3532_v32 = vpop.f32.mrf.mxu0 }
0x180f   :  { %v3541_v59 = vmul.f32 %v11945_v48, %v3532_v32  ;;  %9852 = vmatprep.subr.mxu0 %v3542_v27  ;;  %v10670_v32 = vld [vmem:[#allocation8 + $0x8] sm:$0xff] }
0x1810   :  { %9853 = vmatpush3.msra.mxu0 %v3542_v27 }
0x1811   :  { %9854 = vmatprep.subr.mxu0 %v3541_v59 }
0x1812   :  { %9855 = vmatpush3.msra.mxu0 %v3541_v59 }
0x1813   :  { %9857 = vmatmul.mubr.msk.f32.vlgmr.msra.gmra.mxu0 %vm414_vm5, %v11948_v12  ;;  %9859 = vmatprep.subr.msk.mxu0 %vm333_vm3, %v11808_v62 }
0x1814   :  { %9860 = vmatpush3.msk.msra.mxu0 %vm333_vm3, %v11808_v62  ;;  %9861 = vmatprep.mubr.msk.f32.mxu0 %vm328_vm4, %v3619_v13 }
0x1815   :  { %9883 = vmatprep.subr.msk.mxu0 %vm333_vm3, %v11808_v62 }
0x1817   :  { %9862 = vmatmul.mubr.msk.f32.vlgmr.msra.gmra.mxu0 %vm328_vm4, %v3621_v38 }
0x1818   :  { %9884 = vmatpush3.msk.msra.mxu0 %vm333_vm3, %v11808_v62 }
0x1819   :  { %9888 = vmatprep.subr.bf16.mxu0 %v11053_v1 }
0x18d3   :  { %v9858_v18 = vpop.f32.mrf.mxu0 }
0x18d5   :  { %v3609_v47 = vpop.f32.mrf.mxu0 }
0x18d7   :  { %v9863_v52 = vpop.f32.mrf.mxu0 }
0x18d8   :  { %v3698_v43 = vadd.f32 %v9863_v52, %v9858_v18  ;;  %v3892_v18 = vmul.f32 %v11928_v37, %v11541_v23  ;;  %v3894_v52 = vmul.f32 %v11928_v37, %v11533_v11 }
0x18d9   :  { %v3692_v5 = vpop.f32.mrf.mxu0 }
0x18da   :  { %vm3702_vm9 = vcmp.ge.f32.partialorder %v3698_v43, 0.0  ;;  %v3704_v3 = vmul.f32 0.2, %v3698_v43  ;;  %v3693_v45 = vadd.f32 %v3692_v5, %v3609_v47  ;;  %v3891_v47 = vmul.f32 %v11924_v40, %v11543_v30 }
0x18db   :  { %v3890_v5 = vmul.f32 %v11928_v37, %v11550_v34 }
0x18dc   :  { %vm3701_vm10 = vcmp.ge.f32.partialorder %v3693_v45, 0.0  ;;  %v3703_v20 = vmul.f32 0.2, %v3693_v45  ;;  %v3706_v27 = vsel %vm3702_vm9, %v3698_v43, %v3704_v3  ;;  %v3898_v43 = vpack.c.bf16 %v3892_v18, %v3891_v47 }
0x18dd   :  { %v3708_v59 = vadd.f32 %v10670_v32, %v3706_v27  ;;  %v3887_v27 = vmul.f32 %v11924_v40, %v11563_v42 }
0x18de   :  { %v3705_v13 = vsel %vm3701_vm10, %v3693_v45, %v3703_v20  ;;  %v3888_v45 = vmul.f32 %v11928_v37, %v11559_v39 }
0x18df   :  { %v3712_v38 = vsel %vm589_vm8, %v3708_v59, -inf  ;;  %v3707_v24 = vadd.f32 %v10671_v0, %v3705_v13  ;;  %v3893_v0 = vmul.f32 %v11924_v40, %v11535_v19 }
0x18e0   :  { %3713 = vmax.xlane.f32.xlu0 %v3712_v38  ;;  %v3896_v32 = vpack.c.bf16 %v3888_v45, %v3887_v27 }
0x18e1   :  { %v3709_v33 = vsel %vm589_vm8, %v3707_v24, -inf  ;;  %v3899_v3 = vpack.c.bf16 %v3894_v52, %v3893_v0 }
0x18e2   :  { %3710 = vmax.xlane.f32.xlu1 %v3709_v33  ;;  %v3889_v33 = vmul.f32 %v11924_v40, %v11552_v36 }
0x18e4   :  { %v3897_v20 = vpack.c.bf16 %v3890_v5, %v3889_v33  ;;  %v10672_v5 = vld [vmem:[%s13164_s9 + $0x38] sm:$0xff]  ;;  %v10673_v33 = vld [vmem:[%s13164_s9 + $0x30] sm:$0xff] }
0x18e5   :  { %v3008_v0 = vmul.f32 %v10672_v5, %v11928_v37 }
0x18f3   :  { %3908 = vrot.lane.b32.xlu1 %v3898_v43, %s11054_s30 }
0x18f6   :  { %3910 = vrot.lane.b32.xlu0 %v3899_v3, %s11054_s30  ;;  %v3007_v3 = vmul.f32 %v10673_v33, %v11924_v40 }
0x18f7   :  { %3906 = vrot.lane.b32.xlu1 %v3897_v20, %s11054_s30  ;;  %v10674_v20 = vld [vmem:[%s13164_s9 + $0x28] sm:$0xff] }
0x18f8   :  { %v3006_v27 = vmul.f32 %v10674_v20, %v11928_v37 }
0x18fa   :  { %3904 = vrot.lane.b32.xlu0 %v3896_v32, %s11054_s30  ;;  %v10675_v32 = vld [vmem:[%s13164_s9 + $0x20] sm:$0xff] }
0x18fb   :  { %4004 = vrot.lane.b32.xlu1 %v11969_v54, %s11055_s1 }
0x18fe   :  { %4006 = vrot.lane.b32.xlu0 %v11975_v17, %s11055_s1 }
0x18ff   :  { %4164 = vrot.lane.b32.xlu1 %v11969_v54, %s11057_s24 }
0x1902   :  { %4166 = vrot.lane.b32.xlu0 %v11975_v17, %s11057_s24 }
0x1969   :  { %v3714_v13 = vpop.xlane.xlu0 %3713 }
0x196a   :  { %v3716_v38 = vsub.f32 %v3708_v59, %v3714_v13  ;;  %v3005_v13 = vmul.f32 %v10675_v32, %v11924_v40 }
0x196b   :  { %v3711_v18 = vpop.xlane.xlu1 %3710 }
0x196c   :  { %v3715_v47 = vsub.f32 %v3707_v24, %v3711_v18  ;;  %v3719_v52 = vmul.f32 1.442695, %v3716_v38  ;;  %v3013_v24 = vpack.c.bf16 %v3008_v0, %v3007_v3  ;;  %v3012_v38 = vpack.c.bf16 %v3006_v27, %v3005_v13  ;;  %v10676_v18 = vld [vmem:[%s13164_s9 + $0x18] sm:$0xff]  ;;  %v10678_v0 = vld [vmem:[%s13164_s9 + $0x8] sm:$0xff]  ;;  %v10679_v3 = vld [vmem:[%s13164_s9] sm:$0xff] }
0x196d   :  { %v3002_v33 = vmul.f32 %v10678_v0, %v11928_v37  ;;  %v13186_v27 = vpack.c.bf16 %v11999_v15, %v12001_v2 }
0x196e   :  { %v3717_v43 = vmul.f32 1.442695, %v3715_v47  ;;  %v3004_v47 = vmul.f32 %v10676_v18, %v11928_v37 }
0x1970   :  { %10573 = vpow2.f32 %v3717_v43 }
0x1971   :  { %10575 = vpow2.f32 %v3719_v52  ;;  %v10677_v52 = vld [vmem:[%s13164_s9 + $0x10] sm:$0xff] }
0x1972   :  { %v3003_v43 = vmul.f32 %v10677_v52, %v11924_v40 }
0x1974   :  { %v3011_v5 = vpack.c.bf16 %v3004_v47, %v3003_v43 }
0x197d   :  { %v12121_v45 = vpop.eup %10573 }
0x197e   :  { %v12123_v59 = vpop.eup %10575  ;;  %9880 = vmatprep.mubr.msk.f32.mxu1 %vm589_vm8, %v12121_v45 }
0x197f   :  { %9881 = vmatmul.mubr.msk.f32.vlgmr.msra.gmra.mxu1 %vm589_vm8, %v12123_v59 }
0x1980   :  { %9901 = vmatpush3.bf16.msra.mxu1 %v3013_v24  ;;  %9908 = vmatprep.mubr.msk.bf16.mxu1 %vm11056_vm13, %v11053_v1  ;;  %v3001_v24 = vmul.f32 %v10679_v3, %v11924_v40 }
0x1981   :  { %9902 = vmatprep.subr.bf16.mxu1 %v11053_v1 }
0x1982   :  { %v3010_v20 = vpack.c.bf16 %v3002_v33, %v3001_v24 }
0x1984   :  { %9903 = vmatpush3.bf16.msra.mxu1 %v3012_v38 }
0x1985   :  { %9904 = vmatprep.subr.bf16.mxu1 %v11053_v1 }
0x1988   :  { %9905 = vmatpush3.bf16.msra.mxu1 %v3011_v5 }
0x1989   :  { %9906 = vmatprep.subr.bf16.mxu1 %v11053_v1 }
0x198c   :  { %9907 = vmatpush3.bf16.msra.mxu1 %v3010_v20 }
0x198d   :  { %9929 = vmatprep.subr.mxu1 %v11860_v55 }
0x198f   :  { %9909 = vmatmul.mubr.msk.bf16.vlgmr.msra.gmra.mxu1 %vm589_vm8, %v13186_v27 }
0x1990   :  { %9930 = vmatpush3.msra.mxu1 %v11860_v55 }
0x1991   :  { %9931 = vmatprep.subr.mxu1 %v11875_v57 }
0x1992   :  { %9932 = vmatpush3.msra.mxu1 %v11875_v57 }
0x1993   :  { %9933 = vmatprep.subr.mxu1 %v11882_v60 }
0x1994   :  { %9934 = vmatpush3.msra.mxu1 %v11882_v60 }
0x1995   :  { %9935 = vmatprep.subr.mxu1 %v11889_v10 }
0x1996   :  { %9936 = vmatpush3.msra.mxu1 %v11889_v10 }
0x1997   :  { %9937 = vmatprep.subr.mxu1 %v11896_v16 }
0x1998   :  { %9938 = vmatpush3.msra.mxu1 %v11896_v16 }
0x1999   :  { %9939 = vmatprep.subr.mxu1 %v11903_v31 }
0x199a   :  { %9940 = vmatpush3.msra.mxu1 %v11903_v31  ;;  %v3911_v31 = vpop.permute.xlu0 %3910 }
0x199b   :  { %9941 = vmatprep.subr.mxu1 %v11910_v61 }
0x199c   :  { %9942 = vmatpush3.msra.mxu1 %v11910_v61  ;;  %v3909_v61 = vpop.permute.xlu1 %3908 }
0x199d   :  { %9943 = vmatprep.subr.mxu1 %v11917_v56 }
0x199e   :  { %9944 = vmatpush3.msra.mxu1 %v11917_v56  ;;  %v3905_v13 = vpop.permute.xlu0 %3904 }
0x199f   :  { %9965 = vmatprep.subr.bf16.mxu1 %v11053_v1 }
0x19a0   :  { %v3907_v32 = vpop.permute.xlu1 %3906 }
0x19a2   :  { %v4007_v0 = vpop.permute.xlu0 %4006 }
0x19a4   :  { %v4005_v5 = vpop.permute.xlu1 %4004 }
0x1a3f   :  { %v9882_v55 = vpop.f32.mrf.mxu1 }
0x1a41   :  { %v3793_v57 = vpop.f32.mrf.mxu1 }
0x1a42   :  { %10577 = vrcp.f32 %v3793_v57  ;;  %v4165_v57 = vpop.permute.xlu1 %4164 }
0x1a43   :  { %10579 = vrcp.f32 %v9882_v55 }
0x1a4f   :  { %v10578_v60 = vpop.eup %10577  ;;  %v12179_v10 = vpop.f32.mrf.mxu1 }
0x1a50   :  { %v10580_v16 = vpop.eup %10579  ;;  %9885 = vmatprep.mubr.msk.f32.mxu0 %vm328_vm4, %v10578_v60 }
0x1a51   :  { %v9910_v15 = vpop.f32.mrf.mxu1  ;;  %9886 = vmatmul.mubr.msk.f32.vlgmr.msra.gmra.mxu0 %vm328_vm4, %v10580_v16 }
0x1a52   :  { %9889 = vmatpush3.bf16.msra.mxu0 %v3911_v31  ;;  %9896 = vmatprep.mubr.msk.bf16.mxu0 %vm11056_vm13, %v11053_v1 }
0x1a53   :  { %v12185_v56 = vpop.f32.mrf.mxu1  ;;  %9890 = vmatprep.subr.bf16.mxu0 %v11053_v1 }
0x1a55   :  { %v9911_v2 = vpop.f32.mrf.mxu1 }
0x1a56   :  { %9891 = vmatpush3.bf16.msra.mxu0 %v3909_v61 }
0x1a57   :  { %9892 = vmatprep.subr.bf16.mxu0 %v11053_v1 }
0x1a5a   :  { %9893 = vmatpush3.bf16.msra.mxu0 %v3907_v32  ;;  %v10680_v32 = vld [vmem:[#allocation10 + $0x8] sm:$0xff] }
0x1a5b   :  { %9894 = vmatprep.subr.bf16.mxu0 %v11053_v1 }
0x1a5e   :  { %9895 = vmatpush3.bf16.msra.mxu0 %v3905_v13 }
0x1a5f   :  { %9912 = vmatprep.subr.msk.mxu0 %vm333_vm3, %v11808_v62 }
0x1b11   :  { %v9887_v38 = vpop.f32.mrf.mxu0 }
0x1b12   :  { %v3886_v47 = vmul.f32 %v12123_v59, %v9887_v38 }
0x1b13   :  { %v3876_v18 = vpop.f32.mrf.mxu0 }
0x1b14   :  { %v3885_v52 = vmul.f32 %v12121_v45, %v3876_v18 }
0x1b16   :  { %v3895_v43 = vpack.c.bf16 %v3886_v47, %v3885_v52  ;;  %v10681_v47 = vld [vmem:[#allocation10] sm:$0xff] }
0x1b18   :  { %9897 = vmatmul.mubr.msk.bf16.vlgmr.msra.gmra.mxu0 %vm589_vm8, %v3895_v43  ;;  %v4448_v43 = vmul.f32 %v11975_v17, %v11703_v26 }
0x1b19   :  { %9913 = vmatpush3.msk.msra.mxu0 %vm333_vm3, %v11808_v62  ;;  %9914 = vmatprep.mubr.msk.f32.mxu0 %vm328_vm4, %v4005_v5  ;;  %v4446_v5 = vmul.f32 %v11969_v54, %v11705_v41 }
0x1b20   :  { %9915 = vmatmul.mubr.msk.f32.vlgmr.msra.gmra.mxu0 %vm328_vm4, %v4007_v0  ;;  %v4447_v0 = vmul.f32 %v11928_v37, %v11703_v26 }
0x1b21   :  { %9921 = vmatprep.mubr.msk.f32.mxu0 %vm414_vm5, %v11938_v21  ;;  %v4167_v21 = vpop.permute.xlu0 %4166 }
0x1bd8   :  { %v12201_v33 = vpop.f32.mrf.mxu0 }
0x1bda   :  { %v9898_v59 = vpop.f32.mrf.mxu0 }
0x1bdb   :  { %v4457_v59 = vpack.c.bf16 %v4448_v43, %v4446_v5  ;;  %v4435_v5 = vmul.f32 %v11928_v37, %v11781_v28 }
0x1bdc   :  { %v12203_v3 = vpop.f32.mrf.mxu0 }
0x1bde   :  { %v9899_v45 = vpop.f32.mrf.mxu0 }
0x1bdf   :  { %v3452_v45 = vmul.f32 %v11928_v37, %v11715_v44 }
0x1be0   :  { %v9916_v24 = vpop.f32.mrf.mxu0 }
0x1be1   :  { %v4088_v20 = vmul.f32 %v11942_v8, %v9916_v24  ;;  %v4445_v24 = vmul.f32 %v11924_v40, %v11705_v41 }
0x1be2   :  { %v4078_v27 = vpop.f32.mrf.mxu0 }
0x1be3   :  { %v4087_v55 = vmul.f32 %v11945_v48, %v4078_v27  ;;  %9917 = vmatprep.subr.mxu0 %v4088_v20  ;;  %v4456_v27 = vpack.c.bf16 %v4447_v0, %v4445_v24  ;;  %v4434_v24 = vmul.f32 %v11969_v54, %v11783_v63 }
0x1be4   :  { %9918 = vmatpush3.msra.mxu0 %v4088_v20  ;;  %v3451_v20 = vmul.f32 %v11924_v40, %v11717_v6 }
0x1be5   :  { %9919 = vmatprep.subr.mxu0 %v4087_v55 }
0x1be6   :  { %9920 = vmatpush3.msra.mxu0 %v4087_v55  ;;  %v4443_v55 = vmul.f32 %v11928_v37, %v11725_v46 }
0x1be7   :  { %9922 = vmatmul.mubr.msk.f32.vlgmr.msra.gmra.mxu0 %vm414_vm5, %v11948_v12  ;;  %9924 = vmatprep.subr.msk.mxu0 %vm333_vm3, %v11808_v62 }
0x1be8   :  { %9925 = vmatpush3.msk.msra.mxu0 %vm333_vm3, %v11808_v62  ;;  %9926 = vmatprep.mubr.msk.f32.mxu0 %vm328_vm4, %v4165_v57  ;;  %v3457_v57 = vpack.c.bf16 %v3452_v45, %v3451_v20  ;;  %v4433_v45 = vmul.f32 %v11924_v40, %v11783_v63 }
0x1be9   :  { %9948 = vmatprep.subr.msk.mxu0 %vm333_vm3, %v11808_v62 }
0x1bea   :  { %v4450_v20 = vpack.c.bf16 %v4435_v5, %v4433_v45 }
0x1beb   :  { %9927 = vmatmul.mubr.msk.f32.vlgmr.msra.gmra.mxu0 %vm328_vm4, %v4167_v21  ;;  %v4444_v21 = vmul.f32 %v11975_v17, %v11725_v46 }
0x1bec   :  { %9949 = vmatpush3.msk.msra.mxu0 %vm333_vm3, %v11808_v62 }
0x1bed   :  { %9953 = vmatprep.subr.bf16.mxu0 %v11053_v1 }
0x1ca7   :  { %v9923_v8 = vpop.f32.mrf.mxu0 }
0x1ca9   :  { %v4155_v48 = vpop.f32.mrf.mxu0 }
0x1cab   :  { %v9928_v12 = vpop.f32.mrf.mxu0 }
0x1cac   :  { %v4244_v60 = vadd.f32 %v9928_v12, %v9923_v8  ;;  %v4441_v8 = vmul.f32 %v11924_v40, %v11727_v22 }
0x1cad   :  { %v4238_v16 = vpop.f32.mrf.mxu0 }
0x1cae   :  { %vm4248_vm11 = vcmp.ge.f32.partialorder %v4244_v60, 0.0  ;;  %v4250_v31 = vmul.f32 0.2, %v4244_v60  ;;  %v4239_v15 = vadd.f32 %v4238_v16, %v4155_v48  ;;  %v4442_v48 = vmul.f32 %v11969_v54, %v11727_v22 }
0x1caf   :  { %v4454_v12 = vpack.c.bf16 %v4443_v55, %v4441_v8 }
0x1cb0   :  { %vm4247_vm12 = vcmp.ge.f32.partialorder %v4239_v15, 0.0  ;;  %v4249_v61 = vmul.f32 0.2, %v4239_v15  ;;  %v4252_v2 = vsel %vm4248_vm11, %v4244_v60, %v4250_v31  ;;  %v3450_v60 = vmul.f32 %v11928_v37, %v11738_v25 }
0x1cb1   :  { %v4254_v13 = vadd.f32 %v10680_v32, %v4252_v2  ;;  %v4455_v16 = vpack.c.bf16 %v4444_v21, %v4442_v48  ;;  %v4439_v31 = vmul.f32 %v11928_v37, %v11750_v51  ;;  %v4440_v32 = vmul.f32 %v11975_v17, %v11750_v51 }
0x1cb2   :  { %v4251_v38 = vsel %vm4247_vm12, %v4239_v15, %v4249_v61  ;;  %v3449_v15 = vmul.f32 %v11924_v40, %v11740_v35  ;;  %v4437_v61 = vmul.f32 %v11924_v40, %v11758_v58 }
0x1cb3   :  { %v4258_v18 = vsel %vm589_vm8, %v4254_v13, -inf  ;;  %v4253_v62 = vadd.f32 %v10681_v47, %v4251_v38  ;;  %v4438_v47 = vmul.f32 %v11969_v54, %v11758_v58 }
0x1cb4   :  { %4259 = vmax.xlane.f32.xlu0 %v4258_v18  ;;  %v3456_v2 = vpack.c.bf16 %v3450_v60, %v3449_v15  ;;  %v4452_v38 = vpack.c.bf16 %v4439_v31, %v4437_v61  ;;  %v3448_v18 = vmul.f32 %v11928_v37, %v11771_v9 }
0x1cb5   :  { %v4255_v52 = vsel %vm589_vm8, %v4253_v62, -inf  ;;  %v4453_v43 = vpack.c.bf16 %v4440_v32, %v4438_v47 }
0x1cb6   :  { %4256 = vmax.xlane.f32.xlu1 %v4255_v52  ;;  %v3447_v52 = vmul.f32 %v11924_v40, %v11773_v49 }
0x1cb8   :  { %v3455_v0 = vpack.c.bf16 %v3448_v18, %v3447_v52 }
0x1cc7   :  { %4480 = vrot.lane.b32.xlu1 %v4457_v59, %s11059_s4  ;;  %v4436_v59 = vmul.f32 %v11975_v17, %v11781_v28  ;;  %v3445_v17 = vmul.f32 %v11924_v40, %v11796_v29 }
0x1cc9   :  { %v4451_v55 = vpack.c.bf16 %v4436_v59, %v4434_v24  ;;  %v13187_v59 = vpack.c.bf16 %v12062_v53, %v12064_v4 }
0x1cca   :  { %4478 = vrot.lane.b32.xlu0 %v4456_v27, %s11059_s4  ;;  %v3446_v27 = vmul.f32 %v11928_v37, %v11794_v7 }
0x1ccb   :  { %4544 = vrot.lane.b32.xlu1 %v3457_v57, %s11060_s21 }
0x1ccc   :  { %v3454_v57 = vpack.c.bf16 %v3446_v27, %v3445_v17 }
0x1cce   :  { %4474 = vrot.lane.b32.xlu0 %v4454_v12, %s11059_s4 }
0x1ccf   :  { %4476 = vrot.lane.b32.xlu1 %v4455_v16, %s11059_s4 }
0x1cd2   :  { %4542 = vrot.lane.b32.xlu0 %v3456_v2, %s11060_s21 }
0x1cd3   :  { %4470 = vrot.lane.b32.xlu1 %v4452_v38, %s11059_s4 }
0x1cd6   :  { %4472 = vrot.lane.b32.xlu0 %v4453_v43, %s11059_s4 }
0x1cd7   :  { %4540 = vrot.lane.b32.xlu1 %v3455_v0, %s11060_s21  ;;  %v12292_v0 = vld [vmem:[#allocation11] sm:$0xf] }
0x1cda   :  { %4466 = vrot.lane.b32.xlu0 %v4450_v20, %s11059_s4 }
0x1cdb   :  { %4468 = vrot.lane.b32.xlu1 %v4451_v55, %s11059_s4 }
0x1cde   :  { %4538 = vrot.lane.b32.xlu0 %v3454_v57, %s11060_s21 }
0x1d3d   :  { %v4260_v21 = vpop.xlane.xlu0 %4259 }
0x1d3e   :  { %v4262_v8 = vsub.f32 %v4254_v13, %v4260_v21 }
0x1d3f   :  { %v4257_v48 = vpop.xlane.xlu1 %4256 }
0x1d40   :  { %v4261_v12 = vsub.f32 %v4253_v62, %v4257_v48  ;;  %v4265_v54 = vmul.f32 1.442695, %v4262_v8 }
0x1d41   :  { %v4479_v60 = vpop.permute.xlu0 %4478 }
0x1d42   :  { %v4263_v16 = vmul.f32 1.442695, %v4261_v12 }
0x1d43   :  { %v4481_v31 = vpop.permute.xlu1 %4480 }
0x1d44   :  { %10581 = vpow2.f32 %v4263_v16  ;;  %v4485_v37 = vsel %vm414_vm5, %v4479_v60, %v4481_v31  ;;  %v13188_v16 = vmov 0   ;;  %v10509_v31 = vld [vmem:[%s13169_s14 + $0x30] ss:$8 sps:$4 sm:$0xff]  }
0x1d45   :  { %10583 = vpow2.f32 %v4265_v54  ;;  %v4475_v15 = vpop.permute.xlu0 %4474 }
0x1d47   :  { %v4545_v61 = vpop.permute.xlu1 %4544 }
0x1d49   :  { %v4543_v40 = vpop.permute.xlu0 %4542 }
0x1d4b   :  { %v4477_v2 = vpop.permute.xlu1 %4476 }
0x1d4c   :  { %v4484_v32 = vsel %vm414_vm5, %v4475_v15, %v4477_v2  ;;  %v10514_v15 = vld [vmem:[%s13169_s14 + $0x24] ss:$8 sps:$4 sm:$0xff]   ;;  %v10515_v2 = vld [vmem:[%s13169_s14 + $0x10] ss:$8 sps:$4 sm:$0xff]  }
0x1d4d   :  { %v4473_v38 = vpop.permute.xlu0 %4472 }
0x1d4f   :  { %v4471_v18 = vpop.permute.xlu1 %4470 }
0x1d50   :  { %v4483_v13 = vsel %vm414_vm5, %v4471_v18, %v4473_v38  ;;  %v10518_v38 = vld [vmem:[%s13169_s14] ss:$8 sps:$4 sm:$0xff]   ;;  %v10520_v18 = vld [vmem:[%s13169_s14 + $0x4] ss:$8 sps:$4 sm:$0xff]  }
0x1d51   :  { %v10582_v47 = vpop.eup %10581  ;;  %v4467_v52 = vpop.permute.xlu0 %4466 }
0x1d52   :  { %v10584_v62 = vpop.eup %10583  ;;  %9945 = vmatprep.mubr.msk.f32.mxu1 %vm589_vm8, %v10582_v47 }
0x1d53   :  { %9946 = vmatmul.mubr.msk.f32.vlgmr.msra.gmra.mxu1 %vm589_vm8, %v10584_v62  ;;  %v4541_v43 = vpop.permute.xlu1 %4540 }
0x1d54   :  { %9966 = vmatpush3.bf16.msra.mxu1 %v4545_v61  ;;  %9973 = vmatprep.mubr.msk.bf16.mxu1 %vm11056_vm13, %v11053_v1  ;;  %v10512_v61 = vld [vmem:[%s13169_s14 + $0x20] ss:$8 sps:$4 sm:$0xff]  }
0x1d55   :  { %9967 = vmatprep.subr.bf16.mxu1 %v11053_v1  ;;  %v4539_v5 = vpop.permute.xlu0 %4538 }
0x1d57   :  { %v4469_v57 = vpop.permute.xlu1 %4468 }
0x1d58   :  { %9968 = vmatpush3.bf16.msra.mxu1 %v4543_v40  ;;  %v4482_v21 = vsel %vm414_vm5, %v4467_v52, %v4469_v57  ;;  %v10517_v40 = vld [vmem:[%s13169_s14 + $0x14] ss:$8 sps:$4 sm:$0xff]  }
0x1d59   :  { %9969 = vmatprep.subr.bf16.mxu1 %v11053_v1 }
0x1d5c   :  { %9970 = vmatpush3.bf16.msra.mxu1 %v4541_v43  ;;  %v12339_v43 = vld [vmem:[%s13163_s8 + $0x38] sm:$0xff] }
0x1d5d   :  { %9971 = vmatprep.subr.bf16.mxu1 %v11053_v1 }
0x1d60   :  { %9972 = vmatpush3.bf16.msra.mxu1 %v4539_v5 }
0x1d61   :  { %9977 = vmatprep.subr.msk.mxu1 %vm333_vm3, %v12292_v0 }
0x1d63   :  { %9974 = vmatmul.mubr.msk.bf16.vlgmr.msra.gmra.mxu1 %vm589_vm8, %v13187_v59 }
0x1d64   :  { %9978 = vmatpush3.msk.msra.mxu1 %vm333_vm3, %v12292_v0 }
0x1e13   :  { %v9947_v45 = vpop.f32.mrf.mxu1 }
0x1e15   :  { %v4339_v24 = vpop.f32.mrf.mxu1 }
0x1e16   :  { %10585 = vrcp.f32 %v4339_v24 }
0x1e17   :  { %10587 = vrcp.f32 %v9947_v45 }
0x1e23   :  { %v10586_v20 = vpop.eup %10585  ;;  %v4587_v27 = vpop.f32.mrf.mxu1 }
0x1e24   :  { %v10588_v55 = vpop.eup %10587  ;;  %9950 = vmatprep.mubr.msk.f32.mxu0 %vm328_vm4, %v10586_v20  ;;  %v3998_v20 = vadd.f32 %v12179_v10, %v12201_v33  ;;  %v12354_v10 = vld [vmem:[%s13163_s8 + $0x30] sm:$0xff]  ;;  %v12368_v33 = vld [vmem:[%s13163_s8 + $0x20] sm:$0xff] }
0x1e25   :  { %v9975_v17 = vpop.f32.mrf.mxu1  ;;  %9951 = vmatmul.mubr.msk.f32.vlgmr.msra.gmra.mxu0 %vm328_vm4, %v10588_v55 }
0x1e26   :  { %9954 = vmatpush3.bf16.msra.mxu0 %v4485_v37  ;;  %9961 = vmatprep.mubr.msk.bf16.mxu0 %vm11056_vm13, %v11053_v1  ;;  %v10511_v37 = vld [vmem:[%s13169_s14 + $0x34] ss:$8 sps:$4 sm:$0xff]   ;;  %v4594_v17 = vmax.f32 %v3998_v20, 0.0 }
0x1e27   :  { %v4590_v53 = vpop.f32.mrf.mxu1  ;;  %9955 = vmatprep.subr.bf16.mxu0 %v11053_v1 }
0x1e29   :  { %v9976_v4 = vpop.f32.mrf.mxu1 }
0x1e2a   :  { %9956 = vmatpush3.bf16.msra.mxu0 %v4484_v32 }
0x1e2b   :  { %9957 = vmatprep.subr.bf16.mxu0 %v11053_v1 }
0x1e2e   :  { %9958 = vmatpush3.bf16.msra.mxu0 %v4483_v13 }
0x1e2f   :  { %9959 = vmatprep.subr.bf16.mxu0 %v11053_v1 }
0x1e32   :  { %9960 = vmatpush3.bf16.msra.mxu0 %v4482_v21 }
0x1e33   :  { %4680 = vmatprep.subr.bf16.mxu0 %v10511_v37 }
0x1ee5   :  { %v9952_v8 = vpop.f32.mrf.mxu0 }
0x1ee6   :  { %v4432_v12 = vmul.f32 %v10584_v62, %v9952_v8 }
0x1ee7   :  { %v4422_v48 = vpop.f32.mrf.mxu0 }
0x1ee8   :  { %v4431_v54 = vmul.f32 %v10582_v47, %v4422_v48 }
0x1eea   :  { %v4449_v60 = vpack.c.bf16 %v4432_v12, %v4431_v54  ;;  %v12382_v12 = vld [vmem:[%s13163_s8 + $0x10] sm:$0xff]  ;;  %v12389_v54 = vld [vmem:[%s13163_s8 + $0x8] sm:$0xff] }
0x1eec   :  { %9962 = vmatmul.mubr.msk.bf16.vlgmr.msra.gmra.mxu0 %vm589_vm8, %v4449_v60  ;;  %v12396_v60 = vld [vmem:[%s13163_s8] sm:$0xff] }
0x1eed   :  { %4704 = vmatprep.mubr.bf16.mxu0 %v13188_v16  ;;  %4681 = vmatpush1.bf16.msra.mxu0 %v10509_v31  ;;  %v4617_v16 = vld [vmem:[#allocation20] sm:$0x3] }
0x1eee   :  { %4682 = vmatprep.subr.bf16.mxu0 %v10514_v15  ;;  %v4622_v31 = vrot.slane %v4617_v16, %v11241_v14 }
0x1ef1   :  { %4683 = vmatpush1.bf16.msra.mxu0 %v10512_v61 }
0x1ef2   :  { %4684 = vmatprep.subr.bf16.mxu0 %v10517_v40 }
0x1ef5   :  { %4685 = vmatpush1.bf16.msra.mxu0 %v10515_v2 }
0x1ef6   :  { %4686 = vmatprep.subr.bf16.mxu0 %v10520_v18 }
0x1ef9   :  { %4687 = vmatpush1.bf16.msra.mxu0 %v10518_v38  ;;  %v12417_v38 = vld [vmem:[#allocation14] sm:$0xff] }
0x1efa   :  { %9994 = vmatprep.subr.mxu0 %v12339_v43 }
0x1fac   :  { %v4527_v32 = vpop.f32.mrf.mxu0 }
0x1fad   :  { %v4588_v47 = vadd.f32 %v4587_v27, %v4527_v32  ;;  %v4001_v27 = vadd.f32 %v12185_v56, %v12203_v3  ;;  %v12361_v56 = vld [vmem:[%s13163_s8 + $0x28] sm:$0xff]  ;;  %v12375_v3 = vld [vmem:[%s13163_s8 + $0x18] sm:$0xff] }
0x1fae   :  { %v9963_v13 = vpop.f32.mrf.mxu0 }
0x1faf   :  { %v4596_v59 = vmax.f32 %v4588_v47, 0.0  ;;  %v12421_v13 = vld [vmem:[#allocation13 + $0x8] sm:$0xff] }
0x1fb0   :  { %v4530_v62 = vpop.f32.mrf.mxu0 }
0x1fb1   :  { %v4591_v52 = vadd.f32 %v4590_v53, %v4530_v62  ;;  %v4595_v53 = vmax.f32 %v4001_v27, 0.0 }
0x1fb2   :  { %v9964_v5 = vpop.f32.mrf.mxu0 }
0x1fb3   :  { %v4597_v45 = vmax.f32 %v4591_v52, 0.0  ;;  %v12424_v52 = vld [vmem:[#allocation13] sm:$0xff] }
0x1fb5   :  { %v10459_v24 = vpack.i.bf16 %v4597_v45, %v4596_v59  ;;  %v12427_v45 = vld [vmem:[#allocation14 + $0x8] sm:$0xff] }
0x1fb7   :  { %10460 = vrot.lane.b32.xlu1 %v10459_v24, %s11058_s25 }
0x2029   :  { %v10461_v55 = vpop.permute.xlu1 %10460 }
0x202a   :  { %v10463_v4 = vunpack.i.h.bf16 %v10461_v55  ;;  %v10462_v57 = vunpack.i.l.bf16 %v10461_v55 }
0x202c   :  { %v4607_v21 = vsel %vm2460_vm0, %v4595_v53, %v10463_v4  ;;  %v4606_v8 = vsel %vm2460_vm0, %v4594_v17, %v10462_v57 }
0x202d   :  { %v4608_v48 = vpack.c.bf16 %v4607_v21, %v4606_v8 }
0x202f   :  { %8981 = vmatmul.mubr.msk.bf16.vlgmr.msra.gmra.mxu0 %vm589_vm8, %v4608_v48  ;;  %v10695_v48 = vld [vmem:[#allocation5 + $0x8] sm:$0xff] }
0x2030   :  { %9995 = vmatpush3.msra.mxu0 %v12339_v43 }
0x2031   :  { %9996 = vmatprep.subr.mxu0 %v12354_v10 }
0x2032   :  { %9997 = vmatpush3.msra.mxu0 %v12354_v10 }
0x2033   :  { %9998 = vmatprep.subr.mxu0 %v12361_v56 }
0x2034   :  { %9999 = vmatpush3.msra.mxu0 %v12361_v56 }
0x2035   :  { %10000 = vmatprep.subr.mxu0 %v12368_v33 }
0x2036   :  { %10001 = vmatpush3.msra.mxu0 %v12368_v33 }
0x2037   :  { %10002 = vmatprep.subr.mxu0 %v12375_v3 }
0x2038   :  { %10003 = vmatpush3.msra.mxu0 %v12375_v3 }
0x2039   :  { %10004 = vmatprep.subr.mxu0 %v12382_v12 }
0x203a   :  { %10005 = vmatpush3.msra.mxu0 %v12382_v12 }
0x203b   :  { %10006 = vmatprep.subr.mxu0 %v12389_v54 }
0x203c   :  { %10007 = vmatpush3.msra.mxu0 %v12389_v54 }
0x203d   :  { %10008 = vmatprep.subr.mxu0 %v12396_v60 }
0x203e   :  { %10009 = vmatpush3.msra.mxu0 %v12396_v60 }
0x203f   :  { %10030 = vmatprep.subr.msk.mxu0 %vm333_vm3, %v12292_v0 }
0x20ef   :  { %v4706_v37 = vpop.f32.mrf.mxu0 }
0x20f0   :  { %v12403_v15 = vadd.f32 %v4706_v37, %v4622_v31 }
0x20f1   :  { %v4708_v61 = vpop.f32.mrf.mxu0 }
0x20f2   :  { %4717 = vrot.lane.b32.xlu0 %v12403_v15, %s11047_s15 }
0x20f3   :  { %v4710_v40 = vpop.f32.mrf.mxu0 }
0x20f4   :  { %v12407_v2 = vadd.f32 %v4710_v40, %v4622_v31 }
0x20f6   :  { %4719 = vrot.lane.b32.xlu1 %v12407_v2, %s11047_s15  ;;  %4877 = vrot.lane.b32.xlu0 %v12403_v15, %s11046_s13 }
0x20fa   :  { %4879 = vrot.lane.b32.xlu1 %v12407_v2, %s11046_s13 }
0x2164   :  { %v4718_v14 = vpop.permute.xlu0 %4717 }
0x2165   :  { %9979 = vmatprep.mubr.msk.f32.mxu1 %vm328_vm4, %v4718_v14  ;;  %v10696_v14 = vld [vmem:[#allocation5] sm:$0xff] }
0x2168   :  { %v4720_v32 = vpop.permute.xlu1 %4719  ;;  %v4878_v59 = vpop.permute.xlu0 %4877 }
0x2169   :  { %9980 = vmatmul.mubr.msk.f32.vlgmr.msra.gmra.mxu1 %vm328_vm4, %v4720_v32 }
0x216a   :  { %9986 = vmatprep.mubr.msk.f32.mxu1 %vm414_vm5, %v12417_v38 }
0x216c   :  { %v4880_v24 = vpop.permute.xlu1 %4879 }
0x2229   :  { %v9981_v18 = vpop.f32.mrf.mxu1 }
0x222a   :  { %v4801_v47 = vmul.f32 %v12421_v13, %v9981_v18 }
0x222b   :  { %v4791_v62 = vpop.f32.mrf.mxu1 }
0x222c   :  { %v4800_v5 = vmul.f32 %v12424_v52, %v4791_v62  ;;  %9982 = vmatprep.subr.mxu1 %v4801_v47  ;;  %v4626_v62 = vrot.slane %v4617_v16, %v11290_v50 }
0x222d   :  { %9983 = vmatpush3.msra.mxu1 %v4801_v47  ;;  %v4712_v47 = vpop.f32.mrf.mxu0 }
0x222e   :  { %9984 = vmatprep.subr.mxu1 %v4800_v5 }
0x222f   :  { %9985 = vmatpush3.msra.mxu1 %v4800_v5  ;;  %v12448_v5 = vadd.f32 %v4712_v47, %v4626_v62 }
0x2230   :  { %9987 = vmatmul.mubr.msk.f32.vlgmr.msra.gmra.mxu1 %vm414_vm5, %v12427_v45  ;;  %9989 = vmatprep.subr.msk.mxu1 %vm333_vm3, %v12292_v0 }
0x2231   :  { %9990 = vmatpush3.msk.msra.mxu1 %vm333_vm3, %v12292_v0  ;;  %9991 = vmatprep.mubr.msk.f32.mxu1 %vm328_vm4, %v4878_v59  ;;  %v12454_v59 = vadd.f32 %v4708_v61, %v4626_v62 }
0x2232   :  { %10013 = vmatprep.subr.msk.mxu1 %vm333_vm3, %v12292_v0 }
0x2234   :  { %9992 = vmatmul.mubr.msk.f32.vlgmr.msra.gmra.mxu1 %vm328_vm4, %v4880_v24 }
0x2235   :  { %10014 = vmatpush3.msk.msra.mxu1 %vm333_vm3, %v12292_v0 }
0x2236   :  { %10018 = vmatprep.subr.msk.mxu1 %vm333_vm3, %v12292_v0 }
0x22f0   :  { %v9988_v20 = vpop.f32.mrf.mxu1 }
0x22f2   :  { %v4868_v27 = vpop.f32.mrf.mxu1 }
0x22f4   :  { %v9993_v55 = vpop.f32.mrf.mxu1 }
0x22f5   :  { %v4957_v17 = vadd.f32 %v9993_v55, %v9988_v20 }
0x22f6   :  { %v4951_v53 = vpop.f32.mrf.mxu1 }
0x22f7   :  { %vm4961_vm14 = vcmp.ge.f32.partialorder %v4957_v17, 0.0  ;;  %v4963_v4 = vmul.f32 0.2, %v4957_v17  ;;  %v4952_v57 = vadd.f32 %v4951_v53, %v4868_v27 }
0x22f9   :  { %vm4960_vm15 = vcmp.ge.f32.partialorder %v4952_v57, 0.0  ;;  %v4962_v21 = vmul.f32 0.2, %v4952_v57  ;;  %v4965_v8 = vsel %vm4961_vm14, %v4957_v17, %v4963_v4 }
0x22fa   :  { %v4967_v31 = vadd.f32 %v10695_v48, %v4965_v8 }
0x22fb   :  { %v4964_v37 = vsel %vm4960_vm15, %v4952_v57, %v4962_v21 }
0x22fc   :  { %v4971_v40 = vsel %vm589_vm8, %v4967_v31, -inf  ;;  %v4966_v32 = vadd.f32 %v10696_v14, %v4964_v37 }
0x22fd   :  { %4972 = vmax.xlane.f32.xlu1 %v4971_v40 }
0x22fe   :  { %v4968_v18 = vsel %vm589_vm8, %v4966_v32, -inf }
0x22ff   :  { %4969 = vmax.xlane.f32.xlu0 %v4968_v18 }
0x230e   :  { %5161 = vrot.lane.b32.xlu1 %v12407_v2, %s11048_s23 }
0x2312   :  { %5323 = vrot.lane.b32.xlu1 %v12448_v5, %s11049_s26 }
0x2315   :  { %5159 = vrot.lane.b32.xlu0 %v12403_v15, %s11048_s23 }
0x2319   :  { %5321 = vrot.lane.b32.xlu0 %v12454_v59, %s11049_s26 }
0x2386   :  { %v4973_v24 = vpop.xlane.xlu1 %4972 }
0x2387   :  { %v4975_v20 = vsub.f32 %v4967_v31, %v4973_v24 }
0x2388   :  { %v4970_v27 = vpop.xlane.xlu0 %4969 }
0x2389   :  { %v4974_v50 = vsub.f32 %v4966_v32, %v4970_v27  ;;  %v4978_v16 = vmul.f32 1.442695, %v4975_v20 }
0x238a   :  { %v5162_v53 = vpop.permute.xlu1 %5161 }
0x238b   :  { %v4976_v55 = vmul.f32 1.442695, %v4974_v50 }
0x238c   :  { %v5160_v17 = vpop.permute.xlu0 %5159 }
0x238d   :  { %10589 = vpow2.f32 %v4976_v55 }
0x238e   :  { %10591 = vpow2.f32 %v4978_v16  ;;  %v5324_v61 = vpop.permute.xlu1 %5323 }
0x2390   :  { %v5322_v21 = vpop.permute.xlu0 %5321 }
0x239a   :  { %v10590_v4 = vpop.eup %10589 }
0x239b   :  { %v10592_v57 = vpop.eup %10591  ;;  %10010 = vmatprep.mubr.msk.f32.mxu0 %vm589_vm8, %v10590_v4 }
0x239c   :  { %10011 = vmatmul.mubr.msk.f32.vlgmr.msra.gmra.mxu0 %vm589_vm8, %v10592_v57 }
0x239d   :  { %10032 = vmatprep.mubr.msk.f32.mxu0 %vm328_vm4, %v5322_v21  ;;  %10031 = vmatpush3.msk.msra.mxu0 %vm333_vm3, %v12292_v0 }
0x239e   :  { %10054 = vmatprep.subr.msk.mxu0 %vm333_vm3, %v12292_v0 }
0x23a0   :  { %10033 = vmatmul.mubr.msk.f32.vlgmr.msra.gmra.mxu0 %vm328_vm4, %v5324_v61 }
0x23a1   :  { %10055 = vmatpush3.msk.msra.mxu0 %vm333_vm3, %v12292_v0 }
0x23a2   :  { %10059 = vmatprep.subr.msk.mxu0 %vm333_vm3, %v12292_v0 }
0x245c   :  { %v10012_v8 = vpop.f32.mrf.mxu0 }
0x245e   :  { %v5052_v48 = vpop.f32.mrf.mxu0 }
0x245f   :  { %10593 = vrcp.f32 %v5052_v48 }
0x2460   :  { %10595 = vrcp.f32 %v10012_v8  ;;  %v10034_v50 = vpop.f32.mrf.mxu0  ;;  %v10697_v8 = vld [vmem:[#allocation7 + $0x8] sm:$0xff] }
0x246c   :  { %v10594_v31 = vpop.eup %10593 }
0x246d   :  { %v10596_v37 = vpop.eup %10595  ;;  %10015 = vmatprep.mubr.msk.f32.mxu1 %vm328_vm4, %v10594_v31 }
0x246e   :  { %10016 = vmatmul.mubr.msk.f32.vlgmr.msra.gmra.mxu1 %vm328_vm4, %v10596_v37 }
0x246f   :  { %10019 = vmatpush3.msk.msra.mxu1 %vm333_vm3, %v12292_v0  ;;  %10020 = vmatprep.mubr.msk.f32.mxu1 %vm328_vm4, %v5160_v17  ;;  %v5395_v17 = vpop.f32.mrf.mxu0 }
0x2472   :  { %10021 = vmatmul.mubr.msk.f32.vlgmr.msra.gmra.mxu1 %vm328_vm4, %v5162_v53 }
0x2473   :  { %10027 = vmatprep.mubr.msk.f32.mxu1 %vm414_vm5, %v12417_v38 }
0x252e   :  { %v10017_v40 = vpop.f32.mrf.mxu1 }
0x252f   :  { %v12478_v32 = vmul.f32 %v10592_v57, %v10017_v40  ;;  %v10698_v40 = vld [vmem:[#allocation7] sm:$0xff] }
0x2530   :  { %v5135_v14 = vpop.f32.mrf.mxu1 }
0x2531   :  { %v12480_v18 = vmul.f32 %v10590_v4, %v5135_v14 }
0x2532   :  { %v10022_v47 = vpop.f32.mrf.mxu1 }
0x2533   :  { %v5154_v62 = vpack.c.bf16 %v12478_v32, %v12480_v18  ;;  %v5243_v24 = vmul.f32 %v12421_v13, %v10022_v47 }
0x2534   :  { %v5233_v20 = vpop.f32.mrf.mxu1 }
0x2535   :  { %v5242_v27 = vmul.f32 %v12424_v52, %v5233_v20  ;;  %10023 = vmatprep.subr.mxu1 %v5243_v24 }
0x2536   :  { %10024 = vmatpush3.msra.mxu1 %v5243_v24 }
0x2537   :  { %10025 = vmatprep.subr.mxu1 %v5242_v27 }
0x2538   :  { %10026 = vmatpush3.msra.mxu1 %v5242_v27 }
0x2539   :  { %10028 = vmatmul.mubr.msk.f32.vlgmr.msra.gmra.mxu1 %vm414_vm5, %v12427_v45  ;;  %10035 = vmatprep.subr.mxu1 %v12339_v43 }
0x253a   :  { %10036 = vmatpush3.msra.mxu1 %v12339_v43 }
0x253b   :  { %10037 = vmatprep.subr.mxu1 %v12354_v10 }
0x253c   :  { %10038 = vmatpush3.msra.mxu1 %v12354_v10 }
0x253d   :  { %10039 = vmatprep.subr.mxu1 %v12361_v56 }
0x253e   :  { %10040 = vmatpush3.msra.mxu1 %v12361_v56 }
0x253f   :  { %10041 = vmatprep.subr.mxu1 %v12368_v33 }
0x2540   :  { %10042 = vmatpush3.msra.mxu1 %v12368_v33 }
0x2541   :  { %10043 = vmatprep.subr.mxu1 %v12375_v3 }
0x2542   :  { %10044 = vmatpush3.msra.mxu1 %v12375_v3 }
0x2543   :  { %10045 = vmatprep.subr.mxu1 %v12382_v12 }
0x2544   :  { %10046 = vmatpush3.msra.mxu1 %v12382_v12 }
0x2545   :  { %10047 = vmatprep.subr.mxu1 %v12389_v54 }
0x2546   :  { %10048 = vmatpush3.msra.mxu1 %v12389_v54 }
0x2547   :  { %10049 = vmatprep.subr.mxu1 %v12396_v60 }
0x2548   :  { %10050 = vmatpush3.msra.mxu1 %v12396_v60 }
0x2549   :  { %10076 = vmatprep.subr.mxu1 %v12339_v43 }
0x25f9   :  { %v10029_v16 = vpop.f32.mrf.mxu1 }
0x25fa   :  { %v5401_v55 = vadd.f32 %v10034_v50, %v10029_v16 }
0x25fb   :  { %v5310_v53 = vpop.f32.mrf.mxu1 }
0x25fc   :  { %vm5405_vm1 = vcmp.ge.f32.partialorder %v5401_v55, 0.0  ;;  %v5407_v4 = vmul.f32 0.2, %v5401_v55  ;;  %v5396_v57 = vadd.f32 %v5395_v17, %v5310_v53 }
0x25fe   :  { %vm5404_vm2 = vcmp.ge.f32.partialorder %v5396_v57, 0.0  ;;  %v5406_v21 = vmul.f32 0.2, %v5396_v57  ;;  %v5409_v61 = vsel %vm5405_vm1, %v5401_v55, %v5407_v4 }
0x25ff   :  { %v5411_v48 = vadd.f32 %v10697_v8, %v5409_v61 }
0x2600   :  { %v5408_v31 = vsel %vm5404_vm2, %v5396_v57, %v5406_v21  ;;  %vm8809_vm2 = vcmask 64512  }
0x2601   :  { %v5415_v37 = vsel %vm589_vm8, %v5411_v48, -inf  ;;  %v5410_v14 = vadd.f32 %v10698_v40, %v5408_v31 }
0x2602   :  { %5416 = vmax.xlane.f32.xlu1 %v5415_v37 }
0x2603   :  { %v5412_v47 = vsel %vm589_vm8, %v5410_v14, -inf }
0x2604   :  { %5413 = vmax.xlane.f32.xlu0 %v5412_v47 }
0x2613   :  { %5605 = vrot.lane.b32.xlu1 %v12448_v5, %s11050_s10 }
0x2617   :  { %5765 = vrot.lane.b32.xlu1 %v12407_v2, %s11051_s22 }
0x261a   :  { %5603 = vrot.lane.b32.xlu0 %v12454_v59, %s11050_s10 }
0x261e   :  { %5763 = vrot.lane.b32.xlu0 %v12403_v15, %s11051_s22 }
0x268b   :  { %v5417_v24 = vpop.xlane.xlu1 %5416 }
0x268c   :  { %v5419_v20 = vsub.f32 %v5411_v48, %v5417_v24 }
0x268d   :  { %v5414_v27 = vpop.xlane.xlu0 %5413 }
0x268e   :  { %v5418_v50 = vsub.f32 %v5410_v14, %v5414_v27  ;;  %v5422_v16 = vmul.f32 1.442695, %v5419_v20 }
0x268f   :  { %v5606_v48 = vpop.permute.xlu1 %5605 }
0x2690   :  { %v5420_v55 = vmul.f32 1.442695, %v5418_v50 }
0x2691   :  { %v5604_v8 = vpop.permute.xlu0 %5603 }
0x2692   :  { %10597 = vpow2.f32 %v5420_v55 }
0x2693   :  { %10599 = vpow2.f32 %v5422_v16  ;;  %v5766_v55 = vpop.permute.xlu1 %5765 }
0x2695   :  { %v5764_v16 = vpop.permute.xlu0 %5763 }
0x269f   :  { %v10598_v17 = vpop.eup %10597 }
0x26a0   :  { %v10600_v53 = vpop.eup %10599  ;;  %10051 = vmatprep.mubr.msk.f32.mxu1 %vm589_vm8, %v10598_v17 }
0x26a1   :  { %10052 = vmatmul.mubr.msk.f32.vlgmr.msra.gmra.mxu1 %vm589_vm8, %v10600_v53 }
0x26a2   :  { %10077 = vmatpush3.msra.mxu1 %v12339_v43 }
0x26a3   :  { %10078 = vmatprep.subr.mxu1 %v12354_v10 }
0x26a4   :  { %10079 = vmatpush3.msra.mxu1 %v12354_v10 }
0x26a5   :  { %10080 = vmatprep.subr.mxu1 %v12361_v56 }
0x26a6   :  { %10081 = vmatpush3.msra.mxu1 %v12361_v56 }
0x26a7   :  { %10082 = vmatprep.subr.mxu1 %v12368_v33 }
0x26a8   :  { %10083 = vmatpush3.msra.mxu1 %v12368_v33 }
0x26a9   :  { %10084 = vmatprep.subr.mxu1 %v12375_v3 }
0x26aa   :  { %10085 = vmatpush3.msra.mxu1 %v12375_v3 }
0x26ab   :  { %10086 = vmatprep.subr.mxu1 %v12382_v12 }
0x26ac   :  { %10087 = vmatpush3.msra.mxu1 %v12382_v12 }
0x26ad   :  { %10088 = vmatprep.subr.mxu1 %v12389_v54 }
0x26ae   :  { %10089 = vmatpush3.msra.mxu1 %v12389_v54 }
0x26af   :  { %10090 = vmatprep.subr.mxu1 %v12396_v60 }
0x26b0   :  { %10091 = vmatpush3.msra.mxu1 %v12396_v60 }
0x26b1   :  { %10112 = vmatprep.subr.bf16.mxu1 %v11053_v1 }
0x2761   :  { %v10053_v4 = vpop.f32.mrf.mxu1 }
0x2763   :  { %v5496_v57 = vpop.f32.mrf.mxu1 }
0x2764   :  { %10601 = vrcp.f32 %v5496_v57 }
0x2765   :  { %10603 = vrcp.f32 %v10053_v4 }
0x2771   :  { %v10602_v21 = vpop.eup %10601 }
0x2772   :  { %v10604_v61 = vpop.eup %10603  ;;  %10056 = vmatprep.mubr.msk.f32.mxu0 %vm328_vm4, %v10602_v21 }
0x2773   :  { %10057 = vmatmul.mubr.msk.f32.vlgmr.msra.gmra.mxu0 %vm328_vm4, %v10604_v61 }
0x2774   :  { %10060 = vmatpush3.msk.msra.mxu0 %vm333_vm3, %v12292_v0  ;;  %10061 = vmatprep.mubr.msk.f32.mxu0 %vm328_vm4, %v5604_v8 }
0x2777   :  { %10062 = vmatmul.mubr.msk.f32.vlgmr.msra.gmra.mxu0 %vm328_vm4, %v5606_v48 }
0x2778   :  { %10068 = vmatprep.mubr.msk.f32.mxu0 %vm414_vm5, %v12417_v38 }
0x2833   :  { %v10058_v31 = vpop.f32.mrf.mxu0 }
0x2834   :  { %v12541_v40 = vmul.f32 %v10600_v53, %v10058_v31 }
0x2835   :  { %v5579_v37 = vpop.f32.mrf.mxu0 }
0x2836   :  { %v12543_v14 = vmul.f32 %v10598_v17, %v5579_v37  ;;  %v10699_v37 = vld [vmem:[#allocation8 + $0x8] sm:$0xff] }
0x2837   :  { %v10063_v47 = vpop.f32.mrf.mxu0 }
0x2838   :  { %v5598_v24 = vpack.c.bf16 %v12541_v40, %v12543_v14  ;;  %v5687_v20 = vmul.f32 %v12421_v13, %v10063_v47 }
0x2839   :  { %v5677_v27 = vpop.f32.mrf.mxu0 }
0x283a   :  { %v5686_v50 = vmul.f32 %v12424_v52, %v5677_v27  ;;  %10064 = vmatprep.subr.mxu0 %v5687_v20 }
0x283b   :  { %10065 = vmatpush3.msra.mxu0 %v5687_v20 }
0x283c   :  { %10066 = vmatprep.subr.mxu0 %v5686_v50 }
0x283d   :  { %10067 = vmatpush3.msra.mxu0 %v5686_v50  ;;  %v10700_v50 = vld [vmem:[#allocation8] sm:$0xff] }
0x283e   :  { %10069 = vmatmul.mubr.msk.f32.vlgmr.msra.gmra.mxu0 %vm414_vm5, %v12427_v45  ;;  %10071 = vmatprep.subr.msk.mxu0 %vm333_vm3, %v12292_v0 }
0x283f   :  { %10072 = vmatpush3.msk.msra.mxu0 %vm333_vm3, %v12292_v0  ;;  %10073 = vmatprep.mubr.msk.f32.mxu0 %vm328_vm4, %v5764_v16 }
0x2840   :  { %10095 = vmatprep.subr.msk.mxu0 %vm333_vm3, %v12292_v0 }
0x2842   :  { %10074 = vmatmul.mubr.msk.f32.vlgmr.msra.gmra.mxu0 %vm328_vm4, %v5766_v55 }
0x2843   :  { %10096 = vmatpush3.msk.msra.mxu0 %vm333_vm3, %v12292_v0 }
0x2844   :  { %10100 = vmatprep.subr.bf16.mxu0 %v11053_v1 }
0x28fe   :  { %v10070_v17 = vpop.f32.mrf.mxu0 }
0x2900   :  { %v5754_v53 = vpop.f32.mrf.mxu0 }
0x2902   :  { %v10075_v4 = vpop.f32.mrf.mxu0 }
0x2903   :  { %v5843_v57 = vadd.f32 %v10075_v4, %v10070_v17  ;;  %v6037_v17 = vmul.f32 %v12407_v2, %v11541_v23 }
0x2904   :  { %v5837_v21 = vpop.f32.mrf.mxu0 }
0x2905   :  { %vm5847_vm6 = vcmp.ge.f32.partialorder %v5843_v57, 0.0  ;;  %v5849_v61 = vmul.f32 0.2, %v5843_v57  ;;  %v5838_v8 = vadd.f32 %v5837_v21, %v5754_v53  ;;  %v6036_v53 = vmul.f32 %v12403_v15, %v11543_v30 }
0x2906   :  { %v6032_v21 = vmul.f32 %v12403_v15, %v11563_v42  ;;  %v6035_v30 = vmul.f32 %v12407_v2, %v11550_v34 }
0x2907   :  { %vm5846_vm7 = vcmp.ge.f32.partialorder %v5838_v8, 0.0  ;;  %v5848_v48 = vmul.f32 0.2, %v5838_v8  ;;  %v5851_v31 = vsel %vm5847_vm6, %v5843_v57, %v5849_v61  ;;  %v6043_v4 = vpack.c.bf16 %v6037_v17, %v6036_v53  ;;  %v10703_v53 = vld [vmem:[%s13164_s9 + $0x28] sm:$0xff] }
0x2908   :  { %v5853_v47 = vadd.f32 %v10699_v37, %v5851_v31  ;;  %v6033_v57 = vmul.f32 %v12407_v2, %v11559_v39  ;;  %v6039_v61 = vmul.f32 %v12407_v2, %v11533_v11  ;;  %v6034_v39 = vmul.f32 %v12403_v15, %v11552_v36 }
0x2909   :  { %v5850_v20 = vsel %vm5846_vm7, %v5838_v8, %v5848_v48  ;;  %v6038_v48 = vmul.f32 %v12403_v15, %v11535_v19 }
0x290a   :  { %v5857_v27 = vsel %vm589_vm8, %v5853_v47, -inf  ;;  %v5852_v16 = vadd.f32 %v10700_v50, %v5850_v20  ;;  %v6041_v8 = vpack.c.bf16 %v6033_v57, %v6032_v21  ;;  %v6042_v42 = vpack.c.bf16 %v6035_v30, %v6034_v39  ;;  %v10701_v20 = vld [vmem:[%s13164_s9 + $0x38] sm:$0xff]  ;;  %v10702_v50 = vld [vmem:[%s13164_s9 + $0x30] sm:$0xff]  ;;  %v10704_v57 = vld [vmem:[%s13164_s9 + $0x20] sm:$0xff] }
0x290b   :  { %5858 = vmax.xlane.f32.xlu1 %v5857_v27  ;;  %v6044_v23 = vpack.c.bf16 %v6039_v61, %v6038_v48  ;;  %v5153_v27 = vmul.f32 %v10701_v20, %v12407_v2  ;;  %v5150_v21 = vmul.f32 %v10704_v57, %v12403_v15 }
0x290c   :  { %v5854_v55 = vsel %vm589_vm8, %v5852_v16, -inf }
0x290d   :  { %5855 = vmax.xlane.f32.xlu0 %v5854_v55  ;;  %v5152_v55 = vmul.f32 %v10702_v50, %v12403_v15 }
0x291c   :  { %6053 = vrot.lane.b32.xlu1 %v6043_v4, %s11054_s30  ;;  %v5151_v4 = vmul.f32 %v10703_v53, %v12407_v2 }
0x291e   :  { %v5157_v61 = vpack.c.bf16 %v5151_v4, %v5150_v21 }
0x2920   :  { %6049 = vrot.lane.b32.xlu1 %v6041_v8, %s11054_s30  ;;  %v10705_v8 = vld [vmem:[%s13164_s9 + $0x18] sm:$0xff] }
0x2921   :  { %v5149_v48 = vmul.f32 %v10705_v8, %v12407_v2 }
0x2923   :  { %6055 = vrot.lane.b32.xlu0 %v6044_v23, %s11054_s30  ;;  %v10706_v23 = vld [vmem:[%s13164_s9 + $0x10] sm:$0xff] }
0x2924   :  { %6151 = vrot.lane.b32.xlu1 %v12448_v5, %s11055_s1  ;;  %v5148_v30 = vmul.f32 %v10706_v23, %v12403_v15 }
0x2926   :  { %v5156_v39 = vpack.c.bf16 %v5149_v48, %v5148_v30 }
0x2927   :  { %6051 = vrot.lane.b32.xlu0 %v6042_v42, %s11054_s30  ;;  %v10707_v42 = vld [vmem:[%s13164_s9 + $0x8] sm:$0xff]  ;;  %s11063_s30 = smov 68  }
0x2928   :  { %6311 = vrot.lane.b32.xlu1 %v12448_v5, %s11057_s24 }
0x292b   :  { %6149 = vrot.lane.b32.xlu0 %v12454_v59, %s11055_s1  ;;  %s11068_s1 = smov 116  }
0x292f   :  { %6309 = vrot.lane.b32.xlu0 %v12454_v59, %s11057_s24 }
0x2994   :  { %v5859_v11 = vpop.xlane.xlu1 %5858 }
0x2995   :  { %v5861_v19 = vsub.f32 %v5853_v47, %v5859_v11  ;;  %v5147_v11 = vmul.f32 %v10707_v42, %v12407_v2 }
0x2996   :  { %v5856_v34 = vpop.xlane.xlu0 %5855 }
0x2997   :  { %v5860_v31 = vsub.f32 %v5852_v16, %v5856_v34  ;;  %v5864_v36 = vmul.f32 1.442695, %v5861_v19  ;;  %v5158_v16 = vpack.c.bf16 %v5153_v27, %v5152_v55  ;;  %v10708_v19 = vld [vmem:[%s13164_s9] sm:$0xff] }
0x2998   :  { %v5146_v34 = vmul.f32 %v10708_v19, %v12403_v15 }
0x2999   :  { %v5862_v37 = vmul.f32 1.442695, %v5860_v31 }
0x299a   :  { %v5155_v31 = vpack.c.bf16 %v5147_v11, %v5146_v34 }
0x299b   :  { %10605 = vpow2.f32 %v5862_v37 }
0x299c   :  { %10607 = vpow2.f32 %v5864_v36 }
0x29a8   :  { %v12600_v17 = vpop.eup %10605 }
0x29a9   :  { %v12602_v47 = vpop.eup %10607  ;;  %10092 = vmatprep.mubr.msk.f32.mxu1 %vm589_vm8, %v12600_v17 }
0x29aa   :  { %10093 = vmatmul.mubr.msk.f32.vlgmr.msra.gmra.mxu1 %vm589_vm8, %v12602_v47 }
0x29ab   :  { %10113 = vmatpush3.bf16.msra.mxu1 %v5158_v16  ;;  %10120 = vmatprep.mubr.msk.bf16.mxu1 %vm11056_vm13, %v11053_v1 }
0x29ac   :  { %10114 = vmatprep.subr.bf16.mxu1 %v11053_v1 }
0x29af   :  { %10115 = vmatpush3.bf16.msra.mxu1 %v5157_v61 }
0x29b0   :  { %10116 = vmatprep.subr.bf16.mxu1 %v11053_v1 }
0x29b3   :  { %10117 = vmatpush3.bf16.msra.mxu1 %v5156_v39 }
0x29b4   :  { %10118 = vmatprep.subr.bf16.mxu1 %v11053_v1 }
0x29b7   :  { %10119 = vmatpush3.bf16.msra.mxu1 %v5155_v31  ;;  %v10709_v31 = vld [vmem:[#allocation10 + $0x8] sm:$0xff] }
0x29b8   :  { %10141 = vmatprep.subr.mxu1 %v12339_v43 }
0x29ba   :  { %10121 = vmatmul.mubr.msk.bf16.vlgmr.msra.gmra.mxu1 %vm589_vm8, %v5154_v62 }
0x29bb   :  { %10142 = vmatpush3.msra.mxu1 %v12339_v43 }
0x29bc   :  { %10143 = vmatprep.subr.mxu1 %v12354_v10 }
0x29bd   :  { %10144 = vmatpush3.msra.mxu1 %v12354_v10 }
0x29be   :  { %10145 = vmatprep.subr.mxu1 %v12361_v56 }
0x29bf   :  { %10146 = vmatpush3.msra.mxu1 %v12361_v56 }
0x29c0   :  { %10147 = vmatprep.subr.mxu1 %v12368_v33 }
0x29c1   :  { %10148 = vmatpush3.msra.mxu1 %v12368_v33 }
0x29c2   :  { %10149 = vmatprep.subr.mxu1 %v12375_v3 }
0x29c3   :  { %10150 = vmatpush3.msra.mxu1 %v12375_v3 }
0x29c4   :  { %10151 = vmatprep.subr.mxu1 %v12382_v12 }
0x29c5   :  { %10152 = vmatpush3.msra.mxu1 %v12382_v12  ;;  %v6056_v12 = vpop.permute.xlu0 %6055 }
0x29c6   :  { %10153 = vmatprep.subr.mxu1 %v12389_v54 }
0x29c7   :  { %10154 = vmatpush3.msra.mxu1 %v12389_v54 }
0x29c8   :  { %10155 = vmatprep.subr.mxu1 %v12396_v60 }
0x29c9   :  { %10156 = vmatpush3.msra.mxu1 %v12396_v60  ;;  %v6054_v60 = vpop.permute.xlu1 %6053  ;;  %v6052_v62 = vpop.permute.xlu0 %6051 }
0x29ca   :  { %10177 = vmatprep.subr.bf16.mxu1 %v11053_v1 }
0x29cd   :  { %v6050_v36 = vpop.permute.xlu1 %6049  ;;  %v6150_v16 = vpop.permute.xlu0 %6149 }
0x29d1   :  { %v6152_v53 = vpop.permute.xlu1 %6151  ;;  %v6310_v23 = vpop.permute.xlu0 %6309 }
0x2a6a   :  { %v10094_v43 = vpop.f32.mrf.mxu1 }
0x2a6c   :  { %v5938_v10 = vpop.f32.mrf.mxu1 }
0x2a6d   :  { %10609 = vrcp.f32 %v5938_v10 }
0x2a6e   :  { %10611 = vrcp.f32 %v10094_v43 }
0x2a7a   :  { %v10610_v56 = vpop.eup %10609  ;;  %v12658_v33 = vpop.f32.mrf.mxu1 }
0x2a7b   :  { %v10612_v3 = vpop.eup %10611  ;;  %10097 = vmatprep.mubr.msk.f32.mxu0 %vm328_vm4, %v10610_v56 }
0x2a7c   :  { %v10122_v32 = vpop.f32.mrf.mxu1  ;;  %10098 = vmatmul.mubr.msk.f32.vlgmr.msra.gmra.mxu0 %vm328_vm4, %v10612_v3  ;;  %v10710_v3 = vld [vmem:[#allocation10] sm:$0xff] }
0x2a7d   :  { %10101 = vmatpush3.bf16.msra.mxu0 %v6056_v12  ;;  %10108 = vmatprep.mubr.msk.bf16.mxu0 %vm11056_vm13, %v11053_v1  ;;  %v6593_v32 = vmul.f32 %v12448_v5, %v11703_v26 }
0x2a7e   :  { %v12664_v54 = vpop.f32.mrf.mxu1  ;;  %10102 = vmatprep.subr.bf16.mxu0 %v11053_v1 }
0x2a80   :  { %v10123_v18 = vpop.f32.mrf.mxu1 }
0x2a81   :  { %10103 = vmatpush3.bf16.msra.mxu0 %v6054_v60  ;;  %v6591_v60 = vmul.f32 %v12454_v59, %v11705_v41 }
0x2a82   :  { %10104 = vmatprep.subr.bf16.mxu0 %v11053_v1 }
0x2a83   :  { %v6602_v18 = vpack.c.bf16 %v6593_v32, %v6591_v60 }
0x2a85   :  { %10105 = vmatpush3.bf16.msra.mxu0 %v6052_v62  ;;  %v6588_v62 = vmul.f32 %v12407_v2, %v11725_v46 }
0x2a86   :  { %10106 = vmatprep.subr.bf16.mxu0 %v11053_v1 }
0x2a89   :  { %10107 = vmatpush3.bf16.msra.mxu0 %v6050_v36  ;;  %v6586_v36 = vmul.f32 %v12403_v15, %v11727_v22 }
0x2a8a   :  { %10124 = vmatprep.subr.msk.mxu0 %vm333_vm3, %v12292_v0 }
0x2b3c   :  { %v10099_v37 = vpop.f32.mrf.mxu0 }
0x2b3d   :  { %v6031_v27 = vmul.f32 %v12602_v47, %v10099_v37  ;;  %v6592_v37 = vmul.f32 %v12407_v2, %v11703_v26  ;;  %v6585_v26 = vmul.f32 %v12448_v5, %v11750_v51 }
0x2b3e   :  { %v6021_v20 = vpop.f32.mrf.mxu0 }
0x2b3f   :  { %v6030_v50 = vmul.f32 %v12600_v17, %v6021_v20  ;;  %v6599_v20 = vpack.c.bf16 %v6588_v62, %v6586_v36 }
0x2b41   :  { %v6040_v55 = vpack.c.bf16 %v6031_v27, %v6030_v50  ;;  %v5595_v27 = vmul.f32 %v12407_v2, %v11738_v25  ;;  %v6590_v50 = vmul.f32 %v12403_v15, %v11705_v41  ;;  %v5596_v25 = vmul.f32 %v12403_v15, %v11717_v6 }
0x2b42   :  { %v6583_v41 = vmul.f32 %v12454_v59, %v11758_v58  ;;  %v6578_v6 = vmul.f32 %v12403_v15, %v11783_v63 }
0x2b43   :  { %10109 = vmatmul.mubr.msk.bf16.vlgmr.msra.gmra.mxu0 %vm589_vm8, %v6040_v55  ;;  %v5594_v55 = vmul.f32 %v12403_v15, %v11740_v35  ;;  %v6589_v35 = vmul.f32 %v12448_v5, %v11725_v46  ;;  %v5591_v46 = vmul.f32 %v12407_v2, %v11794_v7 }
0x2b44   :  { %10125 = vmatpush3.msk.msra.mxu0 %vm333_vm3, %v12292_v0  ;;  %10126 = vmatprep.mubr.msk.f32.mxu0 %vm328_vm4, %v6150_v16  ;;  %v6601_v16 = vpack.c.bf16 %v6592_v37, %v6590_v50 }
0x2b4b   :  { %10127 = vmatmul.mubr.msk.f32.vlgmr.msra.gmra.mxu0 %vm328_vm4, %v6152_v53  ;;  %v5597_v53 = vmul.f32 %v12407_v2, %v11715_v44  ;;  %v6580_v44 = vmul.f32 %v12407_v2, %v11781_v28 }
0x2b4c   :  { %10133 = vmatprep.mubr.msk.f32.mxu0 %vm414_vm5, %v12417_v38  ;;  %v6312_v38 = vpop.permute.xlu1 %6311 }
0x2c03   :  { %v12680_v4 = vpop.f32.mrf.mxu0 }
0x2c05   :  { %v10110_v47 = vpop.f32.mrf.mxu0 }
0x2c06   :  { %v5601_v47 = vpack.c.bf16 %v5595_v27, %v5594_v55 }
0x2c07   :  { %v12682_v57 = vpop.f32.mrf.mxu0 }
0x2c09   :  { %v10111_v17 = vpop.f32.mrf.mxu0 }
0x2c0a   :  { %v5602_v17 = vpack.c.bf16 %v5597_v53, %v5596_v25 }
0x2c0b   :  { %v10128_v21 = vpop.f32.mrf.mxu0 }
0x2c0c   :  { %v6233_v61 = vmul.f32 %v12421_v13, %v10128_v21  ;;  %v6598_v21 = vpack.c.bf16 %v6585_v26, %v6583_v41  ;;  %v10521_v41 = vld [vmem:[%s13171_s16 + $0x18] sm:$0xff]  }
0x2c0d   :  { %v6223_v8 = vpop.f32.mrf.mxu0 }
0x2c0e   :  { %v6232_v48 = vmul.f32 %v12424_v52, %v6223_v8  ;;  %10129 = vmatprep.subr.mxu0 %v6233_v61 }
0x2c0f   :  { %10130 = vmatpush3.msra.mxu0 %v6233_v61  ;;  %v6587_v61 = vmul.f32 %v12454_v59, %v11727_v22  ;;  %v5590_v22 = vmul.f32 %v12403_v15, %v11796_v29  ;;  %v6579_v29 = vmul.f32 %v12454_v59, %v11783_v63 }
0x2c10   :  { %10131 = vmatprep.subr.mxu0 %v6232_v48 }
0x2c11   :  { %10132 = vmatpush3.msra.mxu0 %v6232_v48  ;;  %v6600_v8 = vpack.c.bf16 %v6589_v35, %v6587_v61  ;;  %v6584_v48 = vmul.f32 %v12407_v2, %v11750_v51  ;;  %v5592_v51 = vmul.f32 %v12403_v15, %v11773_v49  ;;  %v10523_v35 = vld [vmem:[%s13171_s16 + $0x8] sm:$0xff]  }
0x2c12   :  { %10134 = vmatmul.mubr.msk.f32.vlgmr.msra.gmra.mxu0 %vm414_vm5, %v12427_v45  ;;  %10136 = vmatprep.subr.msk.mxu0 %vm333_vm3, %v12292_v0 }
0x2c13   :  { %10137 = vmatpush3.msk.msra.mxu0 %vm333_vm3, %v12292_v0  ;;  %10138 = vmatprep.mubr.msk.f32.mxu0 %vm328_vm4, %v6310_v23  ;;  %v6595_v23 = vpack.c.bf16 %v6580_v44, %v6578_v6  ;;  %v10524_v44 = vld [vmem:[%s13171_s16] sm:$0xff]  }
0x2c14   :  { %10160 = vmatprep.subr.msk.mxu0 %vm333_vm3, %v12292_v0 }
0x2c16   :  { %10139 = vmatmul.mubr.msk.f32.vlgmr.msra.gmra.mxu0 %vm328_vm4, %v6312_v38  ;;  %v6582_v38 = vmul.f32 %v12403_v15, %v11758_v58  ;;  %v6581_v58 = vmul.f32 %v12448_v5, %v11781_v28 }
0x2c17   :  { %10161 = vmatpush3.msk.msra.mxu0 %vm333_vm3, %v12292_v0 }
0x2c18   :  { %10165 = vmatprep.subr.bf16.mxu0 %v11053_v1 }
0x2cd2   :  { %v10135_v13 = vpop.f32.mrf.mxu0 }
0x2cd4   :  { %v6300_v52 = vpop.f32.mrf.mxu0 }
0x2cd6   :  { %v10140_v45 = vpop.f32.mrf.mxu0 }
0x2cd7   :  { %v6389_v30 = vadd.f32 %v10140_v45, %v10135_v13  ;;  %v6597_v13 = vpack.c.bf16 %v6584_v48, %v6582_v38  ;;  %v5599_v45 = vpack.c.bf16 %v5591_v46, %v5590_v22  ;;  %v12811_v48 = vld [vmem:[%s13163_s8 + $0x38] sm:$0xff] }
0x2cd8   :  { %v6383_v39 = vpop.f32.mrf.mxu0 }
0x2cd9   :  { %vm6393_vm9 = vcmp.ge.f32.partialorder %v6389_v30, 0.0  ;;  %v6395_v42 = vmul.f32 0.2, %v6389_v30  ;;  %v6384_v11 = vadd.f32 %v6383_v39, %v6300_v52  ;;  %v5593_v52 = vmul.f32 %v12407_v2, %v11771_v9 }
0x2cdb   :  { %vm6392_vm10 = vcmp.ge.f32.partialorder %v6384_v11, 0.0  ;;  %v6394_v19 = vmul.f32 0.2, %v6384_v11  ;;  %v6397_v34 = vsel %vm6393_vm9, %v6389_v30, %v6395_v42  ;;  %v5600_v7 = vpack.c.bf16 %v5593_v52, %v5592_v51 }
0x2cdc   :  { %v6399_v43 = vadd.f32 %v10709_v31, %v6397_v34  ;;  %v6596_v30 = vpack.c.bf16 %v6581_v58, %v6579_v29  ;;  %v6143_v52 = vadd.f32 %v12658_v33, %v12680_v4  ;;  %v12826_v33 = vld [vmem:[%s13163_s8 + $0x30] sm:$0xff]  ;;  %v12840_v4 = vld [vmem:[%s13163_s8 + $0x20] sm:$0xff] }
0x2cdd   :  { %v6396_v10 = vsel %vm6392_vm10, %v6384_v11, %v6394_v19 }
0x2cde   :  { %v6403_v56 = vsel %vm589_vm8, %v6399_v43, -inf  ;;  %v6398_v0 = vadd.f32 %v10710_v3, %v6396_v10 }
0x2cdf   :  { %6404 = vmax.xlane.f32.xlu1 %v6403_v56 }
0x2ce0   :  { %v6400_v12 = vsel %vm589_vm8, %v6398_v0, -inf }
0x2ce1   :  { %6401 = vmax.xlane.f32.xlu0 %v6400_v12 }
0x2cf0   :  { %6625 = vrot.lane.b32.xlu1 %v6602_v18, %s11059_s4  ;;  %v12771_v18 = vld [vmem:[#allocation11] sm:$0xf] }
0x2cf4   :  { %6619 = vrot.lane.b32.xlu1 %v6599_v20, %s11059_s4 }
0x2cf7   :  { %6623 = vrot.lane.b32.xlu0 %v6601_v16, %s11059_s4 }
0x2cf8   :  { %6687 = vrot.lane.b32.xlu1 %v5601_v47, %s11060_s21 }
0x2cfb   :  { %6689 = vrot.lane.b32.xlu0 %v5602_v17, %s11060_s21  ;;  %v10522_v17 = vld [vmem:[%s13171_s16 + $0x10] sm:$0xff]  }
0x2cfc   :  { %6617 = vrot.lane.b32.xlu1 %v6598_v21, %s11059_s4 }
0x2cff   :  { %6621 = vrot.lane.b32.xlu0 %v6600_v8, %s11059_s4 }
0x2d00   :  { %6611 = vrot.lane.b32.xlu1 %v6595_v23, %s11059_s4 }
0x2d03   :  { %6615 = vrot.lane.b32.xlu0 %v6597_v13, %s11059_s4 }
0x2d04   :  { %6683 = vrot.lane.b32.xlu1 %v5599_v45, %s11060_s21  ;;  %v6146_v45 = vadd.f32 %v12664_v54, %v12682_v57  ;;  %v12833_v54 = vld [vmem:[%s13163_s8 + $0x28] sm:$0xff]  ;;  %v12847_v57 = vld [vmem:[%s13163_s8 + $0x18] sm:$0xff] }
0x2d06   :  { %v6740_v58 = vmax.f32 %v6146_v45, 0.0 }
0x2d07   :  { %6685 = vrot.lane.b32.xlu0 %v5600_v7, %s11060_s21  ;;  %v6739_v7 = vmax.f32 %v6143_v52, 0.0 }
0x2d0b   :  { %6613 = vrot.lane.b32.xlu0 %v6596_v30, %s11059_s4 }
0x2d68   :  { %v6405_v9 = vpop.xlane.xlu1 %6404 }
0x2d69   :  { %v6407_v2 = vsub.f32 %v6399_v43, %v6405_v9 }
0x2d6a   :  { %v6402_v39 = vpop.xlane.xlu0 %6401 }
0x2d6b   :  { %v6406_v42 = vsub.f32 %v6398_v0, %v6402_v39  ;;  %v6410_v11 = vmul.f32 1.442695, %v6407_v2 }
0x2d6c   :  { %v6626_v49 = vpop.permute.xlu1 %6625 }
0x2d6d   :  { %v6408_v15 = vmul.f32 1.442695, %v6406_v42  ;;  %v12854_v42 = vld [vmem:[%s13163_s8 + $0x10] sm:$0xff] }
0x2d6e   :  { %v6624_v19 = vpop.permute.xlu0 %6623 }
0x2d6f   :  { %10613 = vpow2.f32 %v6408_v15  ;;  %v6630_v34 = vsel %vm414_vm5, %v6624_v19, %v6626_v49  ;;  %v12868_v49 = vld [vmem:[%s13163_s8] sm:$0xff] }
0x2d70   :  { %10615 = vpow2.f32 %v6410_v11  ;;  %v6620_v28 = vpop.permute.xlu1 %6619  ;;  %v12861_v11 = vld [vmem:[%s13163_s8 + $0x8] sm:$0xff]  ;;  %v9038_v15 = vld [vmem:[%s13172_s17] ss:$0 sm:$0xff]  ;;  %s11061_s8 = smov 72   ;;  %s11062_s17 = smov 76  }
0x2d72   :  { %v6690_v5 = vpop.permute.xlu0 %6689 }
0x2d74   :  { %v6688_v31 = vpop.permute.xlu1 %6687 }
0x2d76   :  { %v6622_v10 = vpop.permute.xlu0 %6621 }
0x2d77   :  { %v6629_v63 = vsel %vm414_vm5, %v6620_v28, %v6622_v10 }
0x2d78   :  { %v6618_v59 = vpop.permute.xlu1 %6617 }
0x2d7a   :  { %v6616_v56 = vpop.permute.xlu0 %6615 }
0x2d7b   :  { %v6628_v43 = vsel %vm414_vm5, %v6616_v56, %v6618_v59  ;;  %v12889_v56 = vld [vmem:[#allocation14] sm:$0xff] }
0x2d7c   :  { %v10614_v3 = vpop.eup %10613  ;;  %v6612_v12 = vpop.permute.xlu1 %6611 }
0x2d7d   :  { %v10616_v0 = vpop.eup %10615  ;;  %10157 = vmatprep.mubr.msk.f32.mxu1 %vm589_vm8, %v10614_v3 }
0x2d7e   :  { %10158 = vmatmul.mubr.msk.f32.vlgmr.msra.gmra.mxu1 %vm589_vm8, %v10616_v0  ;;  %v6686_v32 = vpop.permute.xlu0 %6685 }
0x2d7f   :  { %10178 = vmatpush3.bf16.msra.mxu1 %v6690_v5  ;;  %10185 = vmatprep.mubr.msk.bf16.mxu1 %vm11056_vm13, %v11053_v1 }
0x2d80   :  { %10179 = vmatprep.subr.bf16.mxu1 %v11053_v1  ;;  %v6684_v60 = vpop.permute.xlu1 %6683 }
0x2d83   :  { %10180 = vmatpush3.bf16.msra.mxu1 %v6688_v31 }
0x2d84   :  { %10181 = vmatprep.subr.bf16.mxu1 %v11053_v1 }
0x2d87   :  { %10182 = vmatpush3.bf16.msra.mxu1 %v6686_v32  ;;  %v12896_v32 = vld [vmem:[#allocation13] sm:$0xff] }
0x2d88   :  { %10183 = vmatprep.subr.bf16.mxu1 %v11053_v1 }
0x2d8b   :  { %10184 = vmatpush3.bf16.msra.mxu1 %v6684_v60 }
0x2d8c   :  { %10201 = vmatprep.subr.msk.mxu1 %vm333_vm3, %v12771_v18 }
0x2d8e   :  { %10186 = vmatmul.mubr.msk.bf16.vlgmr.msra.gmra.mxu1 %vm589_vm8, %v5598_v24  ;;  %v6614_v24 = vpop.permute.xlu0 %6613 }
0x2d8f   :  { %10202 = vmatpush3.msk.msra.mxu1 %vm333_vm3, %v12771_v18  ;;  %v6627_v55 = vsel %vm414_vm5, %v6612_v12, %v6614_v24 }
0x2e3e   :  { %v10159_v62 = vpop.f32.mrf.mxu1 }
0x2e40   :  { %v6484_v36 = vpop.f32.mrf.mxu1 }
0x2e41   :  { %10617 = vrcp.f32 %v6484_v36  ;;  %v12899_v36 = vld [vmem:[#allocation14 + $0x8] sm:$0xff] }
0x2e42   :  { %10619 = vrcp.f32 %v10159_v62 }
0x2e4e   :  { %v10618_v37 = vpop.eup %10617  ;;  %v6732_v20 = vpop.f32.mrf.mxu1 }
0x2e4f   :  { %v10620_v27 = vpop.eup %10619  ;;  %10162 = vmatprep.mubr.msk.f32.mxu0 %vm328_vm4, %v10618_v37 }
0x2e50   :  { %v10187_v50 = vpop.f32.mrf.mxu1  ;;  %10163 = vmatmul.mubr.msk.f32.vlgmr.msra.gmra.mxu0 %vm328_vm4, %v10620_v27 }
0x2e51   :  { %10166 = vmatpush3.bf16.msra.mxu0 %v6630_v34  ;;  %10173 = vmatprep.mubr.msk.bf16.mxu0 %vm11056_vm13, %v11053_v1 }
0x2e52   :  { %v6735_v40 = vpop.f32.mrf.mxu1  ;;  %10167 = vmatprep.subr.bf16.mxu0 %v11053_v1 }
0x2e54   :  { %v10188_v14 = vpop.f32.mrf.mxu1 }
0x2e55   :  { %10168 = vmatpush3.bf16.msra.mxu0 %v6629_v63 }
0x2e56   :  { %10169 = vmatprep.subr.bf16.mxu0 %v11053_v1 }
0x2e59   :  { %10170 = vmatpush3.bf16.msra.mxu0 %v6628_v43 }
0x2e5a   :  { %10171 = vmatprep.subr.bf16.mxu0 %v11053_v1 }
0x2e5d   :  { %10172 = vmatpush3.bf16.msra.mxu0 %v6627_v55 }
0x2e5e   :  { %10189 = vmatprep.subr.bf16.mxu0 %v11053_v1 }
0x2f10   :  { %v10164_v16 = vpop.f32.mrf.mxu0 }
0x2f11   :  { %v6577_v47 = vmul.f32 %v10616_v0, %v10164_v16 }
0x2f12   :  { %v6567_v53 = vpop.f32.mrf.mxu0 }
0x2f13   :  { %v6576_v26 = vmul.f32 %v10614_v3, %v6567_v53  ;;  %v12893_v3 = vld [vmem:[#allocation13 + $0x8] sm:$0xff] }
0x2f15   :  { %v6594_v25 = vpack.c.bf16 %v6577_v47, %v6576_v26  ;;  %v10724_v47 = vld [vmem:[#allocation5 + $0x8] sm:$0xff] }
0x2f17   :  { %10174 = vmatmul.mubr.msk.bf16.vlgmr.msra.gmra.mxu0 %vm589_vm8, %v6594_v25 }
0x2f18   :  { %10197 = vmatprep.mubr.msk.bf16.mxu0 %vm11056_vm13, %v11053_v1  ;;  %10190 = vmatpush3.bf16.msra.mxu0 %v10521_v41 }
0x2f19   :  { %10191 = vmatprep.subr.bf16.mxu0 %v11053_v1 }
0x2f1c   :  { %10192 = vmatpush3.bf16.msra.mxu0 %v10522_v17  ;;  %v10725_v17 = vld [vmem:[#allocation5] sm:$0xff] }
0x2f1d   :  { %10193 = vmatprep.subr.bf16.mxu0 %v11053_v1 }
0x2f20   :  { %10194 = vmatpush3.bf16.msra.mxu0 %v10523_v35 }
0x2f21   :  { %10195 = vmatprep.subr.bf16.mxu0 %v11053_v1 }
0x2f24   :  { %10196 = vmatpush3.bf16.msra.mxu0 %v10524_v44 }
0x2f25   :  { %10218 = vmatprep.subr.mxu0 %v12811_v48 }
0x2fd7   :  { %v6672_v21 = vpop.f32.mrf.mxu0 }
0x2fd8   :  { %v6733_v6 = vadd.f32 %v6732_v20, %v6672_v21 }
0x2fd9   :  { %v10175_v61 = vpop.f32.mrf.mxu0 }
0x2fda   :  { %v6741_v38 = vmax.f32 %v6733_v6, 0.0 }
0x2fdb   :  { %v6675_v8 = vpop.f32.mrf.mxu0 }
0x2fdc   :  { %v6736_v23 = vadd.f32 %v6735_v40, %v6675_v8 }
0x2fdd   :  { %v10176_v46 = vpop.f32.mrf.mxu0 }
0x2fde   :  { %v6742_v22 = vmax.f32 %v6736_v23, 0.0 }
0x2fe0   :  { %v10464_v13 = vpack.i.bf16 %v6742_v22, %v6741_v38 }
0x2fe2   :  { %10465 = vrot.lane.b32.xlu0 %v10464_v13, %s11058_s25 }
0x3054   :  { %v10466_v51 = vpop.permute.xlu0 %10465 }
0x3055   :  { %v10468_v29 = vunpack.i.h.bf16 %v10466_v51  ;;  %v10467_v30 = vunpack.i.l.bf16 %v10466_v51 }
0x3057   :  { %v6752_v9 = vsel %vm2460_vm0, %v6740_v58, %v10468_v29  ;;  %v6751_v2 = vsel %vm2460_vm0, %v6739_v7, %v10467_v30 }
0x3058   :  { %v6753_v39 = vpack.c.bf16 %v6752_v9, %v6751_v2 }
0x305a   :  { %10198 = vmatmul.mubr.msk.bf16.vlgmr.msra.gmra.mxu0 %vm589_vm8, %v6753_v39 }
0x305b   :  { %10219 = vmatpush3.msra.mxu0 %v12811_v48 }
0x305c   :  { %10220 = vmatprep.subr.mxu0 %v12826_v33 }
0x305d   :  { %10221 = vmatpush3.msra.mxu0 %v12826_v33 }
0x305e   :  { %10222 = vmatprep.subr.mxu0 %v12833_v54 }
0x305f   :  { %10223 = vmatpush3.msra.mxu0 %v12833_v54 }
0x3060   :  { %10224 = vmatprep.subr.mxu0 %v12840_v4 }
0x3061   :  { %10225 = vmatpush3.msra.mxu0 %v12840_v4 }
0x3062   :  { %10226 = vmatprep.subr.mxu0 %v12847_v57 }
0x3063   :  { %10227 = vmatpush3.msra.mxu0 %v12847_v57 }
0x3064   :  { %10228 = vmatprep.subr.mxu0 %v12854_v42 }
0x3065   :  { %10229 = vmatpush3.msra.mxu0 %v12854_v42 }
0x3066   :  { %10230 = vmatprep.subr.mxu0 %v12861_v11 }
0x3067   :  { %10231 = vmatpush3.msra.mxu0 %v12861_v11 }
0x3068   :  { %10232 = vmatprep.subr.mxu0 %v12868_v49 }
0x3069   :  { %10233 = vmatpush3.msra.mxu0 %v12868_v49 }
0x306a   :  { %10254 = vmatprep.subr.msk.mxu0 %vm333_vm3, %v12771_v18 }
0x311a   :  { %v6830_v19 = vpop.f32.mrf.mxu0 }
0x311b   :  { %v12877_v34 = vadd.f32 %v9038_v15, %v6830_v19 }
0x311c   :  { %v10199_v28 = vpop.f32.mrf.mxu0 }
0x311d   :  { %6839 = vrot.lane.b32.xlu1 %v12877_v34, %s11052_s7 }
0x311e   :  { %v6833_v5 = vpop.f32.mrf.mxu0 }
0x311f   :  { %v12881_v31 = vadd.f32 %v9038_v15, %v6833_v5 }
0x3120   :  { %v10200_v10 = vpop.f32.mrf.mxu0 }
0x3121   :  { %6999 = vrot.lane.b32.xlu1 %v12877_v34, %s11061_s8  ;;  %6841 = vrot.lane.b32.xlu0 %v12881_v31, %s11052_s7  ;;  %s13189_s7 = smov 8  }
0x3125   :  { %7001 = vrot.lane.b32.xlu0 %v12881_v31, %s11061_s8 }
0x318f   :  { %v6840_v63 = vpop.permute.xlu1 %6839 }
0x3190   :  { %10203 = vmatprep.mubr.msk.f32.mxu1 %vm328_vm4, %v6840_v63 }
0x3193   :  { %v6842_v59 = vpop.permute.xlu0 %6841  ;;  %v7000_v62 = vpop.permute.xlu1 %6999 }
0x3194   :  { %10204 = vmatmul.mubr.msk.f32.vlgmr.msra.gmra.mxu1 %vm328_vm4, %v6842_v59 }
0x3195   :  { %10210 = vmatprep.mubr.msk.f32.mxu1 %vm414_vm5, %v12889_v56 }
0x3197   :  { %v7002_v37 = vpop.permute.xlu0 %7001 }
0x3254   :  { %v10205_v43 = vpop.f32.mrf.mxu1 }
0x3255   :  { %v6923_v0 = vmul.f32 %v12893_v3, %v10205_v43 }
0x3256   :  { %v6913_v12 = vpop.f32.mrf.mxu1 }
0x3257   :  { %v6922_v60 = vmul.f32 %v12896_v32, %v6913_v12  ;;  %10206 = vmatprep.subr.mxu1 %v6923_v0 }
0x3258   :  { %10207 = vmatpush3.msra.mxu1 %v6923_v0 }
0x3259   :  { %10208 = vmatprep.subr.mxu1 %v6922_v60 }
0x325a   :  { %10209 = vmatpush3.msra.mxu1 %v6922_v60 }
0x325b   :  { %10211 = vmatmul.mubr.msk.f32.vlgmr.msra.gmra.mxu1 %vm414_vm5, %v12899_v36  ;;  %10213 = vmatprep.subr.msk.mxu1 %vm333_vm3, %v12771_v18 }
0x325c   :  { %10214 = vmatpush3.msk.msra.mxu1 %vm333_vm3, %v12771_v18  ;;  %10215 = vmatprep.mubr.msk.f32.mxu1 %vm328_vm4, %v7000_v62 }
0x325d   :  { %10237 = vmatprep.subr.msk.mxu1 %vm333_vm3, %v12771_v18 }
0x325f   :  { %10216 = vmatmul.mubr.msk.f32.vlgmr.msra.gmra.mxu1 %vm328_vm4, %v7002_v37 }
0x3260   :  { %10238 = vmatpush3.msk.msra.mxu1 %vm333_vm3, %v12771_v18 }
0x3261   :  { %10242 = vmatprep.subr.msk.mxu1 %vm333_vm3, %v12771_v18 }
0x331b   :  { %v10212_v20 = vpop.f32.mrf.mxu1 }
0x331d   :  { %v6990_v27 = vpop.f32.mrf.mxu1 }
0x331f   :  { %v10217_v50 = vpop.f32.mrf.mxu1 }
0x3320   :  { %v7079_v40 = vadd.f32 %v10217_v50, %v10212_v20  ;;  %v10726_v50 = vld [vmem:[#allocation7 + $0x8] sm:$0xff] }
0x3321   :  { %v7073_v14 = vpop.f32.mrf.mxu1 }
0x3322   :  { %vm7083_vm0 = vcmp.ge.f32.partialorder %v7079_v40, 0.0  ;;  %v7085_v24 = vmul.f32 0.2, %v7079_v40  ;;  %v7074_v55 = vadd.f32 %v7073_v14, %v6990_v27 }
0x3324   :  { %vm7082_vm11 = vcmp.ge.f32.partialorder %v7074_v55, 0.0  ;;  %v7084_v16 = vmul.f32 0.2, %v7074_v55  ;;  %v7087_v53 = vsel %vm7083_vm0, %v7079_v40, %v7085_v24 }
0x3325   :  { %v7089_v26 = vadd.f32 %v10724_v47, %v7087_v53 }
0x3326   :  { %v7086_v25 = vsel %vm7082_vm11, %v7074_v55, %v7084_v16  ;;  %v10727_v55 = vld [vmem:[#allocation7] sm:$0xff] }
0x3327   :  { %v7093_v41 = vsel %vm589_vm8, %v7089_v26, -inf  ;;  %v7088_v35 = vadd.f32 %v10725_v17, %v7086_v25 }
0x3328   :  { %7094 = vmax.xlane.f32.xlu0 %v7093_v41 }
0x3329   :  { %v7090_v21 = vsel %vm589_vm8, %v7088_v35, -inf }
0x332a   :  { %7091 = vmax.xlane.f32.xlu1 %v7090_v21 }
0x333b   :  { %7293 = vrot.lane.b32.xlu1 %v12881_v31, %s11062_s17 }
0x333e   :  { %7291 = vrot.lane.b32.xlu0 %v12877_v34, %s11062_s17 }
0x333f   :  { %7451 = vrot.lane.b32.xlu1 %v12877_v34, %s13189_s7 }
0x3342   :  { %7453 = vrot.lane.b32.xlu0 %v12881_v31, %s13189_s7 }
0x33b1   :  { %v7095_v44 = vpop.xlane.xlu0 %7094 }
0x33b2   :  { %v7097_v61 = vsub.f32 %v7089_v26, %v7095_v44 }
0x33b3   :  { %v7092_v6 = vpop.xlane.xlu1 %7091 }
0x33b4   :  { %v7096_v8 = vsub.f32 %v7088_v35, %v7092_v6  ;;  %v7100_v23 = vmul.f32 1.442695, %v7097_v61 }
0x33b5   :  { %v7292_v22 = vpop.permute.xlu0 %7291 }
0x33b6   :  { %v7098_v46 = vmul.f32 1.442695, %v7096_v8 }
0x33b7   :  { %v7294_v38 = vpop.permute.xlu1 %7293 }
0x33b8   :  { %10621 = vpow2.f32 %v7098_v46 }
0x33b9   :  { %10623 = vpow2.f32 %v7100_v23  ;;  %v7454_v51 = vpop.permute.xlu0 %7453 }
0x33bb   :  { %v7452_v45 = vpop.permute.xlu1 %7451 }
0x33c5   :  { %v10622_v13 = vpop.eup %10621 }
0x33c6   :  { %v10624_v52 = vpop.eup %10623  ;;  %10234 = vmatprep.mubr.msk.f32.mxu0 %vm589_vm8, %v10622_v13 }
0x33c7   :  { %10235 = vmatmul.mubr.msk.f32.vlgmr.msra.gmra.mxu0 %vm589_vm8, %v10624_v52 }
0x33c8   :  { %10256 = vmatprep.mubr.msk.f32.mxu0 %vm328_vm4, %v7452_v45  ;;  %10255 = vmatpush3.msk.msra.mxu0 %vm333_vm3, %v12771_v18 }
0x33c9   :  { %10278 = vmatprep.subr.msk.mxu0 %vm333_vm3, %v12771_v18 }
0x33cb   :  { %10257 = vmatmul.mubr.msk.f32.vlgmr.msra.gmra.mxu0 %vm328_vm4, %v7454_v51 }
0x33cc   :  { %10279 = vmatpush3.msk.msra.mxu0 %vm333_vm3, %v12771_v18 }
0x33cd   :  { %10283 = vmatprep.subr.msk.mxu0 %vm333_vm3, %v12771_v18 }
0x3487   :  { %v10236_v7 = vpop.f32.mrf.mxu0 }
0x3489   :  { %v7174_v58 = vpop.f32.mrf.mxu0 }
0x348a   :  { %10625 = vrcp.f32 %v7174_v58 }
0x348b   :  { %10627 = vrcp.f32 %v10236_v7  ;;  %v10258_v59 = vpop.f32.mrf.mxu0 }
0x348d   :  { %v7525_v12 = vpop.f32.mrf.mxu0 }
0x3497   :  { %v10626_v29 = vpop.eup %10625 }
0x3498   :  { %v10628_v30 = vpop.eup %10627  ;;  %10239 = vmatprep.mubr.msk.f32.mxu1 %vm328_vm4, %v10626_v29 }
0x3499   :  { %10240 = vmatmul.mubr.msk.f32.vlgmr.msra.gmra.mxu1 %vm328_vm4, %v10628_v30 }
0x349a   :  { %10243 = vmatpush3.msk.msra.mxu1 %vm333_vm3, %v12771_v18  ;;  %10244 = vmatprep.mubr.msk.f32.mxu1 %vm328_vm4, %v7292_v22 }
0x349d   :  { %10245 = vmatmul.mubr.msk.f32.vlgmr.msra.gmra.mxu1 %vm328_vm4, %v7294_v38 }
0x349e   :  { %10251 = vmatprep.mubr.msk.f32.mxu1 %vm414_vm5, %v12889_v56 }
0x3559   :  { %v10241_v9 = vpop.f32.mrf.mxu1 }
0x355a   :  { %v12943_v39 = vmul.f32 %v10624_v52, %v10241_v9 }
0x355b   :  { %v7257_v2 = vpop.f32.mrf.mxu1 }
0x355c   :  { %v12945_v15 = vmul.f32 %v10622_v13, %v7257_v2 }
0x355d   :  { %v10246_v19 = vpop.f32.mrf.mxu1 }
0x355e   :  { %v7286_v28 = vpack.c.bf16 %v12943_v39, %v12945_v15  ;;  %v7375_v5 = vmul.f32 %v12893_v3, %v10246_v19 }
0x355f   :  { %v7365_v10 = vpop.f32.mrf.mxu1 }
0x3560   :  { %v7374_v63 = vmul.f32 %v12896_v32, %v7365_v10  ;;  %10247 = vmatprep.subr.mxu1 %v7375_v5 }
0x3561   :  { %10248 = vmatpush3.msra.mxu1 %v7375_v5 }
0x3562   :  { %10249 = vmatprep.subr.mxu1 %v7374_v63 }
0x3563   :  { %10250 = vmatpush3.msra.mxu1 %v7374_v63 }
0x3564   :  { %10252 = vmatmul.mubr.msk.f32.vlgmr.msra.gmra.mxu1 %vm414_vm5, %v12899_v36  ;;  %10259 = vmatprep.subr.mxu1 %v12811_v48 }
0x3565   :  { %10260 = vmatpush3.msra.mxu1 %v12811_v48 }
0x3566   :  { %10261 = vmatprep.subr.mxu1 %v12826_v33 }
0x3567   :  { %10262 = vmatpush3.msra.mxu1 %v12826_v33 }
0x3568   :  { %10263 = vmatprep.subr.mxu1 %v12833_v54 }
0x3569   :  { %10264 = vmatpush3.msra.mxu1 %v12833_v54 }
0x356a   :  { %10265 = vmatprep.subr.mxu1 %v12840_v4 }
0x356b   :  { %10266 = vmatpush3.msra.mxu1 %v12840_v4 }
0x356c   :  { %10267 = vmatprep.subr.mxu1 %v12847_v57 }
0x356d   :  { %10268 = vmatpush3.msra.mxu1 %v12847_v57 }
0x356e   :  { %10269 = vmatprep.subr.mxu1 %v12854_v42 }
0x356f   :  { %10270 = vmatpush3.msra.mxu1 %v12854_v42 }
0x3570   :  { %10271 = vmatprep.subr.mxu1 %v12861_v11 }
0x3571   :  { %10272 = vmatpush3.msra.mxu1 %v12861_v11 }
0x3572   :  { %10273 = vmatprep.subr.mxu1 %v12868_v49 }
0x3573   :  { %10274 = vmatpush3.msra.mxu1 %v12868_v49 }
0x3574   :  { %10300 = vmatprep.subr.mxu1 %v12811_v48 }
0x3624   :  { %v10253_v43 = vpop.f32.mrf.mxu1 }
0x3625   :  { %v7531_v0 = vadd.f32 %v10258_v59, %v10253_v43 }
0x3626   :  { %v7442_v60 = vpop.f32.mrf.mxu1 }
0x3627   :  { %vm7535_vm12 = vcmp.ge.f32.partialorder %v7531_v0, 0.0  ;;  %v7537_v62 = vmul.f32 0.2, %v7531_v0  ;;  %v7526_v37 = vadd.f32 %v7525_v12, %v7442_v60 }
0x3629   :  { %vm7534_vm14 = vcmp.ge.f32.partialorder %v7526_v37, 0.0  ;;  %v7536_v20 = vmul.f32 0.2, %v7526_v37  ;;  %v7539_v27 = vsel %vm7535_vm12, %v7531_v0, %v7537_v62  ;;  %v10728_v62 = vld [vmem:[#allocation8 + $0x8] sm:$0xff] }
0x362a   :  { %v7541_v40 = vadd.f32 %v10726_v50, %v7539_v27  ;;  %v10729_v50 = vld [vmem:[#allocation8] sm:$0xff] }
0x362b   :  { %v7538_v14 = vsel %vm7534_vm14, %v7526_v37, %v7536_v20 }
0x362c   :  { %v7545_v24 = vsel %vm589_vm8, %v7541_v40, -inf  ;;  %v7540_v16 = vadd.f32 %v10727_v55, %v7538_v14 }
0x362d   :  { %7546 = vmax.xlane.f32.xlu0 %v7545_v24  ;;  %v13029_v24 = vpack.i.bf16 %v12881_v31, %v12877_v34 }
0x362e   :  { %v7542_v53 = vsel %vm589_vm8, %v7540_v16, -inf }
0x362f   :  { %7543 = vmax.xlane.f32.xlu1 %v7542_v53 }
0x3640   :  { %7737 = vrot.lane.b32.xlu1 %v12881_v31, %s11059_s4 }
0x3643   :  { %7735 = vrot.lane.b32.xlu0 %v12877_v34, %s11059_s4  ;;  %s11064_s4 = smov 120  }
0x3644   :  { %7895 = vrot.lane.b32.xlu1 %v12877_v34, %s11063_s30 }
0x3647   :  { %7897 = vrot.lane.b32.xlu0 %v12881_v31, %s11063_s30 }
0x36b6   :  { %v7547_v47 = vpop.xlane.xlu0 %7546 }
0x36b7   :  { %v7549_v26 = vsub.f32 %v7541_v40, %v7547_v47 }
0x36b8   :  { %v7544_v25 = vpop.xlane.xlu1 %7543 }
0x36b9   :  { %v7548_v41 = vsub.f32 %v7540_v16, %v7544_v25  ;;  %v7552_v17 = vmul.f32 1.442695, %v7549_v26 }
0x36ba   :  { %v7736_v46 = vpop.permute.xlu0 %7735 }
0x36bb   :  { %v7550_v35 = vmul.f32 1.442695, %v7548_v41 }
0x36bc   :  { %v7738_v38 = vpop.permute.xlu1 %7737 }
0x36bd   :  { %10629 = vpow2.f32 %v7550_v35 }
0x36be   :  { %10631 = vpow2.f32 %v7552_v17  ;;  %v7898_v2 = vpop.permute.xlu0 %7897 }
0x36c0   :  { %v7896_v9 = vpop.permute.xlu1 %7895 }
0x36ca   :  { %v10630_v21 = vpop.eup %10629 }
0x36cb   :  { %v10632_v44 = vpop.eup %10631  ;;  %10275 = vmatprep.mubr.msk.f32.mxu1 %vm589_vm8, %v10630_v21 }
0x36cc   :  { %10276 = vmatmul.mubr.msk.f32.vlgmr.msra.gmra.mxu1 %vm589_vm8, %v10632_v44 }
0x36cd   :  { %10301 = vmatpush3.msra.mxu1 %v12811_v48 }
0x36ce   :  { %10302 = vmatprep.subr.mxu1 %v12826_v33 }
0x36cf   :  { %10303 = vmatpush3.msra.mxu1 %v12826_v33 }
0x36d0   :  { %10304 = vmatprep.subr.mxu1 %v12833_v54 }
0x36d1   :  { %10305 = vmatpush3.msra.mxu1 %v12833_v54 }
0x36d2   :  { %10306 = vmatprep.subr.mxu1 %v12840_v4 }
0x36d3   :  { %10307 = vmatpush3.msra.mxu1 %v12840_v4 }
0x36d4   :  { %10308 = vmatprep.subr.mxu1 %v12847_v57 }
0x36d5   :  { %10309 = vmatpush3.msra.mxu1 %v12847_v57 }
0x36d6   :  { %10310 = vmatprep.subr.mxu1 %v12854_v42 }
0x36d7   :  { %10311 = vmatpush3.msra.mxu1 %v12854_v42 }
0x36d8   :  { %10312 = vmatprep.subr.mxu1 %v12861_v11 }
0x36d9   :  { %10313 = vmatpush3.msra.mxu1 %v12861_v11 }
0x36da   :  { %10314 = vmatprep.subr.mxu1 %v12868_v49 }
0x36db   :  { %10315 = vmatpush3.msra.mxu1 %v12868_v49 }
0x36dc   :  { %10336 = vmatprep.subr.bf16.mxu1 %v11053_v1 }
0x378c   :  { %v10277_v61 = vpop.f32.mrf.mxu1 }
0x378e   :  { %v7626_v6 = vpop.f32.mrf.mxu1 }
0x378f   :  { %10633 = vrcp.f32 %v7626_v6 }
0x3790   :  { %10635 = vrcp.f32 %v10277_v61 }
0x379c   :  { %v10634_v8 = vpop.eup %10633 }
0x379d   :  { %v10636_v23 = vpop.eup %10635  ;;  %10280 = vmatprep.mubr.msk.f32.mxu0 %vm328_vm4, %v10634_v8 }
0x379e   :  { %10281 = vmatmul.mubr.msk.f32.vlgmr.msra.gmra.mxu0 %vm328_vm4, %v10636_v23 }
0x379f   :  { %10284 = vmatpush3.msk.msra.mxu0 %vm333_vm3, %v12771_v18  ;;  %10285 = vmatprep.mubr.msk.f32.mxu0 %vm328_vm4, %v7736_v46 }
0x37a2   :  { %10286 = vmatmul.mubr.msk.f32.vlgmr.msra.gmra.mxu0 %vm328_vm4, %v7738_v38 }
0x37a3   :  { %10292 = vmatprep.mubr.msk.f32.mxu0 %vm414_vm5, %v12889_v56 }
0x385e   :  { %v10282_v22 = vpop.f32.mrf.mxu0 }
0x385f   :  { %v13004_v52 = vmul.f32 %v10632_v44, %v10282_v22 }
0x3860   :  { %v7709_v13 = vpop.f32.mrf.mxu0 }
0x3861   :  { %v13006_v45 = vmul.f32 %v10630_v21, %v7709_v13  ;;  %v13042_v13 = vpack.c.bf16 %v12881_v31, %v12877_v34 }
0x3862   :  { %v10287_v51 = vpop.f32.mrf.mxu0 }
0x3863   :  { %v7732_v7 = vpack.c.bf16 %v13004_v52, %v13006_v45  ;;  %v7819_v58 = vmul.f32 %v12893_v3, %v10287_v51 }
0x3864   :  { %v7809_v29 = vpop.f32.mrf.mxu0 }
0x3865   :  { %v7818_v30 = vmul.f32 %v12896_v32, %v7809_v29  ;;  %10288 = vmatprep.subr.mxu0 %v7819_v58 }
0x3866   :  { %10289 = vmatpush3.msra.mxu0 %v7819_v58 }
0x3867   :  { %10290 = vmatprep.subr.mxu0 %v7818_v30 }
0x3868   :  { %10291 = vmatpush3.msra.mxu0 %v7818_v30 }
0x3869   :  { %10293 = vmatmul.mubr.msk.f32.vlgmr.msra.gmra.mxu0 %vm414_vm5, %v12899_v36  ;;  %10295 = vmatprep.subr.msk.mxu0 %vm333_vm3, %v12771_v18 }
0x386a   :  { %10296 = vmatpush3.msk.msra.mxu0 %vm333_vm3, %v12771_v18  ;;  %10297 = vmatprep.mubr.msk.f32.mxu0 %vm328_vm4, %v7896_v9 }
0x386b   :  { %10319 = vmatprep.subr.msk.mxu0 %vm333_vm3, %v12771_v18 }
0x386d   :  { %10298 = vmatmul.mubr.msk.f32.vlgmr.msra.gmra.mxu0 %vm328_vm4, %v7898_v2 }
0x386e   :  { %10320 = vmatpush3.msk.msra.mxu0 %vm333_vm3, %v12771_v18 }
0x386f   :  { %10324 = vmatprep.subr.bf16.mxu0 %v11053_v1 }
0x3929   :  { %v10294_v19 = vpop.f32.mrf.mxu0 }
0x392b   :  { %v7886_v5 = vpop.f32.mrf.mxu0 }
0x392d   :  { %v10299_v10 = vpop.f32.mrf.mxu0 }
0x392e   :  { %v7975_v63 = vadd.f32 %v10299_v10, %v10294_v19 }
0x392f   :  { %v7969_v59 = vpop.f32.mrf.mxu0 }
0x3930   :  { %vm7979_vm15 = vcmp.ge.f32.partialorder %v7975_v63, 0.0  ;;  %v7981_v43 = vmul.f32 0.2, %v7975_v63  ;;  %v7970_v0 = vadd.f32 %v7969_v59, %v7886_v5 }
0x3932   :  { %vm7978_vm1 = vcmp.ge.f32.partialorder %v7970_v0, 0.0  ;;  %v7980_v12 = vmul.f32 0.2, %v7970_v0  ;;  %v7983_v60 = vsel %vm7979_vm15, %v7975_v63, %v7981_v43 }
0x3933   :  { %v7985_v37 = vadd.f32 %v10728_v62, %v7983_v60 }
0x3934   :  { %v7982_v20 = vsel %vm7978_vm1, %v7970_v0, %v7980_v12 }
0x3935   :  { %v7989_v27 = vsel %vm589_vm8, %v7985_v37, -inf  ;;  %v7984_v40 = vadd.f32 %v10729_v50, %v7982_v20 }
0x3936   :  { %7990 = vmax.xlane.f32.xlu0 %v7989_v27 }
0x3937   :  { %v7986_v14 = vsel %vm589_vm8, %v7984_v40, -inf }
0x3938   :  { %7987 = vmax.xlane.f32.xlu1 %v7986_v14 }
0x3949   :  { %10475 = vrot.lane.b32.xlu1 %v13029_v24, %s11050_s10  ;;  %s11066_s10 = smov 4  }
0x394c   :  { %10470 = vrot.lane.b32.xlu0 %v13029_v24, %s11049_s26  ;;  %s11065_s26 = smov 12  }
0x394d   :  { %10480 = vrot.lane.b32.xlu1 %v13029_v24, %s11064_s4 }
0x39bf   :  { %v7991_v55 = vpop.xlane.xlu0 %7990 }
0x39c0   :  { %v7993_v16 = vsub.f32 %v7985_v37, %v7991_v55 }
0x39c1   :  { %v7988_v53 = vpop.xlane.xlu1 %7987 }
0x39c2   :  { %v7992_v47 = vsub.f32 %v7984_v40, %v7988_v53  ;;  %v7996_v26 = vmul.f32 1.442695, %v7993_v16 }
0x39c3   :  { %v10471_v25 = vpop.permute.xlu0 %10470 }
0x39c4   :  { %v7994_v41 = vmul.f32 1.442695, %v7992_v47  ;;  %v10473_v17 = vunpack.i.h.bf16 %v10471_v25  ;;  %v10472_v35 = vunpack.i.l.bf16 %v10471_v25  ;;  %v10730_v47 = vld [vmem:[#allocation10 + $0x8] sm:$0xff] }
0x39c5   :  { %v10476_v21 = vpop.permute.xlu1 %10475 }
0x39c6   :  { %10637 = vpow2.f32 %v7994_v41  ;;  %v7290_v44 = vpack.c.bf16 %v10473_v17, %v10472_v35  ;;  %v10478_v61 = vunpack.i.h.bf16 %v10476_v21  ;;  %v10477_v6 = vunpack.i.l.bf16 %v10476_v21  ;;  %v10731_v17 = vld [vmem:[#allocation10] sm:$0xff] }
0x39c7   :  { %10639 = vpow2.f32 %v7996_v26 }
0x39c8   :  { %v7289_v8 = vpack.c.bf16 %v10478_v61, %v10477_v6  ;;  %8175 = vrot.lane.b32.xlu0 %v7290_v44, %s11047_s15 }
0x39c9   :  { %v10481_v23 = vpop.permute.xlu1 %10480 }
0x39ca   :  { %v10483_v46 = vunpack.i.h.bf16 %v10481_v23  ;;  %v10482_v38 = vunpack.i.l.bf16 %v10481_v23  ;;  %8173 = vrot.lane.b32.xlu1 %v7289_v8, %s11047_s15 }
0x39cc   :  { %v13038_v22 = vpack.c.bf16 %v10483_v46, %v10482_v38 }
0x39ce   :  { %8171 = vrot.lane.b32.xlu0 %v13038_v22, %s11047_s15  ;;  %8169 = vrot.lane.b32.xlu1 %v13042_v13, %s11047_s15  ;;  %s11067_s15 = smov 124  }
0x39d2   :  { %8267 = vrot.lane.b32.xlu0 %v12877_v34, %s11065_s26  ;;  %8269 = vrot.lane.b32.xlu1 %v12881_v31, %s11065_s26 }
0x39d3   :  { %v10638_v51 = vpop.eup %10637 }
0x39d4   :  { %v10640_v58 = vpop.eup %10639  ;;  %10316 = vmatprep.mubr.msk.f32.mxu1 %vm589_vm8, %v10638_v51 }
0x39d5   :  { %10317 = vmatmul.mubr.msk.f32.vlgmr.msra.gmra.mxu1 %vm589_vm8, %v10640_v58 }
0x39d6   :  { %10337 = vmatpush3.bf16.msra.mxu1 %v7290_v44  ;;  %8427 = vrot.lane.b32.xlu0 %v12877_v34, %s11066_s10 }
0x39d7   :  { %8429 = vrot.lane.b32.xlu1 %v12881_v31, %s11066_s10  ;;  %10338 = vmatprep.subr.bf16.mxu1 %v11053_v1 }
0x39d8   :  { %10344 = vmatprep.mubr.msk.bf16.mxu1 %vm11056_vm13, %v11053_v1 }
0x39da   :  { %10339 = vmatpush3.bf16.msra.mxu1 %v7289_v8 }
0x39db   :  { %10340 = vmatprep.subr.bf16.mxu1 %v11053_v1 }
0x39de   :  { %10341 = vmatpush3.bf16.msra.mxu1 %v13038_v22 }
0x39df   :  { %10342 = vmatprep.subr.bf16.mxu1 %v11053_v1 }
0x39e2   :  { %10343 = vmatpush3.bf16.msra.mxu1 %v13042_v13 }
0x39e3   :  { %10365 = vmatprep.subr.mxu1 %v12811_v48 }
0x39e5   :  { %10345 = vmatmul.mubr.msk.bf16.vlgmr.msra.gmra.mxu1 %vm589_vm8, %v7286_v28 }
0x39e6   :  { %10366 = vmatpush3.msra.mxu1 %v12811_v48 }
0x39e7   :  { %10367 = vmatprep.subr.mxu1 %v12826_v33 }
0x39e8   :  { %10368 = vmatpush3.msra.mxu1 %v12826_v33 }
0x39e9   :  { %10369 = vmatprep.subr.mxu1 %v12833_v54 }
0x39ea   :  { %10370 = vmatpush3.msra.mxu1 %v12833_v54 }
0x39eb   :  { %10371 = vmatprep.subr.mxu1 %v12840_v4 }
0x39ec   :  { %10372 = vmatpush3.msra.mxu1 %v12840_v4 }
0x39ed   :  { %10373 = vmatprep.subr.mxu1 %v12847_v57 }
0x39ee   :  { %10374 = vmatpush3.msra.mxu1 %v12847_v57 }
0x39ef   :  { %10375 = vmatprep.subr.mxu1 %v12854_v42 }
0x39f0   :  { %10376 = vmatpush3.msra.mxu1 %v12854_v42 }
0x39f1   :  { %10377 = vmatprep.subr.mxu1 %v12861_v11 }
0x39f2   :  { %10378 = vmatpush3.msra.mxu1 %v12861_v11 }
0x39f3   :  { %10379 = vmatprep.subr.mxu1 %v12868_v49 }
0x39f4   :  { %10380 = vmatpush3.msra.mxu1 %v12868_v49 }
0x39f5   :  { %10401 = vmatprep.subr.bf16.mxu1 %v11053_v1 }
0x3a3a   :  { %v8176_v42 = vpop.permute.xlu0 %8175 }
0x3a3c   :  { %v8174_v49 = vpop.permute.xlu1 %8173 }
0x3a40   :  { %v8172_v39 = vpop.permute.xlu0 %8171  ;;  %v8170_v15 = vpop.permute.xlu1 %8169 }
0x3a44   :  { %v8268_v19 = vpop.permute.xlu0 %8267  ;;  %v8270_v5 = vpop.permute.xlu1 %8269 }
0x3a48   :  { %v8428_v27 = vpop.permute.xlu0 %8427 }
0x3a95   :  { %v10318_v48 = vpop.f32.mrf.mxu1 }
0x3a97   :  { %v8070_v33 = vpop.f32.mrf.mxu1 }
0x3a98   :  { %10641 = vrcp.f32 %v8070_v33 }
0x3a99   :  { %10643 = vrcp.f32 %v10318_v48 }
0x3aa5   :  { %v10642_v54 = vpop.eup %10641  ;;  %v8261_v4 = vpop.f32.mrf.mxu1 }
0x3aa6   :  { %v10644_v57 = vpop.eup %10643  ;;  %10321 = vmatprep.mubr.msk.f32.mxu0 %vm328_vm4, %v10642_v54 }
0x3aa7   :  { %v10346_v34 = vpop.f32.mrf.mxu1  ;;  %10322 = vmatmul.mubr.msk.f32.vlgmr.msra.gmra.mxu0 %vm328_vm4, %v10644_v57 }
0x3aa8   :  { %10325 = vmatpush3.bf16.msra.mxu0 %v8176_v42  ;;  %10332 = vmatprep.mubr.msk.bf16.mxu0 %vm11056_vm13, %v11053_v1 }
0x3aa9   :  { %v8264_v11 = vpop.f32.mrf.mxu1  ;;  %10326 = vmatprep.subr.bf16.mxu0 %v11053_v1 }
0x3aab   :  { %v10347_v31 = vpop.f32.mrf.mxu1 }
0x3aac   :  { %10327 = vmatpush3.bf16.msra.mxu0 %v8174_v49 }
0x3aad   :  { %10328 = vmatprep.subr.bf16.mxu0 %v11053_v1 }
0x3ab0   :  { %10329 = vmatpush3.bf16.msra.mxu0 %v8172_v39 }
0x3ab1   :  { %10330 = vmatprep.subr.bf16.mxu0 %v11053_v1 }
0x3ab4   :  { %10331 = vmatpush3.bf16.msra.mxu0 %v8170_v15 }
0x3ab5   :  { %10348 = vmatprep.subr.msk.mxu0 %vm333_vm3, %v12771_v18 }
0x3b67   :  { %v10323_v28 = vpop.f32.mrf.mxu0 }
0x3b68   :  { %v8163_v30 = vmul.f32 %v10640_v58, %v10323_v28 }
0x3b69   :  { %v8153_v29 = vpop.f32.mrf.mxu0 }
0x3b6a   :  { %v8162_v9 = vmul.f32 %v10638_v51, %v8153_v29 }
0x3b6c   :  { %v8164_v2 = vpack.c.bf16 %v8163_v30, %v8162_v9 }
0x3b6e   :  { %10333 = vmatmul.mubr.msk.bf16.vlgmr.msra.gmra.mxu0 %vm589_vm8, %v8164_v2 }
0x3b6f   :  { %10349 = vmatpush3.msk.msra.mxu0 %vm333_vm3, %v12771_v18  ;;  %10350 = vmatprep.mubr.msk.f32.mxu0 %vm328_vm4, %v8268_v19 }
0x3b76   :  { %10351 = vmatmul.mubr.msk.f32.vlgmr.msra.gmra.mxu0 %vm328_vm4, %v8270_v5 }
0x3b77   :  { %10357 = vmatprep.mubr.msk.f32.mxu0 %vm414_vm5, %v12889_v56  ;;  %v8430_v56 = vpop.permute.xlu1 %8429 }
0x3c2e   :  { %v8218_v10 = vpop.f32.mrf.mxu0 }
0x3c2f   :  { %v8262_v63 = vadd.f32 %v8261_v4, %v8218_v10 }
0x3c30   :  { %v10334_v59 = vpop.f32.mrf.mxu0 }
0x3c31   :  { %v8810_v43 = vsel %vm8809_vm2, %v8262_v63, 0.0 }
0x3c32   :  { %8811 = vst [vmem:[#allocation22] sm:$0xff] %v8810_v43  ;;  %v8221_v0 = vpop.f32.mrf.mxu0 }
0x3c34   :  { %v10335_v12 = vpop.f32.mrf.mxu0 }
0x3c36   :  { %v10352_v60 = vpop.f32.mrf.mxu0 }
0x3c37   :  { %v8351_v62 = vmul.f32 %v12893_v3, %v10352_v60 }
0x3c38   :  { %v8341_v37 = vpop.f32.mrf.mxu0 }
0x3c39   :  { %v8350_v20 = vmul.f32 %v12896_v32, %v8341_v37  ;;  %10353 = vmatprep.subr.mxu0 %v8351_v62 }
0x3c3a   :  { %10354 = vmatpush3.msra.mxu0 %v8351_v62 }
0x3c3b   :  { %10355 = vmatprep.subr.mxu0 %v8350_v20 }
0x3c3c   :  { %10356 = vmatpush3.msra.mxu0 %v8350_v20 }
0x3c3d   :  { %10358 = vmatmul.mubr.msk.f32.vlgmr.msra.gmra.mxu0 %vm414_vm5, %v12899_v36  ;;  %10360 = vmatprep.subr.msk.mxu0 %vm333_vm3, %v12771_v18 }
0x3c3e   :  { %10361 = vmatpush3.msk.msra.mxu0 %vm333_vm3, %v12771_v18  ;;  %10362 = vmatprep.mubr.msk.f32.mxu0 %vm328_vm4, %v8428_v27 }
0x3c3f   :  { %10384 = vmatprep.subr.msk.mxu0 %vm333_vm3, %v12771_v18 }
0x3c41   :  { %10363 = vmatmul.mubr.msk.f32.vlgmr.msra.gmra.mxu0 %vm328_vm4, %v8430_v56 }
0x3c42   :  { %10385 = vmatpush3.msk.msra.mxu0 %vm333_vm3, %v12771_v18 }
0x3c43   :  { %10389 = vmatprep.subr.bf16.mxu0 %v11053_v1 }
0x3cfd   :  { %v10359_v3 = vpop.f32.mrf.mxu0 }
0x3cff   :  { %v8418_v32 = vpop.f32.mrf.mxu0 }
0x3d01   :  { %v10364_v36 = vpop.f32.mrf.mxu0 }
0x3d02   :  { %v8507_v50 = vadd.f32 %v10364_v36, %v10359_v3 }
0x3d03   :  { %v8501_v40 = vpop.f32.mrf.mxu0 }
0x3d04   :  { %vm8511_vm5 = vcmp.ge.f32.partialorder %v8507_v50, 0.0  ;;  %v8513_v14 = vmul.f32 0.2, %v8507_v50  ;;  %v8502_v55 = vadd.f32 %v8501_v40, %v8418_v32 }
0x3d06   :  { %vm8510_vm6 = vcmp.ge.f32.partialorder %v8502_v55, 0.0  ;;  %v8512_v16 = vmul.f32 0.2, %v8502_v55  ;;  %v8515_v53 = vsel %vm8511_vm5, %v8507_v50, %v8513_v14 }
0x3d07   :  { %v8517_v26 = vadd.f32 %v10730_v47, %v8515_v53 }
0x3d08   :  { %v8514_v25 = vsel %vm8510_vm6, %v8502_v55, %v8512_v16 }
0x3d09   :  { %v8521_v41 = vsel %vm589_vm8, %v8517_v26, -inf  ;;  %v8516_v18 = vadd.f32 %v10731_v17, %v8514_v25 }
0x3d0a   :  { %8522 = vmax.xlane.f32.xlu1 %v8521_v41 }
0x3d0b   :  { %v8518_v35 = vsel %vm589_vm8, %v8516_v18, -inf }
0x3d0c   :  { %8519 = vmax.xlane.f32.xlu0 %v8518_v35 }
0x3d1b   :  { %10490 = vrot.lane.b32.xlu1 %v13029_v24, %s11067_s15 }
0x3d22   :  { %10485 = vrot.lane.b32.xlu0 %v13029_v24, %s11068_s1 }
0x3d93   :  { %v8523_v21 = vpop.xlane.xlu1 %8522 }
0x3d94   :  { %v8525_v44 = vsub.f32 %v8517_v26, %v8523_v21 }
0x3d95   :  { %v8520_v61 = vpop.xlane.xlu0 %8519 }
0x3d96   :  { %v8524_v6 = vsub.f32 %v8516_v18, %v8520_v61  ;;  %v8528_v8 = vmul.f32 1.442695, %v8525_v44 }
0x3d97   :  { %v10491_v48 = vpop.permute.xlu1 %10490 }
0x3d98   :  { %v8526_v23 = vmul.f32 1.442695, %v8524_v6  ;;  %v10493_v33 = vunpack.i.h.bf16 %v10491_v48  ;;  %v10492_v54 = vunpack.i.l.bf16 %v10491_v48 }
0x3d99   :  { %v10486_v46 = vpop.permute.xlu0 %10485 }
0x3d9a   :  { %10645 = vpow2.f32 %v8526_v23  ;;  %v10488_v38 = vunpack.i.h.bf16 %v10486_v46  ;;  %v10487_v51 = vunpack.i.l.bf16 %v10486_v46  ;;  %v7733_v24 = vpack.c.bf16 %v10493_v33, %v10492_v54 }
0x3d9b   :  { %10647 = vpow2.f32 %v8528_v8 }
0x3d9c   :  { %v7734_v58 = vpack.c.bf16 %v10488_v38, %v10487_v51 }
0x3d9e   :  { %8760 = vrot.lane.b32.xlu1 %v7734_v58, %s11060_s21  ;;  %8705 = vrot.lane.b32.xlu0 %v7734_v58, %s11058_s25 }
0x3da2   :  { %8758 = vrot.lane.b32.xlu1 %v13038_v22, %s11060_s21  ;;  %8703 = vrot.lane.b32.xlu0 %v13038_v22, %s11058_s25 }
0x3da6   :  { %8756 = vrot.lane.b32.xlu1 %v7733_v24, %s11060_s21  ;;  %8701 = vrot.lane.b32.xlu0 %v7733_v24, %s11058_s25 }
0x3da7   :  { %v10646_v4 = vpop.eup %10645 }
0x3da8   :  { %v10648_v57 = vpop.eup %10647  ;;  %10381 = vmatprep.mubr.msk.f32.mxu1 %vm589_vm8, %v10646_v4 }
0x3da9   :  { %10382 = vmatmul.mubr.msk.f32.vlgmr.msra.gmra.mxu1 %vm589_vm8, %v10648_v57 }
0x3daa   :  { %8754 = vrot.lane.b32.xlu1 %v13042_v13, %s11060_s21  ;;  %8699 = vrot.lane.b32.xlu0 %v13042_v13, %s11058_s25  ;;  %s11069_s25 = smov [#allocation22]  }
0x3dab   :  { %10409 = vmatprep.mubr.msk.bf16.mxu1 %vm11056_vm13, %v11053_v1  ;;  %s8820_s21 = sshll.u32 %s11069_s25, 4  ;;  %s8821_s21 = int_to_ptr.vmem [resolvable:$true] %s8820_s21 }
0x3dac   :  { %s10972_s24 = scalar_lea.vmem %s8821_s21, 128  ;;  %p10977_p5 = scmp.lt.s32.totalorder %s8821_s21, %s8821_s21 }
0x3dad   :  { %p10973_p4 = scmp.ne.s32.totalorder %s8821_s21, %s10972_s24  ;;  %p10978_p6 = scmp.lt.s32.totalorder %s10972_s24, %s10972_s24 }
0x3daf   :  { %p10979_p7 = por %p10978_p6, %p10977_p5 }
0x3db1   :  { %p10980_p8 = pnand %p10979_p7, %p10973_p4 }
0x3e10   :  { %v8761_v22 = vpop.permute.xlu1 %8760  ;;  %v8706_v31 = vpop.permute.xlu0 %8705 }
0x3e11   :  { %10402 = vmatpush3.bf16.msra.mxu1 %v8761_v22 }
0x3e12   :  { %10403 = vmatprep.subr.bf16.mxu1 %v11053_v1 }
0x3e14   :  { %v8759_v42 = vpop.permute.xlu1 %8758  ;;  %v8704_v28 = vpop.permute.xlu0 %8703 }
0x3e15   :  { %10404 = vmatpush3.bf16.msra.mxu1 %v8759_v42 }
0x3e16   :  { %10405 = vmatprep.subr.bf16.mxu1 %v11053_v1 }
0x3e18   :  { %v8757_v34 = vpop.permute.xlu1 %8756  ;;  %v8702_v52 = vpop.permute.xlu0 %8701 }
0x3e19   :  { %10406 = vmatpush3.bf16.msra.mxu1 %v8757_v34 }
0x3e1a   :  { %10407 = vmatprep.subr.bf16.mxu1 %v11053_v1 }
0x3e1c   :  { %v8755_v11 = vpop.permute.xlu1 %8754  ;;  %v8700_v45 = vpop.permute.xlu0 %8699 }
0x3e1d   :  { %10408 = vmatpush3.bf16.msra.mxu1 %v8755_v11 }
0x3e20   :  { %10410 = vmatmul.mubr.msk.bf16.vlgmr.msra.gmra.mxu1 %vm589_vm8, %v7732_v7 }
0x3e69   :  { %v10383_v13 = vpop.f32.mrf.mxu1 }
0x3e6b   :  { %v8602_v49 = vpop.f32.mrf.mxu1 }
0x3e6c   :  { %10649 = vrcp.f32 %v8602_v49 }
0x3e6d   :  { %10651 = vrcp.f32 %v10383_v13 }
0x3e79   :  { %v10650_v39 = vpop.eup %10649 }
0x3e7a   :  { %v10652_v15 = vpop.eup %10651  ;;  %10386 = vmatprep.mubr.msk.f32.mxu0 %vm328_vm4, %v10650_v39 }
0x3e7b   :  { %10387 = vmatmul.mubr.msk.f32.vlgmr.msra.gmra.mxu0 %vm328_vm4, %v10652_v15 }
0x3e7c   :  { %10390 = vmatpush3.bf16.msra.mxu0 %v8706_v31  ;;  %10397 = vmatprep.mubr.msk.bf16.mxu0 %vm11056_vm13, %v11053_v1 }
0x3e7d   :  { %10391 = vmatprep.subr.bf16.mxu0 %v11053_v1 }
0x3e80   :  { %10392 = vmatpush3.bf16.msra.mxu0 %v8704_v28 }
0x3e81   :  { %10393 = vmatprep.subr.bf16.mxu0 %v11053_v1 }
0x3e84   :  { %10394 = vmatpush3.bf16.msra.mxu0 %v8702_v52 }
0x3e85   :  { %10395 = vmatprep.subr.bf16.mxu0 %v11053_v1 }
0x3e88   :  { %10396 = vmatpush3.bf16.msra.mxu0 %v8700_v45 }
0x3ee0   :  { %v8803_v7 = vpop.f32.mrf.mxu1 }
0x3ee2   :  { %v10411_v29 = vpop.f32.mrf.mxu1 }
0x3ee4   :  { %v8805_v30 = vpop.f32.mrf.mxu1 }
0x3ee6   :  { %v10412_v9 = vpop.f32.mrf.mxu1 }
0x3f3b   :  { %v10388_v2 = vpop.f32.mrf.mxu0 }
0x3f3c   :  { %v8695_v5 = vmul.f32 %v10648_v57, %v10388_v2 }
0x3f3d   :  { %v8685_v19 = vpop.f32.mrf.mxu0 }
0x3f3e   :  { %v8694_v10 = vmul.f32 %v10646_v4, %v8685_v19 }
0x3f40   :  { %v8696_v63 = vpack.c.bf16 %v8695_v5, %v8694_v10 }
0x3f42   :  { %10398 = vmatmul.mubr.msk.bf16.vlgmr.msra.gmra.mxu0 %vm589_vm8, %v8696_v63 }
0x3f43   :  { %10983 = shalt.err (!%p10980_p8)
}
0x3f44   :  { %8823 = dma.vmem_to_hbm [thread:$0]  %s8821_s21, 128, %s13173_s18, [#allocation4]  }
0x3f45   :  { %s11070_s28 = smov [#allocation23]  }
0x3f46   :  { %s8830_s6 = sshll.u32 %s11070_s28, 4  ;;  %s8831_s6 = int_to_ptr.vmem [resolvable:$true] %s8830_s6 }
0x3f47   :  { %s10992_s29 = scalar_lea.vmem %s8831_s6, 128  ;;  %p10997_p10 = scmp.lt.s32.totalorder %s8831_s6, %s8831_s6 }
0x3f48   :  { %p10993_p9 = scmp.ne.s32.totalorder %s8831_s6, %s10992_s29  ;;  %p10998_p11 = scmp.lt.s32.totalorder %s10992_s29, %s10992_s29 }
0x3f4a   :  { %p10999_p12 = por %p10998_p11, %p10997_p10 }
0x3f4c   :  { %p11000_p13 = pnand %p10999_p12, %p10993_p9 }
0x4002   :  { %v8748_v1 = vpop.f32.mrf.mxu0 }
0x4004   :  { %v10399_v59 = vpop.f32.mrf.mxu0 }
0x4006   :  { %v8750_v43 = vpop.f32.mrf.mxu0 }
0x4007   :  { %v8806_v0 = vadd.f32 %v8805_v30, %v8750_v43 }
0x4008   :  { %v10400_v12 = vpop.f32.mrf.mxu0 }
0x4009   :  { %v8812_v60 = vsel %vm328_vm4, %v8806_v0, 0.0 }
0x400a   :  { %8813 = vst [vmem:[#allocation23] sm:$0xff] %v8812_v60 }
0x400b   :  { %11003 = shalt.err (!%p11000_p13)
}
0x400c   :  { %8833 = dma.vmem_to_hbm [thread:$0]  %s8831_s6, 128, %s13174_s19, [#allocation24]  }
0x400d   :  { %11026 = dma.done.wait [#allocation4], 128  }
0x400e   :  { %11027 = vsyncadd [#allocation4], 4294967168 }
0x400f   :  { %11028 = dma.done.wait [#allocation24], 128  }
0x4010   :  { %11029 = vsyncadd [#allocation24], 4294967168 }
0x4011   :  { %8840 = vsyncpa [#allocation3], 1 }
0x4012   :  { %8841 = vsyncpa [#allocation6], 1 }
0x4013   :  { %8842 = vsyncpa [#allocation9], 1 }
0x4014   :  { %8843 = vsyncpa [#allocation12], 1 }
0x4015   :  { %8844 = vsyncpa [#allocation15], 1 }
0x4016   :  { %8845 = vsyncpa [#allocation18], 1 }
0x4017   :  { %8846 = vsyncpa [#allocation21], 1 }
0x4018   :  { %8847 = vsyncpa [#allocation4], 1 }
0x4019   :  { %8848 = vsyncpa [#allocation24], 1 }

</bundles_post_ra>
